<compile_context>
chip_gen: v7x
topology: tpu7x:2x2x1
jax: 0.10.0
libtpu: 0.0.40
codegen_flags: <defaults>
</compile_context>

<pallas_src>
import functools

import numpy as np
import jax
import jax.numpy as jnp
from jax.experimental import pallas as pl
from jax.experimental.pallas import tpu as pltpu

BN_EPS = 1e-5
LANES = 128


def _round_up(x, m):
    return -(-x // m) * m


def _vmem_limit_bytes():
    # ~75% of physical VMEM: ~96 MiB on v5e/v6e (128 MiB), ~48 MiB on v7x
    # (64 MiB).  Falls back to a safe 48 MiB if the query is unavailable.
    try:
        phys = int(pltpu.get_tpu_info().vmem_capacity_bytes)
        return max(32 * 1024 * 1024, (phys * 3) // 4)
    except Exception:
        return 48 * 1024 * 1024


# --------------------------- Pallas kernels ---------------------------------

def _dilconv_fused_kernel(xp_ref, dw_ref, pw_ref,      # inputs
                          y_ref, stats_ref,            # outputs
                          *, kh, kw, dilation, ho, wo, th):
    """One batch image per grid step (batch axis is "parallel").

    xp_ref    : (Hp, Wp, Cp)   bf16  spatially + channel padded NHWC image
    dw_ref    : (kh*kw, Cp)    f32   depthwise taps, row t = tap (i, j), t=i*kw+j
    pw_ref    : (Cp, Cpo)      bf16  pointwise 1x1 weights
    y_ref     : (Ho*Wo, Cpo)   bf16  pre-BN activation for this image
    stats_ref : (2, Cpo)       f32   per-image [sum(z), sum(z*z)]
    """
    cp = xp_ref.shape[-1]
    cpo = y_ref.shape[-1]

    dw = dw_ref[...]                                   # (kh*kw, Cp) f32
    pw = pw_ref[...]                                   # (Cp, Cpo)  bf16
    # Hoist the per-tap broadcasts out of the loops (JAX does not CSE them).
    dw_rows = [dw[t].reshape(1, 1, cp) for t in range(kh * kw)]

    s_acc = jnp.zeros((1, cpo), jnp.float32)
    q_acc = jnp.zeros((1, cpo), jnp.float32)

    slab_h = th + (kh - 1) * dilation
    for rt in range(ho // th):                         # static row-tile loop
        r0 = rt * th
        acc = None                                     # vreg accumulator (th, Wo, Cp) f32
        for j in range(kw):
            # One unaligned W (sublane) slice + ReLU + f32 upcast per j
            # (kw passes) instead of per tap (kh*kw passes).
            xslab = xp_ref[pl.ds(r0, slab_h), pl.ds(j * dilation, wo), :]
            xslab = jnp.maximum(xslab, 0).astype(jnp.float32)   # (slab_h, Wo, Cp)
            for i in range(kh):
                x_tap = xslab[i * dilation:i * dilation + th]   # leading-axis slice: free
                contrib = x_tap * dw_rows[i * kw + j]
                acc = contrib if acc is None else acc + contrib

        # Pointwise 1x1 conv on the row tile: one lane-dense MXU GEMM.
        lhs = acc.reshape(th * wo, cp).astype(jnp.bfloat16)
        z = jnp.dot(lhs, pw, preferred_element_type=jnp.float32)  # (th*Wo, Cpo) f32
        y_ref[pl.ds(r0 * wo, th * wo), :] = z.astype(y_ref.dtype)

        # BN partial statistics (f32, taken from the f32 GEMM result).
        s_acc = s_acc + jnp.sum(z, axis=0, keepdims=True)
        q_acc = q_acc + jnp.sum(z * z, axis=0, keepdims=True)

    stats_ref[0:1, :] = s_acc
    stats_ref[1:2, :] = q_acc


def _bn_apply_kernel(y_ref, ss_ref, o_ref):
    # o = y * scale + shift  (f32 math, bf16 storage; o aliases y's HBM buffer)
    y = y_ref[...].astype(jnp.float32)
    o_ref[...] = (y * ss_ref[0:1, :] + ss_ref[1:2, :]).astype(o_ref.dtype)


# ------------------------------ wrapper --------------------------------------

def dilconv_forward(x, params, *, kernel_size, stride, padding, dilation,
                    eps=BN_EPS):
    if stride != 1:
        # TODO(synk): stride > 1 needs strided output taps; not implemented here.
        raise NotImplementedError("Pallas DilConv path supports stride == 1 only")

    n, cin, h, w = x.shape
    dw = params['dw']                     # (Cin, 1, kh, kw)
    pw = params['pw']                     # (Cout, Cin, 1, 1)
    gamma, beta = params['gamma'], params['beta']
    cout = pw.shape[0]
    kh = kw = kernel_size
    ho = (h + 2 * padding - dilation * (kh - 1) - 1) // stride + 1
    wo = (w + 2 * padding - dilation * (kw - 1) - 1) // stride + 1
    cp = _round_up(cin, LANES)
    cpo = _round_up(cout, LANES)
    hp, wp = h + 2 * padding, w + 2 * padding
    # In-kernel spatial row tile: keeps the live accumulator at ~th*Wo*Cp f32.
    th = 8 if ho % 8 == 0 else ho
    vmem_limit = _vmem_limit_bytes()

    # One-time layout glue: NCHW -> NHWC, spatial zero-pad, channel pad to a
    # multiple of 128 lanes, bf16 storage (halves the biggest DMA).
    xp = jnp.transpose(x, (0, 2, 3, 1))
    xp = jnp.pad(xp, ((0, 0), (padding, padding), (padding, padding),
                      (0, cp - cin))).astype(jnp.bfloat16)
    # depthwise weights -> (kh*kw, Cp): row t = tap (i, j) with t = i*kw + j
    dwm = jnp.pad(dw.reshape(cin, kh * kw).T.astype(jnp.float32),
                  ((0, 0), (0, cp - cin)))
    # pointwise weights -> (Cp, Cpo), bf16 for the MXU (zero-padded channels)
    pwm = jnp.pad(pw.reshape(cout, cin).T.astype(jnp.float32),
                  ((0, cp - cin), (0, cpo - cout))).astype(jnp.bfloat16)

    kernel = functools.partial(_dilconv_fused_kernel, kh=kh, kw=kw,
                               dilation=dilation, ho=ho, wo=wo, th=th)

    # Fused ReLU -> depthwise dilated conv -> pointwise GEMM -> BN partial stats.
    y, stats = pl.pallas_call(
        kernel,
        out_shape=(jax.ShapeDtypeStruct((n, ho * wo, cpo), jnp.bfloat16),
                   jax.ShapeDtypeStruct((n, 2, cpo), jnp.float32)),
        grid=(n,),
        in_specs=[
            pl.BlockSpec((None, hp, wp, cp), lambda b: (b, 0, 0, 0)),
            pl.BlockSpec((kh * kw, cp), lambda b: (0, 0)),
            pl.BlockSpec((cp, cpo), lambda b: (0, 0)),
        ],
        out_specs=(
            pl.BlockSpec((None, ho * wo, cpo), lambda b: (b, 0, 0)),
            pl.BlockSpec((None, 2, cpo), lambda b: (b, 0, 0)),
        ),
        compiler_params=pltpu.CompilerParams(
            dimension_semantics=("parallel",),
            vmem_limit_bytes=vmem_limit),
    )(xp, dwm, pwm)

    # BatchNorm finalize on tiny (Cpo,) vectors in XLA (train-mode, biased var).
    # TODO(synk): E[x^2]-E[x]^2 in f32 can lose precision for very large
    # batches/activations; a Welford-style per-image combine would be safer.
    inv_rows = 1.0 / float(n * ho * wo)
    mean = jnp.sum(stats[:, 0, :], axis=0) * inv_rows
    var = jnp.maximum(jnp.sum(stats[:, 1, :], axis=0) * inv_rows - mean * mean,
                      0.0)
    gamma_p = jnp.pad(gamma.astype(jnp.float32), (0, cpo - cout))
    beta_p = jnp.pad(beta.astype(jnp.float32), (0, cpo - cout))
    scale = gamma_p * jax.lax.rsqrt(var + eps)
    shift = beta_p - mean * scale
    ss = jnp.stack([scale, shift], axis=0)            # (2, Cpo) f32

    # Apply the BatchNorm scale/shift; output aliases y's HBM buffer.
    y_norm = pl.pallas_call(
        _bn_apply_kernel,
        out_shape=jax.ShapeDtypeStruct((n, ho * wo, cpo), jnp.bfloat16),
        grid=(n,),
        in_specs=[pl.BlockSpec((None, ho * wo, cpo), lambda b: (b, 0, 0)),
                  pl.BlockSpec((2, cpo), lambda b: (0, 0))],
        out_specs=pl.BlockSpec((None, ho * wo, cpo), lambda b: (b, 0, 0)),
        input_output_aliases={0: 0},
        compiler_params=pltpu.CompilerParams(
            dimension_semantics=("parallel",),
            vmem_limit_bytes=vmem_limit),
    )(y, ss)

    # Glue: drop channel padding, back to NCHW f32.
    out = y_norm[:, :, :cout].astype(jnp.float32).reshape(n, ho, wo, cout)
    return jnp.transpose(out, (0, 3, 1, 2))


# --------------------------- pure-JAX reference ------------------------------

def dilconv_reference(x, params, *, kernel_size, stride, padding, dilation,
                      eps=BN_EPS):
    cin = x.shape[1]
    xr = jnp.maximum(x, 0.0)
    y = jax.lax.conv_general_dilated(
        xr, params['dw'], window_strides=(stride, stride),
        padding=[(padding, padding), (padding, padding)],
        rhs_dilation=(dilation, dilation),
        dimension_numbers=('NCHW', 'OIHW', 'NCHW'),
        feature_group_count=cin)
    y = jax.lax.conv_general_dilated(
        y, params['pw'], window_strides=(1, 1), padding='VALID',
        dimension_numbers=('NCHW', 'OIHW', 'NCHW'))
    mean = jnp.mean(y, axis=(0, 2, 3), keepdims=True)
    var = jnp.mean(jnp.square(y - mean), axis=(0, 2, 3), keepdims=True)
    g = params['gamma'].reshape(1, -1, 1, 1)
    b = params['beta'].reshape(1, -1, 1, 1)
    return (y - mean) * jax.lax.rsqrt(var + eps) * g + b


# --------------------------------- main ---------------------------------------

if __name__ == "__main__":
    key = jax.random.PRNGKey(0)
    kx, kd, kp = jax.random.split(key, 3)

    # DilConv(C_in=4, C_out=8, kernel_size=3, stride=1, padding=2, dilation=2)
    N, C_IN, H, W = 2, 4, 16, 16
    C_OUT = 8
    K, STRIDE, PAD, DIL = 3, 1, 2, 2

    x = jax.random.normal(kx, (N, C_IN, H, W), jnp.float32)
    params = {
        'dw': jax.random.normal(kd, (C_IN, 1, K, K), jnp.float32) / np.sqrt(K * K),
        'pw': jax.random.normal(kp, (C_OUT, C_IN, 1, 1), jnp.float32) / np.sqrt(C_IN),
        'gamma': jnp.ones((C_OUT,), jnp.float32),   # BatchNorm2d init (affine)
        'beta': jnp.zeros((C_OUT,), jnp.float32),
    }

    fwd = jax.jit(functools.partial(dilconv_forward, kernel_size=K,
                                    stride=STRIDE, padding=PAD, dilation=DIL))
    out = jax.block_until_ready(fwd(x, params))

    assert out.shape == (N, C_OUT, H, W)
    assert bool(jnp.all(jnp.isfinite(out)))

    # Numerical check against a pure-JAX f32 reference (loose tol: bf16 input /
    # bf16 MXU GEMM / bf16 inter-kernel activations).
    ref = dilconv_reference(x, params, kernel_size=K, stride=STRIDE,
                            padding=PAD, dilation=DIL)
    np.testing.assert_allclose(np.asarray(out), np.asarray(ref),
                               rtol=5e-2, atol=8e-2)

    print("KERNEL_OK")
</pallas_src>

<mosaic_0001>
module attributes {stable_mosaic.version = 11 : i64} {
  func.func @_dilconv_fused_kernel(%arg0: i32, %arg1: memref<1x20x20x128xbf16, #tpu.memory_space<vmem>>, %arg2: memref<9x128xf32, #tpu.memory_space<vmem>>, %arg3: memref<128x128xbf16, #tpu.memory_space<vmem>>, %arg4: memref<1x256x128xbf16, #tpu.memory_space<vmem>>, %arg5: memref<1x2x128xf32, #tpu.memory_space<vmem>>) attributes {dimension_semantics = [#tpu.dimension_semantics<parallel>], iteration_bounds = array<i64: 2>, scalar_prefetch = 0 : i64, scratch_operands = 0 : i64, tpu.core_type = #tpu.core_type<tc>, window_params = [{transform_indices = @transform_0, window_bounds = array<i64: 1, 20, 20, 128>}, {pipeline_mode = #tpu.pipeline_mode<synchronous>, transform_indices = @transform_1, window_bounds = array<i64: 9, 128>}, {pipeline_mode = #tpu.pipeline_mode<synchronous>, transform_indices = @transform_2, window_bounds = array<i64: 128, 128>}, {transform_indices = @transform_3, window_bounds = array<i64: 1, 256, 128>}, {transform_indices = @transform_4, window_bounds = array<i64: 1, 2, 128>}]} {
    %c0 = arith.constant 0 : index
    %c0_0 = arith.constant 0 : index
    %0 = vector.load %arg2[%c0, %c0_0] : memref<9x128xf32, #tpu.memory_space<vmem>>, vector<9x128xf32>
    %c0_1 = arith.constant 0 : index
    %c0_2 = arith.constant 0 : index
    %1 = vector.load %arg3[%c0_1, %c0_2] : memref<128x128xbf16, #tpu.memory_space<vmem>>, vector<128x128xbf16>
    %2 = vector.extract_strided_slice %0 {offsets = [0, 0], sizes = [1, 128], strides = [1, 1]} : vector<9x128xf32> to vector<1x128xf32>
    %3 = vector.shape_cast %2 : vector<1x128xf32> to vector<128xf32>
    %4 = vector.shape_cast %3 : vector<128xf32> to vector<1x1x128xf32>
    %5 = vector.extract_strided_slice %0 {offsets = [1, 0], sizes = [1, 128], strides = [1, 1]} : vector<9x128xf32> to vector<1x128xf32>
    %6 = vector.shape_cast %5 : vector<1x128xf32> to vector<128xf32>
    %7 = vector.shape_cast %6 : vector<128xf32> to vector<1x1x128xf32>
    %8 = vector.extract_strided_slice %0 {offsets = [2, 0], sizes = [1, 128], strides = [1, 1]} : vector<9x128xf32> to vector<1x128xf32>
    %9 = vector.shape_cast %8 : vector<1x128xf32> to vector<128xf32>
    %10 = vector.shape_cast %9 : vector<128xf32> to vector<1x1x128xf32>
    %11 = vector.extract_strided_slice %0 {offsets = [3, 0], sizes = [1, 128], strides = [1, 1]} : vector<9x128xf32> to vector<1x128xf32>
    %12 = vector.shape_cast %11 : vector<1x128xf32> to vector<128xf32>
    %13 = vector.shape_cast %12 : vector<128xf32> to vector<1x1x128xf32>
    %14 = vector.extract_strided_slice %0 {offsets = [4, 0], sizes = [1, 128], strides = [1, 1]} : vector<9x128xf32> to vector<1x128xf32>
    %15 = vector.shape_cast %14 : vector<1x128xf32> to vector<128xf32>
    %16 = vector.shape_cast %15 : vector<128xf32> to vector<1x1x128xf32>
    %17 = vector.extract_strided_slice %0 {offsets = [5, 0], sizes = [1, 128], strides = [1, 1]} : vector<9x128xf32> to vector<1x128xf32>
    %18 = vector.shape_cast %17 : vector<1x128xf32> to vector<128xf32>
    %19 = vector.shape_cast %18 : vector<128xf32> to vector<1x1x128xf32>
    %20 = vector.extract_strided_slice %0 {offsets = [6, 0], sizes = [1, 128], strides = [1, 1]} : vector<9x128xf32> to vector<1x128xf32>
    %21 = vector.shape_cast %20 : vector<1x128xf32> to vector<128xf32>
    %22 = vector.shape_cast %21 : vector<128xf32> to vector<1x1x128xf32>
    %23 = vector.extract_strided_slice %0 {offsets = [7, 0], sizes = [1, 128], strides = [1, 1]} : vector<9x128xf32> to vector<1x128xf32>
    %24 = vector.shape_cast %23 : vector<1x128xf32> to vector<128xf32>
    %25 = vector.shape_cast %24 : vector<128xf32> to vector<1x1x128xf32>
    %26 = vector.extract_strided_slice %0 {offsets = [8, 0], sizes = [1, 128], strides = [1, 1]} : vector<9x128xf32> to vector<1x128xf32>
    %27 = vector.shape_cast %26 : vector<1x128xf32> to vector<128xf32>
    %28 = vector.shape_cast %27 : vector<128xf32> to vector<1x1x128xf32>
    %cst = arith.constant 0.000000e+00 : f32
    %29 = vector.broadcast %cst : f32 to vector<1x128xf32>
    %cst_3 = arith.constant 0.000000e+00 : f32
    %30 = vector.broadcast %cst_3 : f32 to vector<1x128xf32>
    %c0_4 = arith.constant 0 : index
    %c0_5 = arith.constant 0 : index
    %c0_6 = arith.constant 0 : index
    %c0_7 = arith.constant 0 : index
    %31 = vector.load %arg1[%c0_4, %c0_5, %c0_6, %c0_7] : memref<1x20x20x128xbf16, #tpu.memory_space<vmem>>, vector<1x12x16x128xbf16>
    %32 = vector.shape_cast %31 : vector<1x12x16x128xbf16> to vector<12x16x128xbf16>
    %cst_8 = arith.constant 0.000000e+00 : bf16
    %33 = vector.broadcast %cst_8 : bf16 to vector<12x16x128xbf16>
    %34 = arith.maximumf %32, %33 : vector<12x16x128xbf16>
    %35 = arith.extf %34 : vector<12x16x128xbf16> to vector<12x16x128xf32>
    %36 = vector.extract_strided_slice %35 {offsets = [0, 0, 0], sizes = [8, 16, 128], strides = [1, 1, 1]} : vector<12x16x128xf32> to vector<8x16x128xf32>
    %37 = vector.broadcast %4 : vector<1x1x128xf32> to vector<8x16x128xf32>
    %38 = arith.mulf %36, %37 : vector<8x16x128xf32>
    %39 = vector.extract_strided_slice %35 {offsets = [2, 0, 0], sizes = [8, 16, 128], strides = [1, 1, 1]} : vector<12x16x128xf32> to vector<8x16x128xf32>
    %40 = vector.broadcast %13 : vector<1x1x128xf32> to vector<8x16x128xf32>
    %41 = arith.mulf %39, %40 : vector<8x16x128xf32>
    %42 = arith.addf %38, %41 : vector<8x16x128xf32>
    %43 = vector.extract_strided_slice %35 {offsets = [4, 0, 0], sizes = [8, 16, 128], strides = [1, 1, 1]} : vector<12x16x128xf32> to vector<8x16x128xf32>
    %44 = vector.broadcast %22 : vector<1x1x128xf32> to vector<8x16x128xf32>
    %45 = arith.mulf %43, %44 : vector<8x16x128xf32>
    %46 = arith.addf %42, %45 : vector<8x16x128xf32>
    %c0_9 = arith.constant 0 : index
    %c0_10 = arith.constant 0 : index
    %c2 = arith.constant 2 : index
    %c0_11 = arith.constant 0 : index
    %47 = vector.load %arg1[%c0_9, %c0_10, %c2, %c0_11] : memref<1x20x20x128xbf16, #tpu.memory_space<vmem>>, vector<1x12x16x128xbf16>
    %48 = vector.shape_cast %47 : vector<1x12x16x128xbf16> to vector<12x16x128xbf16>
    %cst_12 = arith.constant 0.000000e+00 : bf16
    %49 = vector.broadcast %cst_12 : bf16 to vector<12x16x128xbf16>
    %50 = arith.maximumf %48, %49 : vector<12x16x128xbf16>
    %51 = arith.extf %50 : vector<12x16x128xbf16> to vector<12x16x128xf32>
    %52 = vector.extract_strided_slice %51 {offsets = [0, 0, 0], sizes = [8, 16, 128], strides = [1, 1, 1]} : vector<12x16x128xf32> to vector<8x16x128xf32>
    %53 = vector.broadcast %7 : vector<1x1x128xf32> to vector<8x16x128xf32>
    %54 = arith.mulf %52, %53 : vector<8x16x128xf32>
    %55 = arith.addf %46, %54 : vector<8x16x128xf32>
    %56 = vector.extract_strided_slice %51 {offsets = [2, 0, 0], sizes = [8, 16, 128], strides = [1, 1, 1]} : vector<12x16x128xf32> to vector<8x16x128xf32>
    %57 = vector.broadcast %16 : vector<1x1x128xf32> to vector<8x16x128xf32>
    %58 = arith.mulf %56, %57 : vector<8x16x128xf32>
    %59 = arith.addf %55, %58 : vector<8x16x128xf32>
    %60 = vector.extract_strided_slice %51 {offsets = [4, 0, 0], sizes = [8, 16, 128], strides = [1, 1, 1]} : vector<12x16x128xf32> to vector<8x16x128xf32>
    %61 = vector.broadcast %25 : vector<1x1x128xf32> to vector<8x16x128xf32>
    %62 = arith.mulf %60, %61 : vector<8x16x128xf32>
    %63 = arith.addf %59, %62 : vector<8x16x128xf32>
    %c0_13 = arith.constant 0 : index
    %c0_14 = arith.constant 0 : index
    %c4 = arith.constant 4 : index
    %c0_15 = arith.constant 0 : index
    %64 = vector.load %arg1[%c0_13, %c0_14, %c4, %c0_15] : memref<1x20x20x128xbf16, #tpu.memory_space<vmem>>, vector<1x12x16x128xbf16>
    %65 = vector.shape_cast %64 : vector<1x12x16x128xbf16> to vector<12x16x128xbf16>
    %cst_16 = arith.constant 0.000000e+00 : bf16
    %66 = vector.broadcast %cst_16 : bf16 to vector<12x16x128xbf16>
    %67 = arith.maximumf %65, %66 : vector<12x16x128xbf16>
    %68 = arith.extf %67 : vector<12x16x128xbf16> to vector<12x16x128xf32>
    %69 = vector.extract_strided_slice %68 {offsets = [0, 0, 0], sizes = [8, 16, 128], strides = [1, 1, 1]} : vector<12x16x128xf32> to vector<8x16x128xf32>
    %70 = vector.broadcast %10 : vector<1x1x128xf32> to vector<8x16x128xf32>
    %71 = arith.mulf %69, %70 : vector<8x16x128xf32>
    %72 = arith.addf %63, %71 : vector<8x16x128xf32>
    %73 = vector.extract_strided_slice %68 {offsets = [2, 0, 0], sizes = [8, 16, 128], strides = [1, 1, 1]} : vector<12x16x128xf32> to vector<8x16x128xf32>
    %74 = vector.broadcast %19 : vector<1x1x128xf32> to vector<8x16x128xf32>
    %75 = arith.mulf %73, %74 : vector<8x16x128xf32>
    %76 = arith.addf %72, %75 : vector<8x16x128xf32>
    %77 = vector.extract_strided_slice %68 {offsets = [4, 0, 0], sizes = [8, 16, 128], strides = [1, 1, 1]} : vector<12x16x128xf32> to vector<8x16x128xf32>
    %78 = vector.broadcast %28 : vector<1x1x128xf32> to vector<8x16x128xf32>
    %79 = arith.mulf %77, %78 : vector<8x16x128xf32>
    %80 = arith.addf %76, %79 : vector<8x16x128xf32>
    %81 = vector.shape_cast %80 : vector<8x16x128xf32> to vector<128x128xf32>
    %82 = arith.truncf %81 : vector<128x128xf32> to vector<128x128xbf16>
    %cst_17 = arith.constant dense<0.000000e+00> : vector<128x128xf32>
    %83 = tpu.matmul %82, %1, %cst_17 {dimension_numbers = #tpu.dot_dimension_numbers<[1], [0], [0], [1], [0, 0, 1, 1], [], []>} : vector<128x128xbf16>, vector<128x128xbf16>, vector<128x128xf32> -> vector<128x128xf32>
    %84 = arith.truncf %83 : vector<128x128xf32> to vector<128x128xbf16>
    %c0_18 = arith.constant 0 : index
    %c0_19 = arith.constant 0 : index
    %c0_20 = arith.constant 0 : index
    %85 = vector.load %arg4[%c0_18, %c0_19, %c0_20] : memref<1x256x128xbf16, #tpu.memory_space<vmem>>, vector<1x128x128xbf16>
    %86 = vector.shape_cast %85 : vector<1x128x128xbf16> to vector<128x128xbf16>
    %87 = vector.shape_cast %84 : vector<128x128xbf16> to vector<1x128x128xbf16>
    tpu.vector_store %arg4[%c0_18, %c0_19, %c0_20], %87 {strides = array<i32>} : memref<1x256x128xbf16, #tpu.memory_space<vmem>>, vector<1x128x128xbf16>,
    %cst_21 = arith.constant dense<0.000000e+00> : vector<128xf32>
    %88 = vector.multi_reduction <add>, %83, %cst_21 [0] : vector<128x128xf32> to vector<128xf32>
    %89 = vector.shape_cast %88 : vector<128xf32> to vector<1x128xf32>
    %90 = arith.addf %29, %89 : vector<1x128xf32>
    %91 = arith.mulf %83, %83 : vector<128x128xf32>
    %cst_22 = arith.constant dense<0.000000e+00> : vector<128xf32>
    %92 = vector.multi_reduction <add>, %91, %cst_22 [0] : vector<128x128xf32> to vector<128xf32>
    %93 = vector.shape_cast %92 : vector<128xf32> to vector<1x128xf32>
    %94 = arith.addf %30, %93 : vector<1x128xf32>
    %c0_23 = arith.constant 0 : index
    %c8 = arith.constant 8 : index
    %c0_24 = arith.constant 0 : index
    %c0_25 = arith.constant 0 : index
    %95 = vector.load %arg1[%c0_23, %c8, %c0_24, %c0_25] : memref<1x20x20x128xbf16, #tpu.memory_space<vmem>>, vector<1x12x16x128xbf16>
    %96 = vector.shape_cast %95 : vector<1x12x16x128xbf16> to vector<12x16x128xbf16>
    %cst_26 = arith.constant 0.000000e+00 : bf16
    %97 = vector.broadcast %cst_26 : bf16 to vector<12x16x128xbf16>
    %98 = arith.maximumf %96, %97 : vector<12x16x128xbf16>
    %99 = arith.extf %98 : vector<12x16x128xbf16> to vector<12x16x128xf32>
    %100 = vector.extract_strided_slice %99 {offsets = [0, 0, 0], sizes = [8, 16, 128], strides = [1, 1, 1]} : vector<12x16x128xf32> to vector<8x16x128xf32>
    %101 = vector.broadcast %4 : vector<1x1x128xf32> to vector<8x16x128xf32>
    %102 = arith.mulf %100, %101 : vector<8x16x128xf32>
    %103 = vector.extract_strided_slice %99 {offsets = [2, 0, 0], sizes = [8, 16, 128], strides = [1, 1, 1]} : vector<12x16x128xf32> to vector<8x16x128xf32>
    %104 = vector.broadcast %13 : vector<1x1x128xf32> to vector<8x16x128xf32>
    %105 = arith.mulf %103, %104 : vector<8x16x128xf32>
    %106 = arith.addf %102, %105 : vector<8x16x128xf32>
    %107 = vector.extract_strided_slice %99 {offsets = [4, 0, 0], sizes = [8, 16, 128], strides = [1, 1, 1]} : vector<12x16x128xf32> to vector<8x16x128xf32>
    %108 = vector.broadcast %22 : vector<1x1x128xf32> to vector<8x16x128xf32>
    %109 = arith.mulf %107, %108 : vector<8x16x128xf32>
    %110 = arith.addf %106, %109 : vector<8x16x128xf32>
    %c0_27 = arith.constant 0 : index
    %c8_28 = arith.constant 8 : index
    %c2_29 = arith.constant 2 : index
    %c0_30 = arith.constant 0 : index
    %111 = vector.load %arg1[%c0_27, %c8_28, %c2_29, %c0_30] : memref<1x20x20x128xbf16, #tpu.memory_space<vmem>>, vector<1x12x16x128xbf16>
    %112 = vector.shape_cast %111 : vector<1x12x16x128xbf16> to vector<12x16x128xbf16>
    %cst_31 = arith.constant 0.000000e+00 : bf16
    %113 = vector.broadcast %cst_31 : bf16 to vector<12x16x128xbf16>
    %114 = arith.maximumf %112, %113 : vector<12x16x128xbf16>
    %115 = arith.extf %114 : vector<12x16x128xbf16> to vector<12x16x128xf32>
    %116 = vector.extract_strided_slice %115 {offsets = [0, 0, 0], sizes = [8, 16, 128], strides = [1, 1, 1]} : vector<12x16x128xf32> to vector<8x16x128xf32>
    %117 = vector.broadcast %7 : vector<1x1x128xf32> to vector<8x16x128xf32>
    %118 = arith.mulf %116, %117 : vector<8x16x128xf32>
    %119 = arith.addf %110, %118 : vector<8x16x128xf32>
    %120 = vector.extract_strided_slice %115 {offsets = [2, 0, 0], sizes = [8, 16, 128], strides = [1, 1, 1]} : vector<12x16x128xf32> to vector<8x16x128xf32>
    %121 = vector.broadcast %16 : vector<1x1x128xf32> to vector<8x16x128xf32>
    %122 = arith.mulf %120, %121 : vector<8x16x128xf32>
    %123 = arith.addf %119, %122 : vector<8x16x128xf32>
    %124 = vector.extract_strided_slice %115 {offsets = [4, 0, 0], sizes = [8, 16, 128], strides = [1, 1, 1]} : vector<12x16x128xf32> to vector<8x16x128xf32>
    %125 = vector.broadcast %25 : vector<1x1x128xf32> to vector<8x16x128xf32>
    %126 = arith.mulf %124, %125 : vector<8x16x128xf32>
    %127 = arith.addf %123, %126 : vector<8x16x128xf32>
    %c0_32 = arith.constant 0 : index
    %c8_33 = arith.constant 8 : index
    %c4_34 = arith.constant 4 : index
    %c0_35 = arith.constant 0 : index
    %128 = vector.load %arg1[%c0_32, %c8_33, %c4_34, %c0_35] : memref<1x20x20x128xbf16, #tpu.memory_space<vmem>>, vector<1x12x16x128xbf16>
    %129 = vector.shape_cast %128 : vector<1x12x16x128xbf16> to vector<12x16x128xbf16>
    %cst_36 = arith.constant 0.000000e+00 : bf16
    %130 = vector.broadcast %cst_36 : bf16 to vector<12x16x128xbf16>
    %131 = arith.maximumf %129, %130 : vector<12x16x128xbf16>
    %132 = arith.extf %131 : vector<12x16x128xbf16> to vector<12x16x128xf32>
    %133 = vector.extract_strided_slice %132 {offsets = [0, 0, 0], sizes = [8, 16, 128], strides = [1, 1, 1]} : vector<12x16x128xf32> to vector<8x16x128xf32>
    %134 = vector.broadcast %10 : vector<1x1x128xf32> to vector<8x16x128xf32>
    %135 = arith.mulf %133, %134 : vector<8x16x128xf32>
    %136 = arith.addf %127, %135 : vector<8x16x128xf32>
    %137 = vector.extract_strided_slice %132 {offsets = [2, 0, 0], sizes = [8, 16, 128], strides = [1, 1, 1]} : vector<12x16x128xf32> to vector<8x16x128xf32>
    %138 = vector.broadcast %19 : vector<1x1x128xf32> to vector<8x16x128xf32>
    %139 = arith.mulf %137, %138 : vector<8x16x128xf32>
    %140 = arith.addf %136, %139 : vector<8x16x128xf32>
    %141 = vector.extract_strided_slice %132 {offsets = [4, 0, 0], sizes = [8, 16, 128], strides = [1, 1, 1]} : vector<12x16x128xf32> to vector<8x16x128xf32>
    %142 = vector.broadcast %28 : vector<1x1x128xf32> to vector<8x16x128xf32>
    %143 = arith.mulf %141, %142 : vector<8x16x128xf32>
    %144 = arith.addf %140, %143 : vector<8x16x128xf32>
    %145 = vector.shape_cast %144 : vector<8x16x128xf32> to vector<128x128xf32>
    %146 = arith.truncf %145 : vector<128x128xf32> to vector<128x128xbf16>
    %cst_37 = arith.constant dense<0.000000e+00> : vector<128x128xf32>
    %147 = tpu.matmul %146, %1, %cst_37 {dimension_numbers = #tpu.dot_dimension_numbers<[1], [0], [0], [1], [0, 0, 1, 1], [], []>} : vector<128x128xbf16>, vector<128x128xbf16>, vector<128x128xf32> -> vector<128x128xf32>
    %148 = arith.truncf %147 : vector<128x128xf32> to vector<128x128xbf16>
    %c0_38 = arith.constant 0 : index
    %c128 = arith.constant 128 : index
    %c0_39 = arith.constant 0 : index
    %149 = vector.load %arg4[%c0_38, %c128, %c0_39] : memref<1x256x128xbf16, #tpu.memory_space<vmem>>, vector<1x128x128xbf16>
    %150 = vector.shape_cast %149 : vector<1x128x128xbf16> to vector<128x128xbf16>
    %151 = vector.shape_cast %148 : vector<128x128xbf16> to vector<1x128x128xbf16>
    tpu.vector_store %arg4[%c0_38, %c128, %c0_39], %151 {strides = array<i32>} : memref<1x256x128xbf16, #tpu.memory_space<vmem>>, vector<1x128x128xbf16>,
    %cst_40 = arith.constant dense<0.000000e+00> : vector<128xf32>
    %152 = vector.multi_reduction <add>, %147, %cst_40 [0] : vector<128x128xf32> to vector<128xf32>
    %153 = vector.shape_cast %152 : vector<128xf32> to vector<1x128xf32>
    %154 = arith.addf %90, %153 : vector<1x128xf32>
    %155 = arith.mulf %147, %147 : vector<128x128xf32>
    %cst_41 = arith.constant dense<0.000000e+00> : vector<128xf32>
    %156 = vector.multi_reduction <add>, %155, %cst_41 [0] : vector<128x128xf32> to vector<128xf32>
    %157 = vector.shape_cast %156 : vector<128xf32> to vector<1x128xf32>
    %158 = arith.addf %94, %157 : vector<1x128xf32>
    %c0_42 = arith.constant 0 : index
    %c0_43 = arith.constant 0 : index
    %c0_44 = arith.constant 0 : index
    %159 = vector.load %arg5[%c0_42, %c0_43, %c0_44] : memref<1x2x128xf32, #tpu.memory_space<vmem>>, vector<1x1x128xf32>
    %160 = vector.shape_cast %159 : vector<1x1x128xf32> to vector<1x128xf32>
    %161 = vector.shape_cast %154 : vector<1x128xf32> to vector<1x1x128xf32>
    tpu.vector_store %arg5[%c0_42, %c0_43, %c0_44], %161 {strides = array<i32>} : memref<1x2x128xf32, #tpu.memory_space<vmem>>, vector<1x1x128xf32>,
    %c0_45 = arith.constant 0 : index
    %c1 = arith.constant 1 : index
    %c0_46 = arith.constant 0 : index
    %162 = vector.load %arg5[%c0_45, %c1, %c0_46] : memref<1x2x128xf32, #tpu.memory_space<vmem>>, vector<1x1x128xf32>
    %163 = vector.shape_cast %162 : vector<1x1x128xf32> to vector<1x128xf32>
    %164 = vector.shape_cast %158 : vector<1x128xf32> to vector<1x1x128xf32>
    tpu.vector_store %arg5[%c0_45, %c1, %c0_46], %164 {strides = array<i32>} : memref<1x2x128xf32, #tpu.memory_space<vmem>>, vector<1x1x128xf32>,
    return
  }
  func.func @transform_0(%arg0: i32) -> (i32, i32, i32, i32) {
    %c0_i32 = arith.constant 0 : i32
    %c0_i32_0 = arith.constant 0 : i32
    %c0_i32_1 = arith.constant 0 : i32
    %c0_i32_2 = arith.constant 0 : i32
    return %arg0, %c0_i32, %c0_i32_0, %c0_i32_1 : i32, i32, i32, i32
  }
  func.func @transform_1(%arg0: i32) -> (i32, i32) {
    %c0_i32 = arith.constant 0 : i32
    %c0_i32_0 = arith.constant 0 : i32
    %c0_i32_1 = arith.constant 0 : i32
    return %c0_i32, %c0_i32_0 : i32, i32
  }
  func.func @transform_2(%arg0: i32) -> (i32, i32) {
    %c0_i32 = arith.constant 0 : i32
    %c0_i32_0 = arith.constant 0 : i32
    %c0_i32_1 = arith.constant 0 : i32
    return %c0_i32, %c0_i32_0 : i32, i32
  }
  func.func @transform_3(%arg0: i32) -> (i32, i32, i32) {
    %c0_i32 = arith.constant 0 : i32
    %c0_i32_0 = arith.constant 0 : i32
    %c0_i32_1 = arith.constant 0 : i32
    return %arg0, %c0_i32, %c0_i32_0 : i32, i32, i32
  }
  func.func @transform_4(%arg0: i32) -> (i32, i32, i32) {
    %c0_i32 = arith.constant 0 : i32
    %c0_i32_0 = arith.constant 0 : i32
    %c0_i32_1 = arith.constant 0 : i32
    return %arg0, %c0_i32, %c0_i32_0 : i32, i32, i32
  }
}

module attributes {stable_mosaic.version = 11 : i64} {
  func.func @_bn_apply_kernel(%arg0: i32, %arg1: memref<1x256x128xbf16, #tpu.memory_space<vmem>>, %arg2: memref<2x128xf32, #tpu.memory_space<vmem>>, %arg3: memref<1x256x128xbf16, #tpu.memory_space<vmem>>) attributes {dimension_semantics = [#tpu.dimension_semantics<parallel>], iteration_bounds = array<i64: 2>, scalar_prefetch = 0 : i64, scratch_operands = 0 : i64, tpu.core_type = #tpu.core_type<tc>, window_params = [{transform_indices = @transform_0, window_bounds = array<i64: 1, 256, 128>}, {pipeline_mode = #tpu.pipeline_mode<synchronous>, transform_indices = @transform_1, window_bounds = array<i64: 2, 128>}, {transform_indices = @transform_2, window_bounds = array<i64: 1, 256, 128>}]} {
    %c0 = arith.constant 0 : index
    %c0_0 = arith.constant 0 : index
    %c0_1 = arith.constant 0 : index
    %0 = vector.load %arg1[%c0, %c0_0, %c0_1] : memref<1x256x128xbf16, #tpu.memory_space<vmem>>, vector<1x256x128xbf16>
    %1 = vector.shape_cast %0 : vector<1x256x128xbf16> to vector<256x128xbf16>
    %2 = arith.extf %1 : vector<256x128xbf16> to vector<256x128xf32>
    %c0_2 = arith.constant 0 : index
    %c0_3 = arith.constant 0 : index
    %3 = vector.load %arg2[%c0_2, %c0_3] : memref<2x128xf32, #tpu.memory_space<vmem>>, vector<1x128xf32>
    %4 = vector.broadcast %3 : vector<1x128xf32> to vector<256x128xf32>
    %5 = arith.mulf %2, %4 : vector<256x128xf32>
    %c1 = arith.constant 1 : index
    %c0_4 = arith.constant 0 : index
    %6 = vector.load %arg2[%c1, %c0_4] : memref<2x128xf32, #tpu.memory_space<vmem>>, vector<1x128xf32>
    %7 = vector.broadcast %6 : vector<1x128xf32> to vector<256x128xf32>
    %8 = arith.addf %5, %7 : vector<256x128xf32>
    %9 = arith.truncf %8 : vector<256x128xf32> to vector<256x128xbf16>
    %c0_5 = arith.constant 0 : index
    %c0_6 = arith.constant 0 : index
    %c0_7 = arith.constant 0 : index
    %10 = vector.load %arg3[%c0_5, %c0_6, %c0_7] : memref<1x256x128xbf16, #tpu.memory_space<vmem>>, vector<1x256x128xbf16>
    %11 = vector.shape_cast %10 : vector<1x256x128xbf16> to vector<256x128xbf16>
    %12 = vector.shape_cast %9 : vector<256x128xbf16> to vector<1x256x128xbf16>
    tpu.vector_store %arg3[%c0_5, %c0_6, %c0_7], %12 {strides = array<i32>} : memref<1x256x128xbf16, #tpu.memory_space<vmem>>, vector<1x256x128xbf16>,
    return
  }
  func.func @transform_0(%arg0: i32) -> (i32, i32, i32) {
    %c0_i32 = arith.constant 0 : i32
    %c0_i32_0 = arith.constant 0 : i32
    %c0_i32_1 = arith.constant 0 : i32
    return %arg0, %c0_i32, %c0_i32_0 : i32, i32, i32
  }
  func.func @transform_1(%arg0: i32) -> (i32, i32) {
    %c0_i32 = arith.constant 0 : i32
    %c0_i32_0 = arith.constant 0 : i32
    %c0_i32_1 = arith.constant 0 : i32
    return %c0_i32, %c0_i32_0 : i32, i32
  }
  func.func @transform_2(%arg0: i32) -> (i32, i32, i32) {
    %c0_i32 = arith.constant 0 : i32
    %c0_i32_0 = arith.constant 0 : i32
    %c0_i32_1 = arith.constant 0 : i32
    return %arg0, %c0_i32, %c0_i32_0 : i32, i32, i32
  }
}

</mosaic_0001>

<bundles_post_ra>
// kernel: dilconv_forward.3
= control target key start
LH: loop header
LB: loop body
LE: loop exit
PB: predicated region body
PF: predicated region fallthrough
CT: control target
= control target key end

     0   :  { %s781_s9 = smov 0   ;;  %s881_s0 = inlined_call_operand.vmem [shape: bf16[2,256,128], index: 0, kind: input, shape index: {}, may-alias: {0,2}]   ;;  %s882_s1 = inlined_call_operand.vmem [shape: f32[2,128], index: 1, kind: input, shape index: {}]   ;;  %s883_s2 = inlined_call_operand.vmem [shape: bf16[2,256,128], index: 2, kind: output, shape index: {}, may-alias: {0,2}]  }
   0x1 LB: > { %s497_s10 = sadd.s32 4294967295, %s764_s9   ;;  %p501_p0 = scmp.ge.s32.totalorder %s764_s9, 1  ;;  %s764_s9 = sphi %s781_s9, %s12_s9  }
   0x2   : > { %p112_p1 = scmp.lt.s32.totalorder %s764_s9, 3 }
   0x4   : > { %p113_p2 = pnand %p501_p0, %p112_p1 }
   0x5   : > { %p134_p3 = scmp.lt.s32.totalorder (!%p113_p2), %s497_s10, 1  ;;  %v506_v40 = vld [vmem:[%s882_s1] ss:$0 sm:$0xff] (!%p113_p2) }
   0x6   : > { %116 = sbr.rel (%p113_p2) target bundleno = 49 (0x31), region = 28 }
   0xd   : > { %s885_s10 = smov (!%p134_p3, %s497_s10), 1 }
   0xe   : > { %s542_s11 = sshll.u32 %s885_s10, 7 }
   0xf   : > { %s797_s14 = scalar_lea.vmem %s881_s0, %s542_s11  ;;  %s832_s21 = scalar_lea.vmem %s883_s2, %s542_s11 }
  0x10   : > { %v577_v0 = vld [vmem:[%s797_s14] sm:$0xff]   ;;  %v720_v1 = vld [vmem:[%s797_s14 + $0x8] sm:$0xff]   ;;  %v721_v2 = vld [vmem:[%s797_s14 + $0x10] sm:$0xff]  }
  0x11   : > { %v578_v3 = vunpack.c.l.bf16 %v577_v0  ;;  %v579_v4 = vunpack.c.h.bf16 %v577_v0  ;;  %v582_v5 = vunpack.c.l.bf16 %v720_v1  ;;  %v583_v6 = vunpack.c.h.bf16 %v720_v1  ;;  %v722_v7 = vld [vmem:[%s797_s14 + $0x18] sm:$0xff]   ;;  %v723_v8 = vld [vmem:[%s797_s14 + $0x20] sm:$0xff]   ;;  %v724_v9 = vld [vmem:[%s797_s14 + $0x28] sm:$0xff]  }
  0x12   : > { %v586_v10 = vunpack.c.l.bf16 %v721_v2  ;;  %v587_v11 = vunpack.c.h.bf16 %v721_v2  ;;  %v590_v12 = vunpack.c.l.bf16 %v722_v7  ;;  %v591_v13 = vunpack.c.h.bf16 %v722_v7  ;;  %v725_v14 = vld [vmem:[%s797_s14 + $0x30] sm:$0xff]   ;;  %v726_v15 = vld [vmem:[%s797_s14 + $0x38] sm:$0xff]   ;;  %v727_v16 = vld [vmem:[%s797_s14 + $0x40] sm:$0xff]  }
  0x13   : > { %v594_v17 = vunpack.c.l.bf16 %v723_v8  ;;  %v595_v18 = vunpack.c.h.bf16 %v723_v8  ;;  %v598_v19 = vunpack.c.l.bf16 %v724_v9  ;;  %v599_v20 = vunpack.c.h.bf16 %v724_v9  ;;  %v728_v21 = vld [vmem:[%s797_s14 + $0x48] sm:$0xff]   ;;  %v729_v22 = vld [vmem:[%s797_s14 + $0x50] sm:$0xff]   ;;  %v730_v23 = vld [vmem:[%s797_s14 + $0x58] sm:$0xff]  }
  0x14   : > { %v602_v24 = vunpack.c.l.bf16 %v725_v14  ;;  %v603_v25 = vunpack.c.h.bf16 %v725_v14  ;;  %v606_v26 = vunpack.c.l.bf16 %v726_v15  ;;  %v607_v27 = vunpack.c.h.bf16 %v726_v15  ;;  %v731_v28 = vld [vmem:[%s797_s14 + $0x60] sm:$0xff]   ;;  %v732_v29 = vld [vmem:[%s797_s14 + $0x68] sm:$0xff]   ;;  %v733_v34 = vld [vmem:[%s797_s14 + $0x70] sm:$0xff]  }
  0x15   : > { %v610_v30 = vunpack.c.l.bf16 %v727_v16  ;;  %v611_v31 = vunpack.c.h.bf16 %v727_v16  ;;  %v614_v32 = vunpack.c.l.bf16 %v728_v21  ;;  %v615_v33 = vunpack.c.h.bf16 %v728_v21  ;;  %v734_v35 = vld [vmem:[%s797_s14 + $0x78] sm:$0xff]   ;;  %v821_v9 = vld [vmem:[%s882_s1 + $0x1] ss:$0 sm:$0xff] }
  0x16   : > { %v618_v36 = vunpack.c.l.bf16 %v729_v22  ;;  %v619_v37 = vunpack.c.h.bf16 %v729_v22  ;;  %v622_v38 = vunpack.c.l.bf16 %v730_v23  ;;  %v623_v39 = vunpack.c.h.bf16 %v730_v23 }
  0x17   : > { %v626_v41 = vunpack.c.l.bf16 %v731_v28  ;;  %v627_v42 = vunpack.c.h.bf16 %v731_v28  ;;  %v630_v43 = vunpack.c.l.bf16 %v732_v29  ;;  %v631_v44 = vunpack.c.h.bf16 %v732_v29 }
  0x18   : > { %v634_v45 = vunpack.c.l.bf16 %v733_v34  ;;  %v635_v46 = vunpack.c.h.bf16 %v733_v34  ;;  %v638_v47 = vunpack.c.l.bf16 %v734_v35  ;;  %v639_v48 = vunpack.c.h.bf16 %v734_v35 }
  0x19   : > { %v213_v49 = vmul.f32 %v578_v3, %v506_v40  ;;  %v214_v50 = vmul.f32 %v579_v4, %v506_v40  ;;  %v215_v51 = vmul.f32 %v582_v5, %v506_v40  ;;  %v216_v52 = vmul.f32 %v583_v6, %v506_v40 }
  0x1a   : > { %v217_v53 = vmul.f32 %v586_v10, %v506_v40  ;;  %v218_v54 = vmul.f32 %v587_v11, %v506_v40  ;;  %v219_v55 = vmul.f32 %v590_v12, %v506_v40  ;;  %v220_v56 = vmul.f32 %v591_v13, %v506_v40 }
  0x1b   : > { %v221_v57 = vmul.f32 %v594_v17, %v506_v40  ;;  %v222_v58 = vmul.f32 %v595_v18, %v506_v40  ;;  %v223_v59 = vmul.f32 %v598_v19, %v506_v40  ;;  %v224_v60 = vmul.f32 %v599_v20, %v506_v40 }
  0x1c   : > { %v225_v61 = vmul.f32 %v602_v24, %v506_v40  ;;  %v226_v62 = vmul.f32 %v603_v25, %v506_v40  ;;  %v227_v63 = vmul.f32 %v606_v26, %v506_v40  ;;  %v228_v0 = vmul.f32 %v607_v27, %v506_v40 }
  0x1d   : > { %v229_v1 = vmul.f32 %v610_v30, %v506_v40  ;;  %v230_v2 = vmul.f32 %v611_v31, %v506_v40  ;;  %v231_v7 = vmul.f32 %v614_v32, %v506_v40  ;;  %v232_v8 = vmul.f32 %v615_v33, %v506_v40 }
  0x1e   : > { %v233_v3 = vmul.f32 %v618_v36, %v506_v40  ;;  %v234_v4 = vmul.f32 %v619_v37, %v506_v40  ;;  %v235_v5 = vmul.f32 %v622_v38, %v506_v40  ;;  %v236_v6 = vmul.f32 %v623_v39, %v506_v40 }
  0x1f   : > { %v237_v10 = vmul.f32 %v626_v41, %v506_v40  ;;  %v238_v11 = vmul.f32 %v627_v42, %v506_v40  ;;  %v239_v12 = vmul.f32 %v630_v43, %v506_v40  ;;  %v240_v13 = vmul.f32 %v631_v44, %v506_v40 }
  0x20   : > { %v241_v14 = vmul.f32 %v634_v45, %v506_v40  ;;  %v242_v15 = vmul.f32 %v635_v46, %v506_v40  ;;  %v243_v16 = vmul.f32 %v638_v47, %v506_v40  ;;  %v244_v17 = vmul.f32 %v639_v48, %v506_v40 }
  0x21   : > { %v250_v18 = vadd.f32 %v821_v9, %v213_v49  ;;  %v251_v19 = vadd.f32 %v821_v9, %v214_v50  ;;  %v252_v20 = vadd.f32 %v821_v9, %v215_v51  ;;  %v253_v21 = vadd.f32 %v821_v9, %v216_v52 }
  0x22   : > { %v254_v22 = vadd.f32 %v821_v9, %v217_v53  ;;  %v255_v23 = vadd.f32 %v821_v9, %v218_v54  ;;  %v256_v24 = vadd.f32 %v821_v9, %v219_v55  ;;  %v257_v25 = vadd.f32 %v821_v9, %v220_v56 }
  0x23   : > { %v643_v26 = vpack.c.bf16 %v251_v19, %v250_v18  ;;  %v648_v27 = vpack.c.bf16 %v253_v21, %v252_v20  ;;  %v258_v28 = vadd.f32 %v821_v9, %v221_v57  ;;  %v259_v29 = vadd.f32 %v821_v9, %v222_v58 }
  0x24   : > { %v653_v30 = vpack.c.bf16 %v255_v23, %v254_v22  ;;  %v658_v31 = vpack.c.bf16 %v257_v25, %v256_v24  ;;  %v260_v32 = vadd.f32 %v821_v9, %v223_v59  ;;  %v261_v33 = vadd.f32 %v821_v9, %v224_v60 }
  0x25   : > { %644 = vst [vmem:[%s832_s21] sm:$0xff] %v643_v26   ;;  %735 = vst [vmem:[%s832_s21 + $0x8] sm:$0xff] %v648_v27   ;;  %v663_v34 = vpack.c.bf16 %v259_v29, %v258_v28  ;;  %v262_v35 = vadd.f32 %v821_v9, %v225_v61  ;;  %v263_v36 = vadd.f32 %v821_v9, %v226_v62 }
  0x26   : > { %v264_v37 = vadd.f32 %v821_v9, %v227_v63  ;;  %736 = vst [vmem:[%s832_s21 + $0x10] sm:$0xff] %v653_v30   ;;  %737 = vst [vmem:[%s832_s21 + $0x18] sm:$0xff] %v658_v31   ;;  %v668_v38 = vpack.c.bf16 %v261_v33, %v260_v32  ;;  %v265_v39 = vadd.f32 %v821_v9, %v228_v0 }
  0x27   : > { %v266_v40 = vadd.f32 %v821_v9, %v229_v1  ;;  %v267_v41 = vadd.f32 %v821_v9, %v230_v2  ;;  %738 = vst [vmem:[%s832_s21 + $0x20] sm:$0xff] %v663_v34   ;;  %v673_v42 = vpack.c.bf16 %v263_v36, %v262_v35  ;;  %v268_v43 = vadd.f32 %v821_v9, %v231_v7 }
  0x28   : > { %v269_v44 = vadd.f32 %v821_v9, %v232_v8  ;;  %v270_v45 = vadd.f32 %v821_v9, %v233_v3  ;;  %739 = vst [vmem:[%s832_s21 + $0x28] sm:$0xff] %v668_v38   ;;  %v678_v46 = vpack.c.bf16 %v265_v39, %v264_v37  ;;  %v271_v48 = vadd.f32 %v821_v9, %v234_v4 }
  0x29   : > { %v683_v47 = vpack.c.bf16 %v267_v41, %v266_v40  ;;  %v272_v49 = vadd.f32 %v821_v9, %v235_v5  ;;  %740 = vst [vmem:[%s832_s21 + $0x30] sm:$0xff] %v673_v42   ;;  %v273_v51 = vadd.f32 %v821_v9, %v236_v6  ;;  %v274_v52 = vadd.f32 %v821_v9, %v237_v10 }
  0x2a   : > { %v688_v50 = vpack.c.bf16 %v269_v44, %v268_v43  ;;  %v275_v53 = vadd.f32 %v821_v9, %v238_v11  ;;  %741 = vst [vmem:[%s832_s21 + $0x38] sm:$0xff] %v678_v46   ;;  %v693_v54 = vpack.c.bf16 %v271_v48, %v270_v45  ;;  %v276_v55 = vadd.f32 %v821_v9, %v239_v12 }
  0x2b   : > { %742 = vst [vmem:[%s832_s21 + $0x40] sm:$0xff] %v683_v47   ;;  %v277_v56 = vadd.f32 %v821_v9, %v240_v13  ;;  %v278_v57 = vadd.f32 %v821_v9, %v241_v14  ;;  %v698_v58 = vpack.c.bf16 %v273_v51, %v272_v49  ;;  %v279_v60 = vadd.f32 %v821_v9, %v242_v15 }
  0x2c   : > { %743 = vst [vmem:[%s832_s21 + $0x48] sm:$0xff] %v688_v50   ;;  %v703_v59 = vpack.c.bf16 %v275_v53, %v274_v52  ;;  %v280_v61 = vadd.f32 %v821_v9, %v243_v16  ;;  %744 = vst [vmem:[%s832_s21 + $0x50] sm:$0xff] %v693_v54   ;;  %v281_v63 = vadd.f32 %v821_v9, %v244_v17 }
  0x2d   : > { %v708_v62 = vpack.c.bf16 %v277_v56, %v276_v55  ;;  %745 = vst [vmem:[%s832_s21 + $0x58] sm:$0xff] %v698_v58   ;;  %v713_v0 = vpack.c.bf16 %v279_v60, %v278_v57 }
  0x2e   : > { %746 = vst [vmem:[%s832_s21 + $0x60] sm:$0xff] %v703_v59   ;;  %v718_v1 = vpack.c.bf16 %v281_v63, %v280_v61 }
  0x2f   : > { %747 = vst [vmem:[%s832_s21 + $0x68] sm:$0xff] %v708_v62   ;;  %748 = vst [vmem:[%s832_s21 + $0x70] sm:$0xff] %v713_v0  }
  0x30   : > { %749 = vst [vmem:[%s832_s21 + $0x78] sm:$0xff] %v718_v1  }
  0x31 PF: > { %s12_s9 = sadd.s32 1, %s764_s9  }
  0x32   : > { %p9_p4 = scmp.ge.s32.totalorder %s12_s9, 4  }
  0x34   :  { %11 = sbr.rel (!%p9_p4) target bundleno = 1 (0x1), region = 58 }

// kernel: dilconv_forward.2
= control target key start
LH: loop header
LB: loop body
LE: loop exit
PB: predicated region body
PF: predicated region fallthrough
CT: control target
= control target key end

     0   :  { %s3327_s15 = smov 0   ;;  %s5027_s0 = inlined_call_operand.vmem [shape: bf16[2,20,20,128], index: 0, kind: input, shape index: {}]   ;;  %s5028_s1 = inlined_call_operand.vmem [shape: f32[9,128], index: 1, kind: input, shape index: {}]   ;;  %s5029_s2 = inlined_call_operand.vmem [shape: bf16[128,128], index: 2, kind: input, shape index: {}]   ;;  %s5030_s3 = inlined_call_operand.vmem [shape: bf16[2,256,128], index: 3, kind: output, shape index: {0}]   ;;  %s5031_s4 = inlined_call_operand.vmem [shape: f32[2,2,128], index: 4, kind: output, shape index: {1}]  }
   0x1 LB: > { %s2925_s16 = sadd.s32 4294967295, %s3299_s15   ;;  %p2929_p0 = scmp.ge.s32.totalorder %s3299_s15, 1  ;;  %s3299_s15 = sphi %s3327_s15, %s15_s15  }
   0x2   : > { %p165_p1 = scmp.lt.s32.totalorder %s3299_s15, 3 }
   0x4   : > { %p166_p2 = pnand %p2929_p0, %p165_p1 }
   0x6   : > { %169 = sbr.rel (%p166_p2) target bundleno = 631 (0x277), region = 32 }
   0xd   : > { %v3283_v0 = vld [vmem:[%s5029_s2] sm:$0xff]   ;;  %p195_p3 = scmp.lt.s32.totalorder %s2925_s16, 1  ;;  %v300_v1 = vlaneseq  ;;  %v3284_v2 = vld [vmem:[%s5029_s2 + $0x8] sm:$0xff]   ;;  %v3285_v4 = vld [vmem:[%s5029_s2 + $0x10] sm:$0xff]   ;;  %v5037_v15 = vmov 0   ;;  %vm516_vm0 = vcmask 1045504  }
   0xe   : > { %3209 = vmatprep.subr.bf16.mxu0 %v3283_v0  ;;  %3241 = vmatprep.subr.bf16.mxu1 %v3283_v0  ;;  %v3286_v8 = vld [vmem:[%s5029_s2 + $0x18] sm:$0xff]   ;;  %v3363_v9 = vld [vmem:[%s5028_s1] sm:$0xff]  ;;  %v3288_v53 = vld [vmem:[%s5029_s2 + $0x28] sm:$0xff]   ;;  %vm961_vm1 = vcmask 1043456  }
   0xf   : > { %s5287_s16 = smov (!%p195_p3, %s2925_s16), 1  ;;  %3210 = vmatpush3.bf16.msra.mxu0 %v3283_v0  ;;  %3242 = vmatpush3.bf16.msra.mxu1 %v3283_v0  ;;  %v3343_v3 = vshrl.u32 %v300_v1, 7  ;;  %v3287_v34 = vld [vmem:[%s5029_s2 + $0x20] sm:$0xff]  }
  0x10   : > { %3211 = vmatprep.subr.bf16.mxu0 %v3284_v2  ;;  %3243 = vmatprep.subr.bf16.mxu1 %v3284_v2  ;;  %s3273_s23 = smul.u32 240, %s5287_s16  ;;  %s3049_s21 = sshll.u32 %s5287_s16, 7 }
  0x11   : > { %v302_v5 = vsub.s32 0, %v3343_v3  ;;  %v322_v6 = vsub.s32 3, %v3343_v3  ;;  %v358_v7 = vsub.s32 6, %v3343_v3  ;;  %v466_v11 = vsub.s32 1, %v3343_v3  ;;  %s4969_s24 = scalar_lea.vmem %s5030_s3, %s3049_s21  ;;  %s2933_s25 = sshll.u32 %s5287_s16, 1 }
  0x12   : > { %s3353_s26 = scalar_lea.vmem %s5027_s0, %s3273_s23  ;;  %s208_s28 = scalar_lea.vmem %s5031_s4, %s2933_s25 }
  0x13   : > { %3212 = vmatpush3.bf16.msra.mxu0 %v3284_v2  ;;  %3244 = vmatpush3.bf16.msra.mxu1 %v3284_v2  ;;  %v228_v10 = vld [vmem:[%s3353_s26] sm:$0xf]  ;;  %v229_v12 = vld [vmem:[%s3353_s26 + $0x4] sm:$0xf]  ;;  %v232_v13 = vld [vmem:[%s3353_s26 + $0x18] sm:$0xf]  ;;  %v3372_v17 = vrot.slane %v3363_v9, %v302_v5  ;;  %v3375_v18 = vrot.slane %v3363_v9, %v322_v6  ;;  %v3378_v19 = vrot.slane %v3363_v9, %v358_v7 }
  0x14   : > { %3213 = vmatprep.subr.bf16.mxu0 %v3285_v4  ;;  %3245 = vmatprep.subr.bf16.mxu1 %v3285_v4  ;;  %v233_v14 = vld [vmem:[%s3353_s26 + $0x1c] sm:$0xf]  ;;  %v252_v16 = vmax.bf16 %v5037_v15, %v228_v10  ;;  %v236_v20 = vld [vmem:[%s3353_s26 + $0x30] sm:$0xf]  ;;  %v237_v21 = vld [vmem:[%s3353_s26 + $0x34] sm:$0xf]  ;;  %v253_v22 = vmax.bf16 %v5037_v15, %v229_v12  ;;  %v3384_v23 = vmax.bf16 %v5037_v15, %v232_v13 }
  0x15   : > { %v257_v24 = vmax.bf16 %v5037_v15, %v233_v14  ;;  %v392_v25 = vld [vmem:[%s3353_s26] sm:$0xe]  ;;  %v3389_v26 = vrot.slane %v3363_v9, %v466_v11  ;;  %v260_v27 = vmax.bf16 %v5037_v15, %v236_v20  ;;  %v261_v28 = vmax.bf16 %v5037_v15, %v237_v21  ;;  %v393_v30 = vld [vmem:[%s3353_s26 + $0x8] sm:$0x1]  ;;  %v396_v31 = vld [vmem:[%s3353_s26 + $0x18] sm:$0xe] }
  0x16   : > { %v276_v29 = vunpack.c.l.bf16 %v252_v16  ;;  %v397_v32 = vld [vmem:[%s3353_s26 + $0x20] sm:$0x1]  ;;  %v416_v33 = vmax.bf16 %v5037_v15, %v392_v25  ;;  %v3400_v35 = vunpack.c.l.bf16 %v253_v22  ;;  %v5036_v36 = vunpack.c.l.bf16 %v3384_v23  ;;  %v400_v38 = vld [vmem:[%s3353_s26 + $0x30] sm:$0xe]  ;;  %v401_v43 = vld [vmem:[%s3353_s26 + $0x38] sm:$0x1] }
  0x17   : > { %3214 = vmatpush3.bf16.msra.mxu0 %v3285_v4  ;;  %3246 = vmatpush3.bf16.msra.mxu1 %v3285_v4  ;;  %v3403_v37 = vunpack.c.l.bf16 %v257_v24  ;;  %v417_v39 = vmax.bf16 %v5037_v15, %v393_v30  ;;  %v3407_v40 = vunpack.c.l.bf16 %v260_v27  ;;  %v3409_v41 = vunpack.c.l.bf16 %v261_v28  ;;  %v837_v2 = vld [vmem:[%s3353_s26] sm:$0xc]  ;;  %v3289_v4 = vld [vmem:[%s5029_s2 + $0x30] sm:$0xff]   ;;  %v841_v14 = vld [vmem:[%s3353_s26 + $0x18] sm:$0xc] }
  0x18   : > { %3215 = vmatprep.subr.bf16.mxu0 %v3286_v8  ;;  %3247 = vmatprep.subr.bf16.mxu1 %v3286_v8  ;;  %v304_v42 = vmul.f32 %v3372_v17, %v276_v29  ;;  %v3414_v44 = vmax.bf16 %v5037_v15, %v396_v31  ;;  %v305_v45 = vmul.f32 %v3372_v17, %v3400_v35  ;;  %v440_v52 = vunpack.c.l.bf16 %v416_v33  ;;  %v842_v31 = vld [vmem:[%s3353_s26 + $0x20] sm:$0x3] }
  0x19   : > { %v324_v46 = vmul.f32 %v3375_v18, %v5036_v36  ;;  %v325_v47 = vmul.f32 %v3375_v18, %v3403_v37  ;;  %v421_v48 = vmax.bf16 %v5037_v15, %v397_v32  ;;  %v360_v49 = vmul.f32 %v3378_v19, %v3407_v40  ;;  %v845_v32 = vld [vmem:[%s3353_s26 + $0x30] sm:$0xc]  ;;  %v843_v36 = vld [vmem:[%s3353_s26 + $0x24] sm:$0xc] }
  0x1a   : > { %v361_v50 = vmul.f32 %v3378_v19, %v3409_v41  ;;  %v424_v51 = vmax.bf16 %v5037_v15, %v400_v38  ;;  %v425_v56 = vmax.bf16 %v5037_v15, %v401_v43  ;;  %v441_v57 = vunpack.c.l.bf16 %v417_v39  ;;  %v3290_v38 = vld [vmem:[%s5029_s2 + $0x38] sm:$0xff]  }
  0x1b   : > { %3216 = vmatpush3.bf16.msra.mxu0 %v3286_v8  ;;  %3248 = vmatpush3.bf16.msra.mxu1 %v3286_v8  ;;  %v340_v54 = vadd.f32 %v324_v46, %v304_v42  ;;  %v341_v55 = vadd.f32 %v325_v47, %v305_v45  ;;  %v444_v58 = vunpack.c.l.bf16 %v3414_v44  ;;  %v445_v59 = vunpack.c.l.bf16 %v421_v48  ;;  %v838_v8 = vld [vmem:[%s3353_s26 + $0x8] sm:$0x3] }
  0x1c   : > { %3217 = vmatprep.subr.bf16.mxu0 %v3287_v34  ;;  %3249 = vmatprep.subr.bf16.mxu1 %v3287_v34  ;;  %v3434_v60 = vunpack.c.l.bf16 %v424_v51  ;;  %v468_v61 = vmul.f32 %v3389_v26, %v440_v52  ;;  %v3437_v0 = vunpack.c.l.bf16 %v425_v56  ;;  %v469_v1 = vmul.f32 %v3389_v26, %v3400_v35 }
  0x1d   : > { %v376_v62 = vadd.f32 %v360_v49, %v340_v54  ;;  %v377_v63 = vadd.f32 %v361_v50, %v341_v55  ;;  %v470_v5 = vmul.f32 %v3389_v26, %v441_v57  ;;  %v3447_v6 = vmul.f32 %v3389_v26, %v444_v58  ;;  %v846_v49 = vld [vmem:[%s3353_s26 + $0x38] sm:$0x3] }
  0x1e   : > { %v3450_v7 = vmul.f32 %v3389_v26, %v445_v59  ;;  %v517_v10 = vrot.slane %v468_v61, 2  ;;  %v518_v11 = vrot.slane %v469_v1, 2  ;;  %v591_v12 = vsub.s32 4, %v3343_v3 }
  0x1f   : > { %3218 = vmatpush3.bf16.msra.mxu0 %v3287_v34  ;;  %3250 = vmatpush3.bf16.msra.mxu1 %v3287_v34  ;;  %v715_v13 = vsub.s32 7, %v3343_v3  ;;  %v520_v16 = vrot.slane %v470_v5, 2  ;;  %v3459_v22 = vmax.bf16 %v5037_v15, %v837_v2  ;;  %v3469_v28 = vmax.bf16 %v5037_v15, %v838_v8 }
  0x20   : > { %3219 = vmatprep.subr.bf16.mxu0 %v3288_v53  ;;  %3251 = vmatprep.subr.bf16.mxu1 %v3288_v53  ;;  %v519_v24 = vsel %vm516_vm0, %v517_v10, %v518_v11  ;;  %v3463_v25 = vrot.slane %v3363_v9, %v591_v12  ;;  %v865_v33 = vmax.bf16 %v5037_v15, %v841_v14  ;;  %v911_v12 = vsub.s32 2, %v3343_v3  ;;  %v2960_v14 = vld [vmem:[%s3353_s26 + $0x64] sm:$0xf] }
  0x21   : > { %v3466_v27 = vrot.slane %v3363_v9, %v715_v13  ;;  %v521_v29 = vsel %vm516_vm0, %v518_v11, %v520_v16  ;;  %v573_v30 = vadd.f32 %v519_v24, %v376_v62  ;;  %v885_v34 = vunpack.c.l.bf16 %v3459_v22  ;;  %v2959_v13 = vld [vmem:[%s3353_s26 + $0x60] sm:$0xf] }
  0x22   : > { %v574_v39 = vadd.f32 %v521_v29, %v377_v63  ;;  %v593_v42 = vmul.f32 %v3463_v25, %v444_v58  ;;  %v594_v43 = vmul.f32 %v3463_v25, %v3403_v37  ;;  %v886_v44 = vunpack.c.l.bf16 %v3469_v28  ;;  %v3496_v58 = vld [vmem:[%s5028_s1 + $0x8] ss:$0 sm:$0xff] }
  0x23   : > { %3220 = vmatpush3.bf16.msra.mxu0 %v3288_v53  ;;  %3252 = vmatpush3.bf16.msra.mxu1 %v3288_v53  ;;  %v595_v45 = vmul.f32 %v3463_v25, %v445_v59  ;;  %v717_v46 = vmul.f32 %v3466_v27, %v3434_v60  ;;  %v718_v47 = vmul.f32 %v3466_v27, %v3409_v41  ;;  %v889_v62 = vunpack.c.l.bf16 %v865_v33 }
  0x24   : > { %3221 = vmatprep.subr.bf16.mxu0 %v3289_v4  ;;  %3253 = vmatprep.subr.bf16.mxu1 %v3289_v4  ;;  %v719_v48 = vmul.f32 %v3466_v27, %v3437_v0  ;;  %v641_v50 = vrot.slane %v593_v42, 2  ;;  %v642_v51 = vrot.slane %v594_v43, 2  ;;  %v866_v52 = vmax.bf16 %v5037_v15, %v842_v31 }
  0x25   : > { %v869_v53 = vmax.bf16 %v5037_v15, %v845_v32  ;;  %v644_v54 = vrot.slane %v595_v45, 2  ;;  %v765_v55 = vrot.slane %v717_v46, 2  ;;  %v766_v56 = vrot.slane %v718_v47, 2 }
  0x26   : > { %v768_v57 = vrot.slane %v719_v48, 2  ;;  %v643_v59 = vsel %vm516_vm0, %v641_v50, %v642_v51  ;;  %v870_v61 = vmax.bf16 %v5037_v15, %v846_v49  ;;  %v890_v63 = vunpack.c.l.bf16 %v866_v52  ;;  %v2963_v50 = vld [vmem:[%s3353_s26 + $0x78] sm:$0xf] }
  0x27   : > { %3222 = vmatpush3.bf16.msra.mxu0 %v3289_v4  ;;  %3254 = vmatpush3.bf16.msra.mxu1 %v3289_v4  ;;  %v645_v1 = vsel %vm516_vm0, %v642_v51, %v644_v54  ;;  %v697_v2 = vadd.f32 %v643_v59, %v573_v30  ;;  %v767_v4 = vsel %vm516_vm0, %v765_v55, %v766_v56  ;;  %v3503_v10 = vunpack.c.l.bf16 %v869_v53  ;;  %v2964_v55 = vld [vmem:[%s3353_s26 + $0x7c] sm:$0xf] }
  0x28   : > { %3223 = vmatprep.subr.bf16.mxu0 %v3290_v38  ;;  %3255 = vmatprep.subr.bf16.mxu1 %v3290_v38  ;;  %v769_v5 = vsel %vm516_vm0, %v766_v56, %v768_v57  ;;  %v698_v8 = vadd.f32 %v645_v1, %v574_v39  ;;  %v3505_v11 = vunpack.c.l.bf16 %v870_v61  ;;  %v1036_v22 = vsub.s32 5, %v3343_v3 }
  0x29   : > { %v821_v16 = vadd.f32 %v767_v4, %v697_v2  ;;  %v1163_v24 = vmul.f32 %v3496_v58, %v3409_v41  ;;  %v3514_v29 = vrot.slane %v3363_v9, %v911_v12  ;;  %v1162_v30 = vmul.f32 %v3496_v58, %v3503_v10 }
  0x2a   : > { %v822_v28 = vadd.f32 %v769_v5, %v698_v8  ;;  %v1164_v31 = vmul.f32 %v3496_v58, %v3505_v11  ;;  %v3521_v32 = vrot.slane %v3363_v9, %v1036_v22  ;;  %v1600_v3 = vmax.bf16 %v5037_v15, %v2959_v13 }
  0x2b   : > { %3224 = vmatpush3.bf16.msra.mxu0 %v3290_v38  ;;  %3256 = vmatpush3.bf16.msra.mxu1 %v3290_v38  ;;  %v1211_v33 = vrot.slane %v1163_v24, 4  ;;  %v1601_v38 = vmax.bf16 %v5037_v15, %v2960_v14  ;;  %v913_v39 = vmul.f32 %v3514_v29, %v885_v34  ;;  %v914_v42 = vmul.f32 %v3514_v29, %v3400_v35 }
  0x2c   : > { %v915_v43 = vmul.f32 %v3514_v29, %v886_v44  ;;  %v3530_v45 = vmul.f32 %v3514_v29, %v889_v62  ;;  %v3533_v9 = vmul.f32 %v3514_v29, %v890_v63  ;;  %v1038_v46 = vmul.f32 %v3521_v32, %v889_v62  ;;  %v2967_v62 = vld [vmem:[%s3353_s26 + $0x90] sm:$0xf] }
  0x2d   : > { %v1039_v47 = vmul.f32 %v3521_v32, %v3403_v37  ;;  %v1040_v34 = vmul.f32 %v3521_v32, %v890_v63  ;;  %v962_v48 = vrot.slane %v913_v39, 4  ;;  %v963_v35 = vrot.slane %v914_v42, 4  ;;  %v2968_v63 = vld [vmem:[%s3353_s26 + $0x94] sm:$0xf]  ;;  %v2983_v42 = vld [vmem:[%s3353_s26 + $0x60] sm:$0xe] }
  0x2e   : > { %v965_v49 = vrot.slane %v915_v43, 4  ;;  %v1086_v52 = vrot.slane %v1038_v46, 4  ;;  %v1210_v59 = vrot.slane %v1162_v30, 4  ;;  %v1213_v61 = vrot.slane %v1164_v31, 4 }
  0x2f   : > { %v1087_v53 = vrot.slane %v1039_v47, 4  ;;  %v1089_v54 = vrot.slane %v1040_v34, 4  ;;  %v964_v56 = vsel %vm961_vm1, %v962_v48, %v963_v35  ;;  %v3552_v13 = vmax.bf16 %v5037_v15, %v2963_v50  ;;  %v2984_v48 = vld [vmem:[%s3353_s26 + $0x68] sm:$0x1] }
  0x30   : > { %v966_v57 = vsel %vm961_vm1, %v963_v35, %v965_v49  ;;  %v1018_v1 = vadd.f32 %v964_v56, %v821_v16  ;;  %v1212_v8 = vsel %vm961_vm1, %v1210_v59, %v1211_v33  ;;  %v1214_v12 = vsel %vm961_vm1, %v1211_v33, %v1213_v61  ;;  %v2987_v35 = vld [vmem:[%s3353_s26 + $0x78] sm:$0xe] }
  0x31   : > { %v1019_v2 = vadd.f32 %v966_v57, %v822_v28  ;;  %v1088_v4 = vsel %vm961_vm1, %v1086_v52, %v1087_v53  ;;  %v1090_v5 = vsel %vm961_vm1, %v1087_v53, %v1089_v54  ;;  %v1605_v14 = vmax.bf16 %v5037_v15, %v2964_v55  ;;  %v2988_v52 = vld [vmem:[%s3353_s26 + $0x80] sm:$0x1]  ;;  %v2991_v53 = vld [vmem:[%s3353_s26 + $0x90] sm:$0xe]  ;;  %v2992_v54 = vld [vmem:[%s3353_s26 + $0x98] sm:$0x1] }
  0x32   : > { %v1142_v22 = vadd.f32 %v1088_v4, %v1018_v1  ;;  %v1608_v16 = vmax.bf16 %v5037_v15, %v2967_v62  ;;  %v1609_v28 = vmax.bf16 %v5037_v15, %v2968_v63  ;;  %v1624_v30 = vunpack.c.l.bf16 %v1600_v3 }
  0x33   : > { %v1143_v24 = vadd.f32 %v1090_v5, %v1019_v2  ;;  %v3557_v31 = vunpack.c.l.bf16 %v1601_v38  ;;  %v5032_v33 = vunpack.c.l.bf16 %v3552_v13  ;;  %v3560_v39 = vunpack.c.l.bf16 %v1605_v14 }
  0x34   : > { %v1266_v43 = vadd.f32 %v1212_v8, %v1142_v22  ;;  %v3563_v47 = vunpack.c.l.bf16 %v1608_v16  ;;  %v3565_v34 = vunpack.c.l.bf16 %v1609_v28  ;;  %v1648_v49 = vmul.f32 %v1624_v30, %v3372_v17 }
  0x35   : > { %v1267_v46 = vadd.f32 %v1214_v12, %v1143_v24  ;;  %v1649_v3 = vmul.f32 %v3557_v31, %v3372_v17  ;;  %v1664_v38 = vmul.f32 %v5032_v33, %v3375_v18  ;;  %v1665_v50 = vmul.f32 %v3560_v39, %v3375_v18 }
  0x36   : > { %v1696_v56 = vmul.f32 %v3563_v47, %v3378_v19  ;;  %v1697_v57 = vmul.f32 %v3565_v34, %v3378_v19  ;;  %v1752_v59 = vmax.bf16 %v5037_v15, %v2983_v42  ;;  %v1753_v63 = vmax.bf16 %v5037_v15, %v2984_v48 }
  0x37   : > { %v1282_v55 = vpack.c.bf16 %v1267_v46, %v1266_v43  ;;  %v1680_v61 = vadd.f32 %v1664_v38, %v1648_v49  ;;  %v1681_v62 = vadd.f32 %v1665_v50, %v1649_v3  ;;  %v1756_v1 = vmax.bf16 %v5037_v15, %v2987_v35 }
  0x38   : > { %v1757_v2 = vmax.bf16 %v5037_v15, %v2988_v52  ;;  %v1760_v4 = vmax.bf16 %v5037_v15, %v2991_v53  ;;  %v1761_v5 = vmax.bf16 %v5037_v15, %v2992_v54  ;;  %v1776_v8 = vunpack.c.l.bf16 %v1752_v59 }
  0x39   : > { %3225 = vmatprep.mubr.bf16.mxu0 %v1282_v55  ;;  %v1712_v12 = vadd.f32 %v1696_v56, %v1680_v61  ;;  %v1713_v14 = vadd.f32 %v1697_v57, %v1681_v62  ;;  %v1777_v22 = vunpack.c.l.bf16 %v1753_v63  ;;  %v1780_v24 = vunpack.c.l.bf16 %v1756_v1  ;;  %v3007_v62 = vld [vmem:[%s3353_s26 + $0x60] sm:$0xc] }
  0x3a   : > { %v1781_v16 = vunpack.c.l.bf16 %v1757_v2  ;;  %v3590_v28 = vunpack.c.l.bf16 %v1760_v4  ;;  %v3592_v30 = vunpack.c.l.bf16 %v1761_v5  ;;  %v1800_v42 = vmul.f32 %v1776_v8, %v3389_v26  ;;  %v3008_v5 = vld [vmem:[%s3353_s26 + $0x68] sm:$0x3]  ;;  %v3011_v8 = vld [vmem:[%s3353_s26 + $0x78] sm:$0xc] }
  0x3b   : > { %v1801_v43 = vmul.f32 %v3557_v31, %v3389_v26  ;;  %v1802_v46 = vmul.f32 %v1777_v22, %v3389_v26  ;;  %v3599_v48 = vmul.f32 %v1780_v24, %v3389_v26  ;;  %v1920_v35 = vmul.f32 %v1780_v24, %v3463_v25 }
  0x3c   : > { %v3603_v49 = vmul.f32 %v1781_v16, %v3389_v26  ;;  %v1848_v3 = vrot.slane %v1800_v42, 2  ;;  %v1921_v38 = vmul.f32 %v3560_v39, %v3463_v25  ;;  %v1922_v50 = vmul.f32 %v1781_v16, %v3463_v25 }
  0x3d   : > { %v1849_v52 = vrot.slane %v1801_v43, 2  ;;  %v1851_v53 = vrot.slane %v1802_v46, 2  ;;  %v1968_v55 = vrot.slane %v1920_v35, 2  ;;  %v2040_v61 = vmul.f32 %v3590_v28, %v3466_v27  ;;  %v3012_v43 = vld [vmem:[%s3353_s26 + $0x80] sm:$0x3] }
  0x3e   : > { %v1969_v57 = vrot.slane %v1921_v38, 2  ;;  %v1971_v59 = vrot.slane %v1922_v50, 2  ;;  %v2041_v2 = vmul.f32 %v3565_v34, %v3466_v27  ;;  %v2042_v4 = vmul.f32 %v3592_v30, %v3466_v27  ;;  %v3015_v46 = vld [vmem:[%s3353_s26 + $0x90] sm:$0xc]  ;;  %v3016_v50 = vld [vmem:[%s3353_s26 + $0x98] sm:$0x3] }
  0x3f   : > { %v1850_v63 = vsel %vm516_vm0, %v1848_v3, %v1849_v52  ;;  %v1852_v1 = vsel %vm516_vm0, %v1849_v52, %v1851_v53  ;;  %v2088_v35 = vrot.slane %v2040_v61, 2  ;;  %v2184_v52 = vmax.bf16 %v5037_v15, %v3007_v62 }
  0x40   : > { %v1904_v22 = vadd.f32 %v1850_v63, %v1712_v12  ;;  %v1905_v24 = vadd.f32 %v1852_v1, %v1713_v14  ;;  %v1970_v16 = vsel %vm516_vm0, %v1968_v55, %v1969_v57  ;;  %v1972_v42 = vsel %vm516_vm0, %v1969_v57, %v1971_v59 }
  0x41   : > { %v2089_v3 = vrot.slane %v2041_v2, 2  ;;  %v2091_v38 = vrot.slane %v2042_v4, 2  ;;  %v2185_v54 = vmax.bf16 %v5037_v15, %v3008_v5  ;;  %v2188_v33 = vmax.bf16 %v5037_v15, %v3011_v8 }
  0x42   : > { %v2024_v53 = vadd.f32 %v1970_v16, %v1904_v22  ;;  %v2025_v56 = vadd.f32 %v1972_v42, %v1905_v24  ;;  %v2189_v55 = vmax.bf16 %v5037_v15, %v3012_v43  ;;  %v2192_v57 = vmax.bf16 %v5037_v15, %v3015_v46 }
  0x43   : > { %v2090_v12 = vsel %vm516_vm0, %v2088_v35, %v2089_v3  ;;  %v2092_v14 = vsel %vm516_vm0, %v2089_v3, %v2091_v38  ;;  %v2193_v63 = vmax.bf16 %v5037_v15, %v3016_v50  ;;  %v2208_v1 = vunpack.c.l.bf16 %v2184_v52  ;;  %v239_v50 = vld [vmem:[%s3353_s26 + $0x40] sm:$0xf] }
  0x44   : > { %v2144_v59 = vadd.f32 %v2090_v12, %v2024_v53  ;;  %v2145_v61 = vadd.f32 %v2092_v14, %v2025_v56  ;;  %v2209_v62 = vunpack.c.l.bf16 %v2185_v54  ;;  %v2212_v2 = vunpack.c.l.bf16 %v2188_v33 }
  0x45   : > { %v2213_v4 = vunpack.c.l.bf16 %v2189_v55  ;;  %v3634_v22 = vunpack.c.l.bf16 %v2192_v57  ;;  %v3636_v5 = vunpack.c.l.bf16 %v2193_v63  ;;  %v2232_v8 = vmul.f32 %v2208_v1, %v3514_v29  ;;  %v230_v57 = vld [vmem:[%s3353_s26 + $0xc] sm:$0xf]  ;;  %v231_v63 = vld [vmem:[%s3353_s26 + $0x10] sm:$0xf] }
  0x46   : > { %v2233_v24 = vmul.f32 %v3557_v31, %v3514_v29  ;;  %v2353_v16 = vmul.f32 %v3560_v39, %v3521_v32  ;;  %v2234_v56 = vmul.f32 %v2209_v62, %v3514_v29  ;;  %v3645_v42 = vmul.f32 %v2212_v2, %v3514_v29 }
  0x47   : > { %5136 = vst [vmem:[#allocation2_spill] sm:$0xff] %v3634_v22  ;;  %5137 = vst [vmem:[#allocation3_spill] sm:$0xff] %v3636_v5  ;;  %v3648_v33 = vmul.f32 %v2213_v4, %v3514_v29  ;;  %v2352_v54 = vmul.f32 %v2212_v2, %v3521_v32  ;;  %v2280_v43 = vrot.slane %v2232_v8, 4  ;;  %v2354_v35 = vmul.f32 %v2213_v4, %v3521_v32  ;;  %v234_v8 = vld [vmem:[%s3353_s26 + $0x24] sm:$0xf] }
  0x48   : > { %v2281_v46 = vrot.slane %v2233_v24, 4  ;;  %v2401_v31 = vrot.slane %v2353_v16, 4  ;;  %v2283_v3 = vrot.slane %v2234_v56, 4  ;;  %v2472_v14 = vmul.f32 %v3496_v58, %v3634_v22  ;;  %v235_v24 = vld [vmem:[%s3353_s26 + $0x28] sm:$0xf] }
  0x49   : > { %5138 = vst [vmem:[#allocation4_spill] sm:$0xff] %v3648_v33  ;;  %v2400_v52 = vrot.slane %v2352_v54, 4  ;;  %v2403_v12 = vrot.slane %v2354_v35, 4  ;;  %v2473_v55 = vmul.f32 %v3496_v58, %v3565_v34  ;;  %v2474_v4 = vmul.f32 %v3496_v58, %v3636_v5  ;;  %v238_v35 = vld [vmem:[%s3353_s26 + $0x3c] sm:$0xf] }
  0x4a   : > { %v2282_v53 = vsel %vm961_vm1, %v2280_v43, %v2281_v46  ;;  %v2284_v1 = vsel %vm961_vm1, %v2281_v46, %v2283_v3  ;;  %v2520_v54 = vrot.slane %v2472_v14, 4  ;;  %v255_v46 = vmax.bf16 %v5037_v15, %v231_v63 }
  0x4b   : > { %v2336_v62 = vadd.f32 %v2282_v53, %v2144_v59  ;;  %v2402_v2 = vsel %vm961_vm1, %v2400_v52, %v2401_v31  ;;  %v2337_v16 = vadd.f32 %v2284_v1, %v2145_v61  ;;  %v2404_v56 = vsel %vm961_vm1, %v2401_v31, %v2403_v12  ;;  %v394_v31 = vld [vmem:[%s3353_s26 + $0xc] sm:$0xe] }
  0x4c   : > { %v2521_v43 = vrot.slane %v2473_v55, 4  ;;  %v2523_v51 = vrot.slane %v2474_v4, 4  ;;  %v254_v59 = vmax.bf16 %v5037_v15, %v230_v57  ;;  %v3674_v53 = vmax.bf16 %v5037_v15, %v234_v8  ;;  %v395_v4 = vld [vmem:[%s3353_s26 + $0x14] sm:$0x1] }
  0x4d   : > { %v2456_v38 = vadd.f32 %v2402_v2, %v2336_v62  ;;  %v2457_v3 = vadd.f32 %v2404_v56, %v2337_v16  ;;  %v259_v61 = vmax.bf16 %v5037_v15, %v235_v24  ;;  %v262_v55 = vmax.bf16 %v5037_v15, %v238_v35  ;;  %v402_v56 = vld [vmem:[%s3353_s26 + $0x3c] sm:$0xe] }
  0x4e   : > { %v2522_v52 = vsel %vm961_vm1, %v2520_v54, %v2521_v43  ;;  %5139 = vst [vmem:[#allocation5_spill] sm:$0xff] %v3674_v53  ;;  %v2524_v12 = vsel %vm961_vm1, %v2521_v43, %v2523_v51  ;;  %v263_v57 = vmax.bf16 %v5037_v15, %v239_v50  ;;  %v278_v1 = vunpack.c.l.bf16 %v254_v59  ;;  %v398_v51 = vld [vmem:[%s3353_s26 + $0x24] sm:$0xe] }
  0x4f   : > { %v2576_v14 = vadd.f32 %v2522_v52, %v2456_v38  ;;  %v2577_v63 = vadd.f32 %v2524_v12, %v2457_v3  ;;  %v3681_v62 = vunpack.c.l.bf16 %v255_v46  ;;  %v5033_v2 = vunpack.c.l.bf16 %v3674_v53  ;;  %v399_v38 = vld [vmem:[%s3353_s26 + $0x2c] sm:$0x1]  ;;  %v403_v46 = vld [vmem:[%s3353_s26 + $0x44] sm:$0x1] }
  0x50   : > { %v3685_v8 = vunpack.c.l.bf16 %v259_v61  ;;  %v3687_v24 = vunpack.c.l.bf16 %v262_v55  ;;  %v3689_v16 = vunpack.c.l.bf16 %v263_v57  ;;  %v418_v54 = vmax.bf16 %v5037_v15, %v394_v31 }
  0x51   : > { %v2592_v50 = vpack.c.bf16 %v2577_v63, %v2576_v14  ;;  %v306_v43 = vmul.f32 %v3372_v17, %v278_v1  ;;  %v307_v35 = vmul.f32 %v3372_v17, %v3681_v62  ;;  %v326_v59 = vmul.f32 %v3375_v18, %v5033_v2 }
  0x52   : > { %5140 = vst [vmem:[#allocation6_spill] sm:$0xff] %v3685_v8  ;;  %5141 = vst [vmem:[#allocation7_spill] sm:$0xff] %v3687_v24  ;;  %v327_v3 = vmul.f32 %v3375_v18, %v3685_v8  ;;  %v362_v52 = vmul.f32 %v3378_v19, %v3687_v24  ;;  %v363_v61 = vmul.f32 %v3378_v19, %v3689_v16  ;;  %v442_v2 = vunpack.c.l.bf16 %v418_v54 }
  0x53   : > { %5142 = vst [vmem:[#allocation8_spill] sm:$0xff] %v3689_v16  ;;  %v419_v31 = vmax.bf16 %v5037_v15, %v395_v4  ;;  %3257 = vmatprep.mubr.bf16.mxu1 %v2592_v50  ;;  %v342_v12 = vadd.f32 %v326_v59, %v306_v43  ;;  %v3710_v14 = vmax.bf16 %v5037_v15, %v398_v51  ;;  %v5147_v53 = vmov 0  }
  0x54   : > { %v3713_v55 = vmax.bf16 %v5037_v15, %v399_v38  ;;  %v426_v57 = vmax.bf16 %v5037_v15, %v402_v56  ;;  %v343_v63 = vadd.f32 %v327_v3, %v307_v35  ;;  %v427_v1 = vmax.bf16 %v5037_v15, %v403_v46  ;;  %v844_v15 = vld [vmem:[%s3353_s26 + $0x2c] sm:$0x3] }
  0x55   : > { %5143 = vst [vmem:[#allocation9_spill] sm:$0xff] %v3710_v14  ;;  %v443_v44 = vunpack.c.l.bf16 %v419_v31  ;;  %v378_v21 = vadd.f32 %v362_v52, %v342_v12  ;;  %v5034_v20 = vunpack.c.l.bf16 %v3710_v14  ;;  %v471_v38 = vmul.f32 %v3389_v26, %v442_v2 }
  0x56   : > { %5144 = vst [vmem:[#allocation10_spill] sm:$0xff] %v3713_v55  ;;  %v5035_v4 = vunpack.c.l.bf16 %v3713_v55  ;;  %v3719_v50 = vunpack.c.l.bf16 %v426_v57  ;;  %v379_v51 = vadd.f32 %v363_v61, %v343_v63  ;;  %v3721_v43 = vunpack.c.l.bf16 %v427_v1  ;;  %v839_v61 = vld [vmem:[%s3353_s26 + $0xc] sm:$0xc]  ;;  %v840_v1 = vld [vmem:[%s3353_s26 + $0x14] sm:$0x3] }
  0x57   : > { %v472_v56 = vmul.f32 %v3389_v26, %v3681_v62  ;;  %v473_v54 = vmul.f32 %v3389_v26, %v443_v44  ;;  %v596_v35 = vmul.f32 %v3463_v25, %v5034_v20  ;;  %v597_v59 = vmul.f32 %v3463_v25, %v3685_v8 }
  0x58   : > { %5145 = vst [vmem:[#allocation11_spill] sm:$0xff] %v3719_v50  ;;  %5146 = vst [vmem:[#allocation12_spill] sm:$0xff] %v3721_v43  ;;  %v598_v46 = vmul.f32 %v3463_v25, %v5035_v4  ;;  %v522_v3 = vrot.slane %v471_v38, 2  ;;  %v720_v52 = vmul.f32 %v3466_v27, %v3719_v50  ;;  %v721_v44 = vmul.f32 %v3466_v27, %v3689_v16 }
  0x59   : > { %v523_v2 = vrot.slane %v472_v56, 2  ;;  %v525_v31 = vrot.slane %v473_v54, 2  ;;  %v646_v12 = vrot.slane %v596_v35, 2  ;;  %v647_v57 = vrot.slane %v597_v59, 2  ;;  %v847_v35 = vld [vmem:[%s3353_s26 + $0x3c] sm:$0xc] }
  0x5a   : > { %v649_v63 = vrot.slane %v598_v46, 2  ;;  %v722_v38 = vmul.f32 %v3466_v27, %v3721_v43  ;;  %v770_v56 = vrot.slane %v720_v52, 2  ;;  %v771_v4 = vrot.slane %v721_v44, 2  ;;  %v848_v59 = vld [vmem:[%s3353_s26 + $0x44] sm:$0x3] }
  0x5b   : > { %v524_v20 = vsel %vm516_vm0, %v522_v3, %v523_v2  ;;  %v526_v50 = vsel %vm516_vm0, %v523_v2, %v525_v31  ;;  %v648_v14 = vsel %vm516_vm0, %v646_v12, %v647_v57  ;;  %v863_v33 = vmax.bf16 %v5147_v53, %v839_v61 }
  0x5c   : > { %v575_v55 = vadd.f32 %v524_v20, %v378_v21  ;;  %v650_v54 = vsel %vm516_vm0, %v647_v57, %v649_v63  ;;  %v576_v46 = vadd.f32 %v526_v50, %v379_v51  ;;  %v772_v24 = vsel %vm516_vm0, %v770_v56, %v771_v4  ;;  %v2961_v56 = vld [vmem:[%s3353_s26 + $0x6c] sm:$0xf] }
  0x5d   : > { %v773_v3 = vrot.slane %v722_v38, 2  ;;  %v864_v52 = vmax.bf16 %v5147_v53, %v840_v1  ;;  %v3755_v44 = vmax.bf16 %v5147_v53, %v843_v36  ;;  %v3758_v20 = vmax.bf16 %v5147_v53, %v844_v15 }
  0x5e   : > { %v699_v43 = vadd.f32 %v648_v14, %v575_v55  ;;  %v700_v21 = vadd.f32 %v650_v54, %v576_v46  ;;  %v871_v31 = vmax.bf16 %v5147_v53, %v847_v35  ;;  %v872_v50 = vmax.bf16 %v5147_v53, %v848_v59 }
  0x5f   : > { %5148 = vst [vmem:[#allocation13_spill] sm:$0xff] %v3755_v44  ;;  %5149 = vst [vmem:[#allocation14_spill] sm:$0xff] %v3758_v20  ;;  %v774_v2 = vsel %vm516_vm0, %v771_v4, %v773_v3  ;;  %v887_v12 = vunpack.c.l.bf16 %v863_v33  ;;  %v888_v61 = vunpack.c.l.bf16 %v864_v52  ;;  %v5050_v14 = vunpack.c.l.bf16 %v3755_v44  ;;  %v2962_v3 = vld [vmem:[%s3353_s26 + $0x70] sm:$0xf] }
  0x60   : > { %v823_v51 = vadd.f32 %v772_v24, %v699_v43  ;;  %v824_v55 = vadd.f32 %v774_v2, %v700_v21  ;;  %v5049_v36 = vunpack.c.l.bf16 %v3758_v20  ;;  %v3765_v57 = vunpack.c.l.bf16 %v871_v31 }
  0x61   : > { %v3767_v15 = vunpack.c.l.bf16 %v872_v50  ;;  %v916_v4 = vmul.f32 %v3514_v29, %v887_v12  ;;  %v917_v63 = vmul.f32 %v3514_v29, %v3681_v62  ;;  %v918_v24 = vmul.f32 %v3514_v29, %v888_v61  ;;  %v2965_v50 = vld [vmem:[%s3353_s26 + $0x84] sm:$0xf] }
  0x62   : > { %5150 = vst [vmem:[#allocation15_spill] sm:$0xff] %v3765_v57  ;;  %v1041_v33 = vmul.f32 %v3521_v32, %v5050_v14  ;;  %v1042_v43 = vmul.f32 %v3521_v32, %v3685_v8  ;;  %v1043_v1 = vmul.f32 %v3521_v32, %v5049_v36  ;;  %v1165_v38 = vmul.f32 %v3496_v58, %v3765_v57  ;;  %v2966_v14 = vld [vmem:[%s3353_s26 + $0x88] sm:$0xf]  ;;  %v2969_v57 = vld [vmem:[%s3353_s26 + $0x9c] sm:$0xf] }
  0x63   : > { %5151 = vst [vmem:[#allocation16_spill] sm:$0xff] %v3767_v15  ;;  %v1166_v62 = vmul.f32 %v3496_v58, %v3689_v16  ;;  %v967_v54 = vrot.slane %v916_v4, 4  ;;  %v968_v35 = vrot.slane %v917_v63, 4  ;;  %v970_v59 = vrot.slane %v918_v24, 4 }
  0x64   : > { %v1091_v46 = vrot.slane %v1041_v33, 4  ;;  %v1092_v52 = vrot.slane %v1042_v43, 4  ;;  %v1094_v21 = vrot.slane %v1043_v1, 4  ;;  %v1167_v2 = vmul.f32 %v3496_v58, %v3767_v15  ;;  %v2970_v1 = vld [vmem:[%s3353_s26 + $0xa0] sm:$0xf] }
  0x65   : > { %v1215_v31 = vrot.slane %v1165_v38, 4  ;;  %v969_v12 = vsel %vm961_vm1, %v967_v54, %v968_v35  ;;  %v971_v61 = vsel %vm961_vm1, %v968_v35, %v970_v59  ;;  %v1216_v36 = vrot.slane %v1166_v62, 4 }
  0x66   : > { %v1602_v4 = vmax.bf16 %v5147_v53, %v2961_v56  ;;  %v1020_v63 = vadd.f32 %v969_v12, %v823_v51  ;;  %v1021_v24 = vadd.f32 %v971_v61, %v824_v55  ;;  %v1093_v33 = vsel %vm961_vm1, %v1091_v46, %v1092_v52  ;;  %v2989_v61 = vld [vmem:[%s3353_s26 + $0x84] sm:$0xe] }
  0x67   : > { %v1095_v43 = vsel %vm961_vm1, %v1092_v52, %v1094_v21  ;;  %v1217_v38 = vsel %vm961_vm1, %v1215_v31, %v1216_v36  ;;  %v1218_v15 = vrot.slane %v1167_v2, 4  ;;  %v1603_v54 = vmax.bf16 %v5147_v53, %v2962_v3  ;;  %v2985_v3 = vld [vmem:[%s3353_s26 + $0x6c] sm:$0xe] }
  0x68   : > { %v3801_v62 = vmax.bf16 %v5147_v53, %v2965_v50  ;;  %v1144_v35 = vadd.f32 %v1093_v33, %v1020_v63  ;;  %v1145_v56 = vadd.f32 %v1095_v43, %v1021_v24  ;;  %v1607_v51 = vmax.bf16 %v5147_v53, %v2966_v14  ;;  %v2986_v14 = vld [vmem:[%s3353_s26 + $0x74] sm:$0x1]  ;;  %v2993_v24 = vld [vmem:[%s3353_s26 + $0x9c] sm:$0xe] }
  0x69   : > { %v1610_v55 = vmax.bf16 %v5147_v53, %v2969_v57  ;;  %v1219_v59 = vsel %vm961_vm1, %v1216_v36, %v1218_v15  ;;  %v1611_v46 = vmax.bf16 %v5147_v53, %v2970_v1  ;;  %v1626_v52 = vunpack.c.l.bf16 %v1602_v4  ;;  %v2990_v4 = vld [vmem:[%s3353_s26 + $0x8c] sm:$0x1] }
  0x6a   : > { %5152 = vst [vmem:[#allocation17_spill] sm:$0xff] %v3801_v62  ;;  %v3807_v21 = vunpack.c.l.bf16 %v1603_v54  ;;  %v1268_v2 = vadd.f32 %v1217_v38, %v1144_v35  ;;  %v1269_v31 = vadd.f32 %v1219_v59, %v1145_v56  ;;  %v5055_v50 = vunpack.c.l.bf16 %v3801_v62  ;;  %v2994_v38 = vld [vmem:[%s3353_s26 + $0xa4] sm:$0x1] }
  0x6b   : > { %v3811_v12 = vunpack.c.l.bf16 %v1607_v51  ;;  %v3815_v57 = vunpack.c.l.bf16 %v1610_v55  ;;  %v3817_v63 = vunpack.c.l.bf16 %v1611_v46  ;;  %v1650_v36 = vmul.f32 %v1626_v52, %v3372_v17 }
  0x6c   : > { %v1651_v15 = vmul.f32 %v3807_v21, %v3372_v17  ;;  %v1283_v33 = vpack.c.bf16 %v1269_v31, %v1268_v2  ;;  %v1666_v43 = vmul.f32 %v5055_v50, %v3375_v18  ;;  %v1754_v54 = vmax.bf16 %v5147_v53, %v2985_v3 }
  0x6d   : > { %5153 = vst [vmem:[#allocation18_spill] sm:$0xff] %v3815_v57  ;;  %v1667_v1 = vmul.f32 %v3811_v12, %v3375_v18  ;;  %v1698_v35 = vmul.f32 %v3815_v57, %v3378_v19  ;;  %v1699_v56 = vmul.f32 %v3817_v63, %v3378_v19  ;;  %v1755_v51 = vmax.bf16 %v5147_v53, %v2986_v14 }
  0x6e   : > { %v3837_v55 = vmax.bf16 %v5147_v53, %v2989_v61  ;;  %3226 = vmatmul.mubr.bf16.vlgmr.msra.gmra.mrb[0].mxu0 %v1283_v33  ;;  %v1682_v59 = vadd.f32 %v1666_v43, %v1650_v36  ;;  %v3840_v52 = vmax.bf16 %v5147_v53, %v2990_v4  ;;  %v1762_v2 = vmax.bf16 %v5147_v53, %v2993_v24 }
  0x6f   : > { %v1683_v46 = vadd.f32 %v1667_v1, %v1651_v15  ;;  %v1763_v3 = vmax.bf16 %v5147_v53, %v2994_v38  ;;  %v1778_v31 = vunpack.c.l.bf16 %v1754_v54  ;;  %v1779_v50 = vunpack.c.l.bf16 %v1755_v51  ;;  %v3009_v51 = vld [vmem:[%s3353_s26 + $0x6c] sm:$0xc] }
  0x70   : > { %5154 = vst [vmem:[#allocation19_spill] sm:$0xff] %v3837_v55  ;;  %5155 = vst [vmem:[#allocation20_spill] sm:$0xff] %v3840_v52  ;;  %v5061_v57 = vunpack.c.l.bf16 %v3837_v55  ;;  %v1714_v62 = vadd.f32 %v1698_v35, %v1682_v59  ;;  %v5060_v61 = vunpack.c.l.bf16 %v3840_v52  ;;  %v3846_v20 = vunpack.c.l.bf16 %v1762_v2 }
  0x71   : > { %v1715_v14 = vadd.f32 %v1699_v56, %v1683_v46  ;;  %v3848_v36 = vunpack.c.l.bf16 %v1763_v3  ;;  %v1803_v15 = vmul.f32 %v1778_v31, %v3389_v26  ;;  %v1804_v4 = vmul.f32 %v3807_v21, %v3389_v26  ;;  %v3010_v31 = vld [vmem:[%s3353_s26 + $0x74] sm:$0x3] }
  0x72   : > { %5156 = vst [vmem:[#allocation21_spill] sm:$0xff] %v3846_v20  ;;  %v1805_v24 = vmul.f32 %v1779_v50, %v3389_v26  ;;  %v1923_v33 = vmul.f32 %v5061_v57, %v3463_v25  ;;  %v1924_v43 = vmul.f32 %v3811_v12, %v3463_v25  ;;  %v1925_v1 = vmul.f32 %v5060_v61, %v3463_v25 }
  0x73   : > { %5157 = vst [vmem:[#allocation22_spill] sm:$0xff] %v3848_v36  ;;  %v2043_v38 = vmul.f32 %v3846_v20, %v3466_v27  ;;  %v1853_v54 = vrot.slane %v1803_v15, 2  ;;  %v1854_v35 = vrot.slane %v1804_v4, 2  ;;  %v2044_v50 = vmul.f32 %v3817_v63, %v3466_v27  ;;  %v3014_v20 = vld [vmem:[%s3353_s26 + $0x8c] sm:$0x3] }
  0x74   : > { %v1856_v56 = vrot.slane %v1805_v24, 2  ;;  %v1973_v59 = vrot.slane %v1923_v33, 2  ;;  %v1974_v46 = vrot.slane %v1924_v43, 2  ;;  %v1976_v2 = vrot.slane %v1925_v1, 2  ;;  %v3013_v24 = vld [vmem:[%s3353_s26 + $0x84] sm:$0xc] }
  0x75   : > { %v2045_v3 = vmul.f32 %v3848_v36, %v3466_v27  ;;  %v1855_v61 = vsel %vm516_vm0, %v1853_v54, %v1854_v35  ;;  %v2093_v15 = vrot.slane %v2043_v38, 2  ;;  %v2094_v4 = vrot.slane %v2044_v50, 2  ;;  %v3017_v43 = vld [vmem:[%s3353_s26 + $0x9c] sm:$0xc]  ;;  %v3018_v1 = vld [vmem:[%s3353_s26 + $0xa4] sm:$0x3] }
  0x76   : > { %v1857_v57 = vsel %vm516_vm0, %v1854_v35, %v1856_v56  ;;  %v1906_v52 = vadd.f32 %v1855_v61, %v1714_v62  ;;  %v1975_v44 = vsel %vm516_vm0, %v1973_v59, %v1974_v46  ;;  %v1977_v33 = vsel %vm516_vm0, %v1974_v46, %v1976_v2 }
  0x77   : > { %v1907_v55 = vadd.f32 %v1857_v57, %v1715_v14  ;;  %v2095_v16 = vsel %vm516_vm0, %v2093_v15, %v2094_v4  ;;  %v2096_v36 = vrot.slane %v2045_v3, 2  ;;  %v2186_v8 = vmax.bf16 %v5147_v53, %v3009_v51 }
  0x78   : > { %v2187_v54 = vmax.bf16 %v5147_v53, %v3010_v31  ;;  %v2026_v35 = vadd.f32 %v1975_v44, %v1906_v52  ;;  %v3882_v56 = vmax.bf16 %v5147_v53, %v3013_v24  ;;  %v3885_v62 = vmax.bf16 %v5147_v53, %v3014_v20  ;;  %v240_v24 = vld [vmem:[%s3353_s26 + $0x48] sm:$0xf] }
  0x79   : > { %v2027_v38 = vadd.f32 %v1977_v33, %v1907_v55  ;;  %v2097_v57 = vsel %vm516_vm0, %v2094_v4, %v2096_v36  ;;  %v2194_v14 = vmax.bf16 %v5147_v53, %v3017_v43  ;;  %v2195_v61 = vmax.bf16 %v5147_v53, %v3018_v1 }
  0x7a   : > { %v2210_v50 = vunpack.c.l.bf16 %v2186_v8  ;;  %v2146_v59 = vadd.f32 %v2095_v16, %v2026_v35  ;;  %v2211_v46 = vunpack.c.l.bf16 %v2187_v54  ;;  %v5074_v44 = vunpack.c.l.bf16 %v3882_v56 }
  0x7b   : > { %v2147_v51 = vadd.f32 %v2097_v57, %v2027_v38  ;;  %v5073_v55 = vunpack.c.l.bf16 %v3885_v62  ;;  %v3892_v52 = vunpack.c.l.bf16 %v2194_v14  ;;  %v3894_v2 = vunpack.c.l.bf16 %v2195_v61  ;;  %v241_v61 = vld [vmem:[%s3353_s26 + $0x4c] sm:$0xf] }
  0x7c   : > { %v2235_v20 = vmul.f32 %v2210_v50, %v3514_v29  ;;  %v2236_v36 = vmul.f32 %v3807_v21, %v3514_v29  ;;  %v2237_v3 = vmul.f32 %v2211_v46, %v3514_v29  ;;  %v2355_v8 = vmul.f32 %v5074_v44, %v3521_v32 }
  0x7d   : > { %v2356_v16 = vmul.f32 %v3811_v12, %v3521_v32  ;;  %v2357_v15 = vmul.f32 %v5073_v55, %v3521_v32  ;;  %v2475_v4 = vmul.f32 %v3496_v58, %v3892_v52  ;;  %v2476_v21 = vmul.f32 %v3496_v58, %v3817_v63 }
  0x7e   : > { %v2285_v31 = vrot.slane %v2235_v20, 4  ;;  %v2286_v33 = vrot.slane %v2236_v36, 4  ;;  %v2288_v43 = vrot.slane %v2237_v3, 4  ;;  %v2405_v1 = vrot.slane %v2355_v8, 4 }
  0x7f   : > { %v2406_v54 = vrot.slane %v2356_v16, 4  ;;  %v2408_v35 = vrot.slane %v2357_v15, 4  ;;  %v2477_v38 = vmul.f32 %v3496_v58, %v3894_v2  ;;  %v2525_v57 = vrot.slane %v2475_v4, 4 }
  0x80   : > { %v2526_v14 = vrot.slane %v2476_v21, 4  ;;  %v2287_v50 = vsel %vm961_vm1, %v2285_v31, %v2286_v33  ;;  %v2289_v46 = vsel %vm961_vm1, %v2286_v33, %v2288_v43  ;;  %v264_v36 = vmax.bf16 %v5147_v53, %v240_v24  ;;  %v404_v43 = vld [vmem:[%s3353_s26 + $0x48] sm:$0xe]  ;;  %v405_v24 = vld [vmem:[%s3353_s26 + $0x50] sm:$0x1] }
  0x81   : > { %v2407_v20 = vsel %vm961_vm1, %v2405_v1, %v2406_v54  ;;  %v2338_v3 = vadd.f32 %v2287_v50, %v2146_v59  ;;  %v2339_v8 = vadd.f32 %v2289_v46, %v2147_v51  ;;  %v2409_v16 = vsel %vm961_vm1, %v2406_v54, %v2408_v35 }
  0x82   : > { %v2527_v15 = vsel %vm961_vm1, %v2525_v57, %v2526_v14  ;;  %v2528_v55 = vrot.slane %v2477_v38, 4  ;;  %v265_v4 = vmax.bf16 %v5147_v53, %v241_v61  ;;  %v3923_v21 = vunpack.c.l.bf16 %v264_v36 }
  0x83   : > { %v5158_v31 = vunpack.c.l.bf16 %v3384_v23  ;;  %v2458_v44 = vadd.f32 %v2407_v20, %v2338_v3  ;;  %v2459_v1 = vadd.f32 %v2409_v16, %v2339_v8  ;;  %v309_v59 = vmul.f32 %v3372_v17, %v3403_v37 }
  0x84   : > { %v328_v51 = vmul.f32 %v3375_v18, %v3407_v40  ;;  %v2529_v54 = vsel %vm961_vm1, %v2526_v14, %v2528_v55  ;;  %v3935_v35 = vunpack.c.l.bf16 %v265_v4  ;;  %v329_v38 = vmul.f32 %v3375_v18, %v3409_v41 }
  0x85   : > { %v308_v33 = vmul.f32 %v3372_v17, %v5158_v31  ;;  %v364_v23 = vmul.f32 %v3378_v19, %v3923_v21  ;;  %v2578_v57 = vadd.f32 %v2527_v15, %v2458_v44  ;;  %v2579_v61 = vadd.f32 %v2529_v54, %v2459_v1 }
  0x86   : > { %v428_v46 = vmax.bf16 %v5147_v53, %v404_v43  ;;  %v345_v20 = vadd.f32 %v329_v38, %v309_v59  ;;  %v365_v36 = vmul.f32 %v3378_v19, %v3935_v35  ;;  %v429_v55 = vmax.bf16 %v5147_v53, %v405_v24  ;;  %v849_v24 = vld [vmem:[%s3353_s26 + $0x48] sm:$0xc] }
  0x87   : > { %v344_v50 = vadd.f32 %v328_v51, %v308_v33  ;;  %v475_v14 = vmul.f32 %v3389_v26, %v3403_v37  ;;  %v2593_v3 = vpack.c.bf16 %v2579_v61, %v2578_v57  ;;  %v599_v44 = vmul.f32 %v3463_v25, %v3434_v60 }
  0x88   : > { %v3947_v16 = vunpack.c.l.bf16 %v428_v46  ;;  %v381_v15 = vadd.f32 %v365_v36, %v345_v20  ;;  %v3951_v4 = vunpack.c.l.bf16 %v429_v55  ;;  %v600_v33 = vmul.f32 %v3463_v25, %v3409_v41  ;;  %v850_v46 = vld [vmem:[%s3353_s26 + $0x50] sm:$0x3] }
  0x89   : > { %v380_v8 = vadd.f32 %v364_v23, %v344_v50  ;;  %v528_v31 = vrot.slane %v475_v14, 2  ;;  %3258 = vmatmul.mubr.bf16.vlgmr.msra.gmra.mrb[0].mxu1 %v2593_v3  ;;  %v601_v43 = vmul.f32 %v3463_v25, %v3437_v0  ;;  %v651_v1 = vrot.slane %v599_v44, 2 }
  0x8a   : > { %5159 = vst [vmem:[#allocation23_spill] sm:$0xff] %v3947_v16  ;;  %v723_v59 = vmul.f32 %v3466_v27, %v3947_v16  ;;  %v724_v51 = vmul.f32 %v3466_v27, %v3935_v35  ;;  %v5160_v54 = vrot.slane %v3447_v6, 2  ;;  %v5161_v23 = vrot.slane %v3450_v7, 2 }
  0x8b   : > { %v652_v61 = vrot.slane %v600_v33, 2  ;;  %v725_v50 = vmul.f32 %v3466_v27, %v3951_v4  ;;  %v654_v55 = vrot.slane %v601_v43, 2  ;;  %v873_v6 = vmax.bf16 %v5147_v53, %v849_v24 }
  0x8c   : > { %v529_v38 = vsel %vm516_vm0, %v5160_v54, %v528_v31  ;;  %v531_v57 = vsel %vm516_vm0, %v528_v31, %v5161_v23  ;;  %v775_v14 = vrot.slane %v723_v59, 2  ;;  %v776_v44 = vrot.slane %v724_v51, 2 }
  0x8d   : > { %v577_v20 = vadd.f32 %v529_v38, %v380_v8  ;;  %v578_v36 = vadd.f32 %v531_v57, %v381_v15  ;;  %v653_v3 = vsel %vm516_vm0, %v651_v1, %v652_v61  ;;  %v778_v16 = vrot.slane %v725_v50, 2 }
  0x8e   : > { %v655_v54 = vsel %vm516_vm0, %v652_v61, %v654_v55  ;;  %v874_v31 = vmax.bf16 %v5147_v53, %v850_v46  ;;  %v920_v33 = vmul.f32 %v3514_v29, %v3403_v37  ;;  %v777_v8 = vsel %vm516_vm0, %v775_v14, %v776_v44 }
  0x8f   : > { %v701_v7 = vadd.f32 %v653_v3, %v577_v20  ;;  %v702_v23 = vadd.f32 %v655_v54, %v578_v36  ;;  %v779_v15 = vsel %vm516_vm0, %v776_v44, %v778_v16  ;;  %v3979_v43 = vunpack.c.l.bf16 %v873_v6  ;;  %v2971_v16 = vld [vmem:[%s3353_s26 + $0xa8] sm:$0xf]  ;;  %v2972_v3 = vld [vmem:[%s3353_s26 + $0xac] sm:$0xf] }
  0x90   : > { %v3981_v59 = vunpack.c.l.bf16 %v874_v31  ;;  %v973_v51 = vrot.slane %v920_v33, 4  ;;  %v1044_v24 = vmul.f32 %v3521_v32, %v3503_v10  ;;  %v1045_v57 = vmul.f32 %v3521_v32, %v3409_v41 }
  0x91   : > { %v825_v1 = vadd.f32 %v777_v8, %v701_v7  ;;  %v826_v38 = vadd.f32 %v779_v15, %v702_v23  ;;  %v1046_v37 = vmul.f32 %v3521_v32, %v3505_v11  ;;  %v1168_v61 = vmul.f32 %v3496_v58, %v3979_v43 }
  0x92   : > { %v5162_v50 = vrot.slane %v3530_v45, 4  ;;  %v5163_v20 = vrot.slane %v3533_v9, 4  ;;  %v1096_v55 = vrot.slane %v1044_v24, 4  ;;  %v1169_v14 = vmul.f32 %v3496_v58, %v3935_v35  ;;  %v4004_v45 = vld [vmem:[%s5028_s1 + $0x8] ss:$0 sm:$0xff] }
  0x93   : > { %v1097_v54 = vrot.slane %v1045_v57, 4  ;;  %v1099_v7 = vrot.slane %v1046_v37, 4  ;;  %v1170_v9 = vmul.f32 %v4004_v45, %v3981_v59  ;;  %v1220_v31 = vrot.slane %v1168_v61, 4  ;;  %v2995_v24 = vld [vmem:[%s3353_s26 + $0xa8] sm:$0xe] }
  0x94   : > { %v974_v46 = vsel %vm961_vm1, %v5162_v50, %v973_v51  ;;  %v976_v36 = vsel %vm961_vm1, %v973_v51, %v5163_v20  ;;  %v1221_v33 = vrot.slane %v1169_v14, 4  ;;  %v1612_v23 = vmax.bf16 %v5147_v53, %v2971_v16 }
  0x95   : > { %v1022_v44 = vadd.f32 %v974_v46, %v825_v1  ;;  %v1023_v6 = vadd.f32 %v976_v36, %v826_v38  ;;  %v1098_v58 = vsel %vm961_vm1, %v1096_v55, %v1097_v54  ;;  %v1100_v8 = vsel %vm961_vm1, %v1097_v54, %v1099_v7  ;;  %v2996_v36 = vld [vmem:[%s3353_s26 + $0xb0] sm:$0x1] }
  0x96   : > { %v1613_v15 = vmax.bf16 %v5147_v53, %v2972_v3  ;;  %v5164_v1 = vunpack.c.l.bf16 %v3552_v13  ;;  %v1222_v37 = vsel %vm961_vm1, %v1220_v31, %v1221_v33  ;;  %v1223_v61 = vrot.slane %v1170_v9, 4 }
  0x97   : > { %v1146_v38 = vadd.f32 %v1098_v58, %v1022_v44  ;;  %v1147_v57 = vadd.f32 %v1100_v8, %v1023_v6  ;;  %v4017_v50 = vunpack.c.l.bf16 %v1612_v23  ;;  %v1653_v16 = vmul.f32 %v3560_v39, %v3372_v17 }
  0x98   : > { %v1652_v51 = vmul.f32 %v5164_v1, %v3372_v17  ;;  %v4019_v46 = vunpack.c.l.bf16 %v1613_v15  ;;  %v1668_v20 = vmul.f32 %v3563_v47, %v3375_v18  ;;  %v1224_v13 = vsel %vm961_vm1, %v1221_v33, %v1223_v61 }
  0x99   : > { %v1270_v55 = vadd.f32 %v1222_v37, %v1146_v38  ;;  %v1669_v14 = vmul.f32 %v3565_v34, %v3375_v18  ;;  %v1764_v3 = vmax.bf16 %v5147_v53, %v2995_v24  ;;  %v1271_v44 = vadd.f32 %v1224_v13, %v1147_v57 }
  0x9a   : > { %v1684_v6 = vadd.f32 %v1668_v20, %v1652_v51  ;;  %v1700_v54 = vmul.f32 %v4017_v50, %v3378_v19  ;;  %v1701_v7 = vmul.f32 %v4019_v46, %v3378_v19  ;;  %v1765_v31 = vmax.bf16 %v5147_v53, %v2996_v36  ;;  %v3019_v36 = vld [vmem:[%s3353_s26 + $0xa8] sm:$0xc] }
  0x9b   : > { %v1685_v9 = vadd.f32 %v1669_v14, %v1653_v16  ;;  %v4035_v23 = vunpack.c.l.bf16 %v1764_v3  ;;  %v1807_v33 = vmul.f32 %v3560_v39, %v3389_v26  ;;  %v1284_v58 = vpack.c.bf16 %v1271_v44, %v1270_v55 }
  0x9c   : > { %v1716_v8 = vadd.f32 %v1700_v54, %v1684_v6  ;;  %v1926_v15 = vmul.f32 %v3590_v28, %v3463_v25  ;;  %v1927_v1 = vmul.f32 %v3565_v34, %v3463_v25  ;;  %v4043_v24 = vunpack.c.l.bf16 %v1765_v31  ;;  %v3020_v54 = vld [vmem:[%s3353_s26 + $0xb0] sm:$0x3] }
  0x9d   : > { %5165 = vst [vmem:[#allocation24_spill] sm:$0xff] %v4035_v23  ;;  %v1717_v51 = vadd.f32 %v1701_v7, %v1685_v9  ;;  %v1859_v38 = vrot.slane %v1807_v33, 2  ;;  %v1928_v57 = vmul.f32 %v3592_v30, %v3463_v25  ;;  %3229 = vmatprep.mubr.bf16.mxu0 %v1284_v58  ;;  %v2046_v16 = vmul.f32 %v4035_v23, %v3466_v27  ;;  %v5188_v23 = vld [vmem:[#allocation13_spill] sm:$0xff] }
  0x9e   : > { %5166 = vst [vmem:[#allocation25_spill] sm:$0xff] %v4043_v24  ;;  %v1978_v37 = vrot.slane %v1926_v15, 2  ;;  %v1979_v61 = vrot.slane %v1927_v1, 2  ;;  %v2047_v20 = vmul.f32 %v4019_v46, %v3466_v27  ;;  %v5167_v13 = vrot.slane %v3599_v48, 2 }
  0x9f   : > { %v5168_v14 = vrot.slane %v3603_v49, 2  ;;  %v1981_v44 = vrot.slane %v1928_v57, 2  ;;  %v2048_v6 = vmul.f32 %v4043_v24, %v3466_v27  ;;  %v2098_v33 = vrot.slane %v2046_v16, 2 }
  0xa0   : > { %v1860_v55 = vsel %vm516_vm0, %v5167_v13, %v1859_v38  ;;  %v1980_v31 = vsel %vm516_vm0, %v1978_v37, %v1979_v61  ;;  %v2099_v15 = vrot.slane %v2047_v20, 2  ;;  %v2196_v1 = vmax.bf16 %v5147_v53, %v3019_v36 }
  0xa1   : > { %v1862_v3 = vsel %vm516_vm0, %v1859_v38, %v5168_v14  ;;  %v1908_v7 = vadd.f32 %v1860_v55, %v1716_v8  ;;  %v1982_v58 = vsel %vm516_vm0, %v1979_v61, %v1981_v44  ;;  %v2101_v48 = vrot.slane %v2048_v6, 2  ;;  %v242_v6 = vld [vmem:[%s3353_s26 + $0x54] sm:$0xf] }
  0xa2   : > { %v1909_v9 = vadd.f32 %v1862_v3, %v1717_v51  ;;  %v2197_v38 = vmax.bf16 %v5147_v53, %v3020_v54  ;;  %v2239_v57 = vmul.f32 %v3560_v39, %v3514_v29  ;;  %v2100_v8 = vsel %vm516_vm0, %v2098_v33, %v2099_v15 }
  0xa3   : > { %v2028_v13 = vadd.f32 %v1980_v31, %v1908_v7  ;;  %v2102_v51 = vsel %vm516_vm0, %v2099_v15, %v2101_v48  ;;  %v4069_v37 = vunpack.c.l.bf16 %v2196_v1  ;;  %v2358_v61 = vmul.f32 %v3634_v22, %v3521_v32  ;;  %v243_v48 = vld [vmem:[%s3353_s26 + $0x58] sm:$0xf] }
  0xa4   : > { %v2029_v49 = vadd.f32 %v1982_v58, %v1909_v9  ;;  %v4073_v36 = vunpack.c.l.bf16 %v2197_v38  ;;  %v2291_v55 = vrot.slane %v2239_v57, 4  ;;  %v2359_v14 = vmul.f32 %v3565_v34, %v3521_v32  ;;  %v5172_v9 = vld [vmem:[#allocation4_spill] sm:$0xff] }
  0xa5   : > { %5169 = vst [vmem:[#allocation26_spill] sm:$0xff] %v4069_v37  ;;  %v2148_v16 = vadd.f32 %v2100_v8, %v2028_v13  ;;  %v2360_v39 = vmul.f32 %v3636_v5, %v3521_v32  ;;  %v2410_v3 = vrot.slane %v2358_v61, 4  ;;  %v2478_v44 = vmul.f32 %v4004_v45, %v4069_v37 }
  0xa6   : > { %v2149_v20 = vadd.f32 %v2102_v51, %v2029_v49  ;;  %5170 = vst [vmem:[#allocation27_spill] sm:$0xff] %v4073_v36  ;;  %v5171_v54 = vrot.slane %v3645_v42, 4  ;;  %v5173_v31 = vrot.slane %v5172_v9, 4  ;;  %v2479_v58 = vmul.f32 %v4004_v45, %v4019_v46  ;;  %v5174_v9 = vld [vmem:[#allocation5_spill] sm:$0xff] }
  0xa7   : > { %v2480_v15 = vmul.f32 %v4004_v45, %v4073_v36  ;;  %v2411_v49 = vrot.slane %v2359_v14, 4  ;;  %v2413_v38 = vrot.slane %v2360_v39, 4  ;;  %v2530_v42 = vrot.slane %v2478_v44, 4  ;;  %v407_v44 = vld [vmem:[%s3353_s26 + $0x5c] sm:$0x1] }
  0xa8   : > { %v2292_v7 = vsel %vm961_vm1, %v5171_v54, %v2291_v55  ;;  %v2294_v33 = vsel %vm961_vm1, %v2291_v55, %v5173_v31  ;;  %v2531_v57 = vrot.slane %v2479_v58, 4  ;;  %v266_v51 = vmax.bf16 %v5147_v53, %v242_v6 }
  0xa9   : > { %v2340_v1 = vadd.f32 %v2292_v7, %v2148_v16  ;;  %v2341_v13 = vadd.f32 %v2294_v33, %v2149_v20  ;;  %v2533_v8 = vrot.slane %v2480_v15, 4  ;;  %v2412_v61 = vsel %vm961_vm1, %v2410_v3, %v2411_v49  ;;  %v406_v16 = vld [vmem:[%s3353_s26 + $0x54] sm:$0xe]  ;;  %v5177_v3 = vld [vmem:[#allocation6_spill] sm:$0xff]  ;;  %v5178_v15 = vld [vmem:[#allocation7_spill] sm:$0xff] }
  0xaa   : > { %v2414_v55 = vsel %vm961_vm1, %v2411_v49, %v2413_v38  ;;  %v267_v54 = vmax.bf16 %v5147_v53, %v243_v48  ;;  %v5175_v31 = vunpack.c.l.bf16 %v5174_v9  ;;  %v2532_v14 = vsel %vm961_vm1, %v2530_v42, %v2531_v57  ;;  %v5179_v9 = vld [vmem:[#allocation8_spill] sm:$0xff] }
  0xab   : > { %v2460_v20 = vadd.f32 %v2412_v61, %v2340_v1  ;;  %v2461_v7 = vadd.f32 %v2414_v55, %v2341_v13  ;;  %v2534_v39 = vsel %vm961_vm1, %v2531_v57, %v2533_v8  ;;  %v4104_v33 = vunpack.c.l.bf16 %v266_v51 }
  0xac   : > { %v310_v36 = vmul.f32 %v3372_v17, %v5175_v31  ;;  %v4106_v6 = vunpack.c.l.bf16 %v267_v54  ;;  %v311_v58 = vmul.f32 %v3372_v17, %v5177_v3  ;;  %v330_v48 = vmul.f32 %v3375_v18, %v5178_v15  ;;  %v5181_v31 = vld [vmem:[#allocation9_spill] sm:$0xff] }
  0xad   : > { %5176 = vst [vmem:[#allocation4_spill] sm:$0xff] %v4104_v33  ;;  %v2580_v49 = vadd.f32 %v2532_v14, %v2460_v20  ;;  %v2581_v38 = vadd.f32 %v2534_v39, %v2461_v7  ;;  %v331_v1 = vmul.f32 %v3375_v18, %v5179_v9  ;;  %v430_v13 = vmax.bf16 %v5147_v53, %v406_v16  ;;  %v5184_v16 = vld [vmem:[#allocation10_spill] sm:$0xff] }
  0xae   : > { %v346_v42 = vadd.f32 %v330_v48, %v310_v36  ;;  %v366_v57 = vmul.f32 %v3378_v19, %v4104_v33  ;;  %v367_v8 = vmul.f32 %v3378_v19, %v4106_v6  ;;  %v431_v51 = vmax.bf16 %v5147_v53, %v407_v44 }
  0xaf   : > { %v2594_v61 = vpack.c.bf16 %v2581_v38, %v2580_v49  ;;  %v347_v55 = vadd.f32 %v331_v1, %v311_v58  ;;  %v4120_v54 = vunpack.c.l.bf16 %v430_v13  ;;  %v5182_v20 = vunpack.c.l.bf16 %v5181_v31  ;;  %v5186_v38 = vld [vmem:[#allocation11_spill] sm:$0xff] }
  0xb0   : > { %v382_v14 = vadd.f32 %v366_v57, %v346_v42  ;;  %v4125_v39 = vunpack.c.l.bf16 %v431_v51  ;;  %v478_v36 = vmul.f32 %v3389_v26, %v5177_v3  ;;  %v5185_v48 = vunpack.c.l.bf16 %v5184_v16  ;;  %v5187_v51 = vld [vmem:[#allocation12_spill] sm:$0xff] }
  0xb1   : > { %5180 = vst [vmem:[#allocation5_spill] sm:$0xff] %v4120_v54  ;;  %v477_v7 = vmul.f32 %v3389_v26, %v5182_v20  ;;  %3261 = vmatprep.mubr.bf16.mxu1 %v2594_v61  ;;  %v383_v58 = vadd.f32 %v367_v8, %v347_v55  ;;  %v602_v1 = vmul.f32 %v3463_v25, %v5186_v38  ;;  %v851_v55 = vld [vmem:[%s3353_s26 + $0x54] sm:$0xc] }
  0xb2   : > { %5183 = vst [vmem:[#allocation6_spill] sm:$0xff] %v4125_v39  ;;  %v479_v44 = vmul.f32 %v3389_v26, %v5185_v48  ;;  %v603_v13 = vmul.f32 %v3463_v25, %v5179_v9  ;;  %v533_v42 = vrot.slane %v478_v36, 2  ;;  %v604_v31 = vmul.f32 %v3463_v25, %v5187_v51 }
  0xb3   : > { %v532_v49 = vrot.slane %v477_v7, 2  ;;  %v726_v20 = vmul.f32 %v3466_v27, %v4120_v54  ;;  %v656_v16 = vrot.slane %v602_v1, 2  ;;  %v727_v8 = vmul.f32 %v3466_v27, %v4106_v6  ;;  %v852_v7 = vld [vmem:[%s3353_s26 + $0x5c] sm:$0x3] }
  0xb4   : > { %v535_v57 = vrot.slane %v479_v44, 2  ;;  %v657_v33 = vrot.slane %v603_v13, 2  ;;  %v728_v61 = vmul.f32 %v3466_v27, %v4125_v39  ;;  %v659_v44 = vrot.slane %v604_v31, 2 }
  0xb5   : > { %v534_v48 = vsel %vm516_vm0, %v532_v49, %v533_v42  ;;  %v780_v38 = vrot.slane %v726_v20, 2  ;;  %v781_v1 = vrot.slane %v727_v8, 2  ;;  %v875_v5 = vmax.bf16 %v5147_v53, %v851_v55  ;;  %v5194_v8 = vld [vmem:[#allocation15_spill] sm:$0xff] }
  0xb6   : > { %v536_v36 = vsel %vm516_vm0, %v533_v42, %v535_v57  ;;  %v579_v51 = vadd.f32 %v534_v48, %v382_v14  ;;  %v658_v54 = vsel %vm516_vm0, %v656_v16, %v657_v33  ;;  %v660_v13 = vsel %vm516_vm0, %v657_v33, %v659_v44 }
  0xb7   : > { %v580_v15 = vadd.f32 %v536_v36, %v383_v58  ;;  %v783_v37 = vrot.slane %v728_v61, 2  ;;  %v876_v39 = vmax.bf16 %v5147_v53, %v852_v7  ;;  %v782_v49 = vsel %vm516_vm0, %v780_v38, %v781_v1  ;;  %v2973_v7 = vld [vmem:[%s3353_s26 + $0xb4] sm:$0xf] }
  0xb8   : > { %v703_v22 = vadd.f32 %v658_v54, %v579_v51  ;;  %v5189_v42 = vunpack.c.l.bf16 %v5188_v23  ;;  %v4157_v58 = vunpack.c.l.bf16 %v875_v5  ;;  %v923_v33 = vmul.f32 %v3514_v29, %v5177_v3  ;;  %v5192_v54 = vld [vmem:[#allocation14_spill] sm:$0xff] }
  0xb9   : > { %v704_v24 = vadd.f32 %v660_v13, %v580_v15  ;;  %v784_v14 = vsel %vm516_vm0, %v781_v1, %v783_v37  ;;  %v4159_v31 = vunpack.c.l.bf16 %v876_v39  ;;  %v5193_v15 = vunpack.c.l.bf16 %v5192_v54  ;;  %v5195_v39 = vld [vmem:[#allocation16_spill] sm:$0xff]  ;;  %v2974_v13 = vld [vmem:[%s3353_s26 + $0xb8] sm:$0xf] }
  0xba   : > { %v922_v57 = vmul.f32 %v3514_v29, %v5189_v42  ;;  %5190 = vst [vmem:[#allocation8_spill] sm:$0xff] %v4157_v58  ;;  %v827_v20 = vadd.f32 %v782_v49, %v703_v22  ;;  %v978_v51 = vrot.slane %v923_v33, 4  ;;  %v1047_v37 = vmul.f32 %v3521_v32, %v5194_v8 }
  0xbb   : > { %5191 = vst [vmem:[#allocation9_spill] sm:$0xff] %v4159_v31  ;;  %v828_v16 = vadd.f32 %v784_v14, %v704_v24  ;;  %v924_v38 = vmul.f32 %v3514_v29, %v5193_v15  ;;  %v1048_v5 = vmul.f32 %v3521_v32, %v5179_v9  ;;  %v1049_v61 = vmul.f32 %v3521_v32, %v5195_v39 }
  0xbc   : > { %v977_v23 = vrot.slane %v922_v57, 4  ;;  %v1171_v22 = vmul.f32 %v4004_v45, %v4157_v58  ;;  %v1172_v24 = vmul.f32 %v4004_v45, %v4106_v6  ;;  %v1173_v3 = vmul.f32 %v4004_v45, %v4159_v31  ;;  %v2998_v58 = vld [vmem:[%s3353_s26 + $0xbc] sm:$0x1] }
  0xbd   : > { %v980_v55 = vrot.slane %v924_v38, 4  ;;  %v1101_v36 = vrot.slane %v1047_v37, 4  ;;  %v1102_v44 = vrot.slane %v1048_v5, 4  ;;  %v1104_v1 = vrot.slane %v1049_v61, 4  ;;  %v2997_v61 = vld [vmem:[%s3353_s26 + $0xb4] sm:$0xe] }
  0xbe   : > { %v979_v48 = vsel %vm961_vm1, %v977_v23, %v978_v51  ;;  %v1225_v57 = vrot.slane %v1171_v22, 4  ;;  %v1226_v14 = vrot.slane %v1172_v24, 4  ;;  %v1228_v38 = vrot.slane %v1173_v3, 4 }
  0xbf   : > { %v981_v49 = vsel %vm961_vm1, %v978_v51, %v980_v55  ;;  %v1024_v42 = vadd.f32 %v979_v48, %v827_v20  ;;  %v1103_v54 = vsel %vm961_vm1, %v1101_v36, %v1102_v44  ;;  %v1105_v15 = vsel %vm961_vm1, %v1102_v44, %v1104_v1  ;;  %v5196_v51 = vld [vmem:[#allocation17_spill] sm:$0xff] }
  0xc0   : > { %v1025_v33 = vadd.f32 %v981_v49, %v828_v16  ;;  %v1227_v23 = vsel %vm961_vm1, %v1225_v57, %v1226_v14  ;;  %v1614_v37 = vmax.bf16 %v5147_v53, %v2973_v7  ;;  %v1615_v5 = vmax.bf16 %v5147_v53, %v2974_v13  ;;  %v5199_v7 = vld [vmem:[#allocation18_spill] sm:$0xff] }
  0xc1   : > { %v1148_v31 = vadd.f32 %v1103_v54, %v1024_v42  ;;  %v1229_v20 = vsel %vm961_vm1, %v1226_v14, %v1228_v38  ;;  %v5197_v16 = vunpack.c.l.bf16 %v5196_v51  ;;  %v1655_v22 = vmul.f32 %v3811_v12, %v3372_v17  ;;  %v5200_v14 = vld [vmem:[#allocation19_spill] sm:$0xff] }
  0xc2   : > { %v1149_v39 = vadd.f32 %v1105_v15, %v1025_v33  ;;  %v4195_v3 = vunpack.c.l.bf16 %v1614_v37  ;;  %v4197_v48 = vunpack.c.l.bf16 %v1615_v5  ;;  %v1670_v36 = vmul.f32 %v5199_v7, %v3375_v18  ;;  %v5204_v5 = vld [vmem:[#allocation20_spill] sm:$0xff] }
  0xc3   : > { %v1654_v55 = vmul.f32 %v5197_v16, %v3372_v17  ;;  %v1272_v24 = vadd.f32 %v1227_v23, %v1148_v31  ;;  %v1671_v1 = vmul.f32 %v3817_v63, %v3375_v18  ;;  %v1766_v13 = vmax.bf16 %v5147_v53, %v2997_v61 }
  0xc4   : > { %5198 = vst [vmem:[#allocation10_spill] sm:$0xff] %v4195_v3  ;;  %v1273_v44 = vadd.f32 %v1229_v20, %v1149_v39  ;;  %v1767_v49 = vmax.bf16 %v5147_v53, %v2998_v58  ;;  %v1702_v57 = vmul.f32 %v4195_v3, %v3378_v19  ;;  %v1703_v31 = vmul.f32 %v4197_v48, %v3378_v19 }
  0xc5   : > { %v1686_v42 = vadd.f32 %v1670_v36, %v1654_v55  ;;  %v5201_v33 = vunpack.c.l.bf16 %v5200_v14  ;;  %v1687_v39 = vadd.f32 %v1671_v1, %v1655_v22  ;;  %v4212_v38 = vunpack.c.l.bf16 %v1766_v13  ;;  %v5206_v55 = vld [vmem:[#allocation21_spill] sm:$0xff]  ;;  %v5207_v36 = vld [vmem:[#allocation22_spill] sm:$0xff] }
  0xc6   : > { %v1285_v15 = vpack.c.bf16 %v1273_v44, %v1272_v24  ;;  %v4214_v23 = vunpack.c.l.bf16 %v1767_v49  ;;  %v1810_v58 = vmul.f32 %v3811_v12, %v3389_v26  ;;  %v5205_v61 = vunpack.c.l.bf16 %v5204_v5 }
  0xc7   : > { %v1809_v54 = vmul.f32 %v5201_v33, %v3389_v26  ;;  %5202 = vst [vmem:[#allocation13_spill] sm:$0xff] %v4212_v38  ;;  %v1718_v37 = vadd.f32 %v1702_v57, %v1686_v42  ;;  %v1719_v16 = vadd.f32 %v1703_v31, %v1687_v39  ;;  %v1929_v22 = vmul.f32 %v5206_v55, %v3463_v25  ;;  %v3021_v57 = vld [vmem:[%s3353_s26 + $0xb4] sm:$0xc] }
  0xc8   : > { %5203 = vst [vmem:[#allocation14_spill] sm:$0xff] %v4214_v23  ;;  %v1811_v20 = vmul.f32 %v5205_v61, %v3389_v26  ;;  %3230 = vmatmul.mubr.bf16.gmra.mrb[4].mxu0 %v1285_v15  ;;  %v1930_v24 = vmul.f32 %v3817_v63, %v3463_v25  ;;  %v1931_v44 = vmul.f32 %v5207_v36, %v3463_v25  ;;  %v1864_v1 = vrot.slane %v1810_v58, 2  ;;  %v3022_v15 = vld [vmem:[%s3353_s26 + $0xbc] sm:$0x3] }
  0xc9   : > { %v1863_v51 = vrot.slane %v1809_v54, 2  ;;  %v2049_v49 = vmul.f32 %v4212_v38, %v3466_v27  ;;  %v2050_v42 = vmul.f32 %v4197_v48, %v3466_v27  ;;  %v1983_v14 = vrot.slane %v1929_v22, 2 }
  0xca   : > { %v1866_v13 = vrot.slane %v1811_v20, 2  ;;  %v1984_v31 = vrot.slane %v1930_v24, 2  ;;  %v1986_v33 = vrot.slane %v1931_v44, 2  ;;  %v2051_v54 = vmul.f32 %v4214_v23, %v3466_v27 }
  0xcb   : > { %v1865_v39 = vsel %vm516_vm0, %v1863_v51, %v1864_v1  ;;  %v2103_v58 = vrot.slane %v2049_v49, 2  ;;  %v2104_v61 = vrot.slane %v2050_v42, 2  ;;  %v2198_v44 = vmax.bf16 %v5147_v53, %v3021_v57 }
  0xcc   : > { %v1867_v5 = vsel %vm516_vm0, %v1864_v1, %v1866_v13  ;;  %v1910_v20 = vadd.f32 %v1865_v39, %v1718_v37  ;;  %v1985_v38 = vsel %vm516_vm0, %v1983_v14, %v1984_v31  ;;  %v1987_v55 = vsel %vm516_vm0, %v1984_v31, %v1986_v33 }
  0xcd   : > { %v1911_v36 = vadd.f32 %v1867_v5, %v1719_v16  ;;  %v2105_v22 = vsel %vm516_vm0, %v2103_v58, %v2104_v61  ;;  %v2106_v24 = vrot.slane %v2051_v54, 2  ;;  %v2199_v23 = vmax.bf16 %v5147_v53, %v3022_v15  ;;  %v244_v54 = vld [vmem:[%s3353_s26 + $0x60] sm:$0xf]  ;;  %v245_v15 = vld [vmem:[%s3353_s26 + $0x64] sm:$0xf] }
  0xce   : > { %v2030_v3 = vadd.f32 %v1985_v38, %v1910_v20  ;;  %v5208_v51 = vunpack.c.l.bf16 %v3882_v56  ;;  %v2242_v37 = vmul.f32 %v3811_v12, %v3514_v29  ;;  %v4248_v13 = vunpack.c.l.bf16 %v2198_v44 }
  0xcf   : > { %v2031_v7 = vadd.f32 %v1987_v55, %v1911_v36  ;;  %v2107_v16 = vsel %vm516_vm0, %v2104_v61, %v2106_v24  ;;  %v4250_v49 = vunpack.c.l.bf16 %v2199_v23  ;;  %v5209_v42 = vunpack.c.l.bf16 %v3885_v62 }
  0xd0   : > { %v2241_v1 = vmul.f32 %v5208_v51, %v3514_v29  ;;  %v2150_v55 = vadd.f32 %v2105_v22, %v2030_v3  ;;  %v2296_v56 = vrot.slane %v2242_v37, 4  ;;  %v2361_v12 = vmul.f32 %v3892_v52, %v3521_v32 }
  0xd1   : > { %v2243_v38 = vmul.f32 %v5209_v42, %v3514_v29  ;;  %v2151_v36 = vadd.f32 %v2107_v16, %v2031_v7  ;;  %v2362_v31 = vmul.f32 %v3817_v63, %v3521_v32  ;;  %v2363_v33 = vmul.f32 %v3894_v2, %v3521_v32 }
  0xd2   : > { %v2295_v57 = vrot.slane %v2241_v1, 4  ;;  %v2481_v62 = vmul.f32 %v4004_v45, %v4248_v13  ;;  %v2482_v3 = vmul.f32 %v4004_v45, %v4197_v48  ;;  %v2483_v7 = vmul.f32 %v4004_v45, %v4250_v49 }
  0xd3   : > { %v2298_v14 = vrot.slane %v2243_v38, 4  ;;  %v2415_v58 = vrot.slane %v2361_v12, 4  ;;  %v2416_v61 = vrot.slane %v2362_v31, 4  ;;  %v2418_v22 = vrot.slane %v2363_v33, 4  ;;  %v409_v33 = vld [vmem:[%s3353_s26 + $0x68] sm:$0x1] }
  0xd4   : > { %v2297_v23 = vsel %vm961_vm1, %v2295_v57, %v2296_v56  ;;  %v2535_v24 = vrot.slane %v2481_v62, 4  ;;  %v2536_v44 = vrot.slane %v2482_v3, 4  ;;  %v2538_v1 = vrot.slane %v2483_v7, 4  ;;  %v408_v57 = vld [vmem:[%s3353_s26 + $0x60] sm:$0xe] }
  0xd5   : > { %v2299_v39 = vsel %vm961_vm1, %v2296_v56, %v2298_v14  ;;  %v2342_v5 = vadd.f32 %v2297_v23, %v2150_v55  ;;  %v2417_v51 = vsel %vm961_vm1, %v2415_v58, %v2416_v61  ;;  %v4273_v37 = vmax.bf16 %v5147_v53, %v244_v54 }
  0xd6   : > { %v2343_v20 = vadd.f32 %v2299_v39, %v2151_v36  ;;  %v269_v16 = vmax.bf16 %v5147_v53, %v245_v15  ;;  %v2419_v42 = vsel %vm961_vm1, %v2416_v61, %v2418_v22  ;;  %v2537_v55 = vsel %vm961_vm1, %v2535_v24, %v2536_v44 }
  0xd7   : > { %v2462_v38 = vadd.f32 %v2417_v51, %v2342_v5  ;;  %v312_v36 = vmul.f32 %v3372_v17, %v3407_v40  ;;  %v2539_v14 = vsel %vm961_vm1, %v2536_v44, %v2538_v1  ;;  %v5104_v12 = vunpack.c.l.bf16 %v4273_v37 }
  0xd8   : > { %v2463_v56 = vadd.f32 %v2419_v42, %v2343_v20  ;;  %v4283_v31 = vunpack.c.l.bf16 %v269_v16  ;;  %v313_v62 = vmul.f32 %v3372_v17, %v3409_v41  ;;  %v332_v3 = vmul.f32 %v3375_v18, %v3923_v21 }
  0xd9   : > { %v2582_v23 = vadd.f32 %v2537_v55, %v2462_v38  ;;  %v333_v7 = vmul.f32 %v3375_v18, %v3935_v35  ;;  %v368_v54 = vmul.f32 %v3378_v19, %v5104_v12  ;;  %v4298_v39 = vmax.bf16 %v5147_v53, %v408_v57 }
  0xda   : > { %v2583_v40 = vadd.f32 %v2539_v14, %v2463_v56  ;;  %v369_v15 = vmul.f32 %v3378_v19, %v4283_v31  ;;  %v348_v5 = vadd.f32 %v332_v3, %v312_v36  ;;  %v4301_v61 = vmax.bf16 %v5147_v53, %v409_v33 }
  0xdb   : > { %v349_v58 = vadd.f32 %v333_v7, %v313_v62  ;;  %v480_v20 = vmul.f32 %v3389_v26, %v3434_v60  ;;  %v5103_v24 = vunpack.c.l.bf16 %v4298_v39  ;;  %v481_v44 = vmul.f32 %v3389_v26, %v3409_v41  ;;  %v5211_v60 = vld [vmem:[#allocation23_spill] sm:$0xff]  ;;  %v853_v62 = vld [vmem:[%s3353_s26 + $0x60] sm:$0xc] }
  0xdc   : > { %5210 = vst [vmem:[#allocation15_spill] sm:$0xff] %v4301_v61  ;;  %v2595_v22 = vpack.c.bf16 %v2583_v40, %v2582_v23  ;;  %v482_v51 = vmul.f32 %v3389_v26, %v3437_v0  ;;  %v384_v1 = vadd.f32 %v368_v54, %v348_v5  ;;  %v5105_v42 = vunpack.c.l.bf16 %v4301_v61 }
  0xdd   : > { %v385_v16 = vadd.f32 %v369_v15, %v349_v58  ;;  %v537_v38 = vrot.slane %v480_v20, 2  ;;  %v538_v55 = vrot.slane %v481_v44, 2  ;;  %v605_v57 = vmul.f32 %v3463_v25, %v5211_v60  ;;  %v854_v15 = vld [vmem:[%s3353_s26 + $0x68] sm:$0x3] }
  0xde   : > { %3262 = vmatmul.mubr.bf16.gmra.mrb[4].mxu1 %v2595_v22  ;;  %v540_v36 = vrot.slane %v482_v51, 2  ;;  %v606_v56 = vmul.f32 %v3463_v25, %v3935_v35  ;;  %v607_v14 = vmul.f32 %v3463_v25, %v3951_v4  ;;  %v729_v0 = vmul.f32 %v3466_v27, %v5103_v24 }
  0xdf   : > { %v730_v33 = vmul.f32 %v3466_v27, %v4283_v31  ;;  %v731_v23 = vmul.f32 %v3466_v27, %v5105_v42  ;;  %v539_v3 = vsel %vm516_vm0, %v537_v38, %v538_v55  ;;  %v661_v40 = vrot.slane %v605_v57, 2 }
  0xe0   : > { %v541_v7 = vsel %vm516_vm0, %v538_v55, %v540_v36  ;;  %v662_v54 = vrot.slane %v606_v56, 2  ;;  %v581_v5 = vadd.f32 %v539_v3, %v384_v1  ;;  %v664_v20 = vrot.slane %v607_v14, 2 }
  0xe1   : > { %v582_v58 = vadd.f32 %v541_v7, %v385_v16  ;;  %v785_v22 = vrot.slane %v729_v0, 2  ;;  %v786_v51 = vrot.slane %v730_v33, 2  ;;  %v788_v24 = vrot.slane %v731_v23, 2 }
  0xe2   : > { %v663_v44 = vsel %vm516_vm0, %v661_v40, %v662_v54  ;;  %v4331_v12 = vmax.bf16 %v5147_v53, %v853_v62  ;;  %v665_v42 = vsel %vm516_vm0, %v662_v54, %v664_v20  ;;  %v4335_v38 = vmax.bf16 %v5147_v53, %v854_v15  ;;  %v2975_v15 = vld [vmem:[%s3353_s26 + $0xc0] sm:$0xf] }
  0xe3   : > { %v705_v61 = vadd.f32 %v663_v44, %v581_v5  ;;  %v925_v55 = vmul.f32 %v3514_v29, %v3503_v10  ;;  %v706_v1 = vadd.f32 %v665_v42, %v582_v58  ;;  %v787_v16 = vsel %vm516_vm0, %v785_v22, %v786_v51  ;;  %v2976_v5 = vld [vmem:[%s3353_s26 + $0xc4] sm:$0xf] }
  0xe4   : > { %v789_v36 = vsel %vm516_vm0, %v786_v51, %v788_v24  ;;  %v5110_v57 = vunpack.c.l.bf16 %v4331_v12  ;;  %v5109_v14 = vunpack.c.l.bf16 %v4335_v38  ;;  %v926_v0 = vmul.f32 %v3514_v29, %v3409_v41 }
  0xe5   : > { %v829_v56 = vadd.f32 %v787_v16, %v705_v61  ;;  %v927_v33 = vmul.f32 %v3514_v29, %v3505_v11  ;;  %v830_v23 = vadd.f32 %v789_v36, %v706_v1  ;;  %v982_v10 = vrot.slane %v925_v55, 4 }
  0xe6   : > { %v1050_v42 = vmul.f32 %v3521_v32, %v3979_v43  ;;  %v1051_v24 = vmul.f32 %v3521_v32, %v3935_v35  ;;  %v983_v62 = vrot.slane %v926_v0, 4  ;;  %v1052_v3 = vmul.f32 %v3521_v32, %v3981_v59 }
  0xe7   : > { %v985_v61 = vrot.slane %v927_v33, 4  ;;  %v1174_v41 = vmul.f32 %v4004_v45, %v5110_v57  ;;  %v1175_v11 = vmul.f32 %v4004_v45, %v4283_v31  ;;  %v1176_v54 = vmul.f32 %v4004_v45, %v5109_v14 }
  0xe8   : > { %v1106_v7 = vrot.slane %v1050_v42, 4  ;;  %v1107_v40 = vrot.slane %v1051_v24, 4  ;;  %v984_v58 = vsel %vm961_vm1, %v982_v10, %v983_v62  ;;  %v1109_v22 = vrot.slane %v1052_v3, 4 }
  0xe9   : > { %v986_v20 = vsel %vm961_vm1, %v983_v62, %v985_v61  ;;  %v1230_v44 = vrot.slane %v1174_v41, 4  ;;  %v1026_v51 = vadd.f32 %v984_v58, %v829_v56  ;;  %v1231_v16 = vrot.slane %v1175_v11, 4  ;;  %v2999_v56 = vld [vmem:[%s3353_s26 + $0xc0] sm:$0xe] }
  0xea   : > { %v1027_v55 = vadd.f32 %v986_v20, %v830_v23  ;;  %v1108_v1 = vsel %vm961_vm1, %v1106_v7, %v1107_v40  ;;  %v1110_v36 = vsel %vm961_vm1, %v1107_v40, %v1109_v22  ;;  %v1233_v0 = vrot.slane %v1176_v54, 4  ;;  %v3000_v23 = vld [vmem:[%s3353_s26 + $0xc8] sm:$0x1] }
  0xeb   : > { %v4368_v33 = vmax.bf16 %v5147_v53, %v2975_v15  ;;  %v1617_v42 = vmax.bf16 %v5147_v53, %v2976_v5  ;;  %v1150_v10 = vadd.f32 %v1108_v1, %v1026_v51  ;;  %v1232_v62 = vsel %vm961_vm1, %v1230_v44, %v1231_v16 }
  0xec   : > { %v1151_v24 = vadd.f32 %v1110_v36, %v1027_v55  ;;  %v1656_v61 = vmul.f32 %v3563_v47, %v3372_v17  ;;  %v1234_v3 = vsel %vm961_vm1, %v1231_v16, %v1233_v0  ;;  %v1657_v40 = vmul.f32 %v3565_v34, %v3372_v17 }
  0xed   : > { %v5107_v41 = vunpack.c.l.bf16 %v4368_v33  ;;  %v4378_v7 = vunpack.c.l.bf16 %v1617_v42  ;;  %v1274_v11 = vadd.f32 %v1232_v62, %v1150_v10  ;;  %v1672_v15 = vmul.f32 %v4017_v50, %v3375_v18 }
  0xee   : > { %v1275_v54 = vadd.f32 %v1234_v3, %v1151_v24  ;;  %v1673_v5 = vmul.f32 %v4019_v46, %v3375_v18  ;;  %v4392_v20 = vmax.bf16 %v5147_v53, %v2999_v56  ;;  %v4395_v22 = vmax.bf16 %v5147_v53, %v3000_v23 }
  0xef   : > { %v1704_v47 = vmul.f32 %v5107_v41, %v3378_v19  ;;  %v1705_v58 = vmul.f32 %v4378_v7, %v3378_v19  ;;  %v1688_v51 = vadd.f32 %v1672_v15, %v1656_v61  ;;  %v1812_v1 = vmul.f32 %v3590_v28, %v3389_v26  ;;  %v5214_v61 = vld [vmem:[#allocation24_spill] sm:$0xff] }
  0xf0   : > { %5212 = vst [vmem:[#allocation17_spill] sm:$0xff] %v4392_v20  ;;  %5213 = vst [vmem:[#allocation19_spill] sm:$0xff] %v4395_v22  ;;  %v1286_v44 = vpack.c.bf16 %v1275_v54, %v1274_v11  ;;  %v1689_v55 = vadd.f32 %v1673_v5, %v1657_v40  ;;  %v5108_v16 = vunpack.c.l.bf16 %v4392_v20  ;;  %v5112_v36 = vunpack.c.l.bf16 %v4395_v22  ;;  %v5215_v40 = vld [vmem:[#allocation25_spill] sm:$0xff] }
  0xf1   : > { %v1813_v0 = vmul.f32 %v3565_v34, %v3389_v26  ;;  %v1814_v42 = vmul.f32 %v3592_v30, %v3389_v26  ;;  %v1720_v10 = vadd.f32 %v1704_v47, %v1688_v51  ;;  %v1868_v62 = vrot.slane %v1812_v1, 2  ;;  %v3023_v47 = vld [vmem:[%s3353_s26 + $0xc0] sm:$0xc]  ;;  %v3024_v1 = vld [vmem:[%s3353_s26 + $0xc8] sm:$0x3] }
  0xf2   : > { %3233 = vmatprep.mubr.bf16.mxu0 %v1286_v44  ;;  %v1721_v24 = vadd.f32 %v1705_v58, %v1689_v55  ;;  %v1932_v56 = vmul.f32 %v5214_v61, %v3463_v25  ;;  %v1933_v3 = vmul.f32 %v4019_v46, %v3463_v25  ;;  %v1934_v11 = vmul.f32 %v5215_v40, %v3463_v25 }
  0xf3   : > { %v1869_v28 = vrot.slane %v1813_v0, 2  ;;  %v1871_v23 = vrot.slane %v1814_v42, 2  ;;  %v2052_v30 = vmul.f32 %v5108_v16, %v3466_v27  ;;  %v2053_v15 = vmul.f32 %v4378_v7, %v3466_v27 }
  0xf4   : > { %v1988_v54 = vrot.slane %v1932_v56, 2  ;;  %v2054_v5 = vmul.f32 %v5112_v36, %v3466_v27  ;;  %v1989_v51 = vrot.slane %v1933_v3, 2  ;;  %v1991_v55 = vrot.slane %v1934_v11, 2 }
  0xf5   : > { %v1870_v58 = vsel %vm516_vm0, %v1868_v62, %v1869_v28  ;;  %v1872_v44 = vsel %vm516_vm0, %v1869_v28, %v1871_v23  ;;  %v2108_v56 = vrot.slane %v2052_v30, 2  ;;  %v2109_v41 = vrot.slane %v2053_v15, 2  ;;  %v5218_v23 = vld [vmem:[#allocation2_spill] sm:$0xff] }
  0xf6   : > { %v1912_v0 = vadd.f32 %v1870_v58, %v1720_v10  ;;  %v1913_v42 = vadd.f32 %v1872_v44, %v1721_v24  ;;  %v1990_v16 = vsel %vm516_vm0, %v1988_v54, %v1989_v51  ;;  %v1992_v14 = vsel %vm516_vm0, %v1989_v51, %v1991_v55 }
  0xf7   : > { %v2111_v57 = vrot.slane %v2054_v5, 2  ;;  %v4426_v22 = vmax.bf16 %v5147_v53, %v3023_v47  ;;  %v2110_v62 = vsel %vm516_vm0, %v2108_v56, %v2109_v41  ;;  %v4430_v28 = vmax.bf16 %v5147_v53, %v3024_v1  ;;  %v246_v56 = vld [vmem:[%s3353_s26 + $0x6c] sm:$0xf] }
  0xf8   : > { %v2032_v36 = vadd.f32 %v1990_v16, %v1912_v0  ;;  %v2033_v20 = vadd.f32 %v1992_v14, %v1913_v42  ;;  %v2244_v3 = vmul.f32 %v5218_v23, %v3514_v29  ;;  %v2245_v11 = vmul.f32 %v3565_v34, %v3514_v29  ;;  %v5219_v16 = vld [vmem:[#allocation3_spill] sm:$0xff] }
  0xf9   : > { %5216 = vst [vmem:[#allocation20_spill] sm:$0xff] %v4426_v22  ;;  %5217 = vst [vmem:[#allocation23_spill] sm:$0xff] %v4430_v28  ;;  %v2112_v10 = vsel %vm516_vm0, %v2109_v41, %v2111_v57  ;;  %v5114_v24 = vunpack.c.l.bf16 %v4426_v22  ;;  %v5116_v14 = vunpack.c.l.bf16 %v4430_v28  ;;  %v2246_v15 = vmul.f32 %v5219_v16, %v3514_v29  ;;  %v5220_v57 = vld [vmem:[#allocation26_spill] sm:$0xff]  ;;  %v5221_v34 = vld [vmem:[#allocation27_spill] sm:$0xff] }
  0xfa   : > { %v2152_v54 = vadd.f32 %v2110_v62, %v2032_v36  ;;  %v2153_v30 = vadd.f32 %v2112_v10, %v2033_v20  ;;  %v2300_v5 = vrot.slane %v2244_v3, 4  ;;  %v2301_v47 = vrot.slane %v2245_v11, 4  ;;  %v247_v62 = vld [vmem:[%s3353_s26 + $0x70] sm:$0xf] }
  0xfb   : > { %v2364_v41 = vmul.f32 %v5220_v57, %v3521_v32  ;;  %v2365_v58 = vmul.f32 %v4019_v46, %v3521_v32  ;;  %v2303_v44 = vrot.slane %v2246_v15, 4  ;;  %v2366_v36 = vmul.f32 %v5221_v34, %v3521_v32 }
  0xfc   : > { %v2484_v20 = vmul.f32 %v4004_v45, %v5114_v24  ;;  %v2485_v51 = vmul.f32 %v4004_v45, %v4378_v7  ;;  %v2302_v55 = vsel %vm961_vm1, %v2300_v5, %v2301_v47  ;;  %v2486_v42 = vmul.f32 %v4004_v45, %v5116_v14  ;;  %v410_v14 = vld [vmem:[%s3353_s26 + $0x6c] sm:$0xe] }
  0xfd   : > { %v2420_v1 = vrot.slane %v2364_v41, 4  ;;  %v2421_v0 = vrot.slane %v2365_v58, 4  ;;  %v2304_v10 = vsel %vm961_vm1, %v2301_v47, %v2303_v44  ;;  %v2344_v23 = vadd.f32 %v2302_v55, %v2152_v54  ;;  %v5223_v44 = vld [vmem:[#allocation7_spill] sm:$0xff] }
  0xfe   : > { %v2423_v3 = vrot.slane %v2366_v36, 4  ;;  %v2540_v11 = vrot.slane %v2484_v20, 4  ;;  %v2345_v16 = vadd.f32 %v2304_v10, %v2153_v30  ;;  %v2541_v24 = vrot.slane %v2485_v51, 4  ;;  %v411_v36 = vld [vmem:[%s3353_s26 + $0x74] sm:$0x1] }
  0xff   : > { %v2422_v15 = vsel %vm961_vm1, %v2420_v1, %v2421_v0  ;;  %v2543_v5 = vrot.slane %v2486_v42, 4  ;;  %v4462_v28 = vmax.bf16 %v5147_v53, %v246_v56  ;;  %v271_v45 = vmax.bf16 %v5147_v53, %v247_v62  ;;  %v5224_v42 = vld [vmem:[#allocation4_spill] sm:$0xff] }
 0x100   : > { %v2424_v41 = vsel %vm961_vm1, %v2421_v0, %v2423_v3  ;;  %v2464_v58 = vadd.f32 %v2422_v15, %v2344_v23  ;;  %v2542_v54 = vsel %vm961_vm1, %v2540_v11, %v2541_v24  ;;  %v314_v30 = vmul.f32 %v3372_v17, %v5223_v44 }
 0x101   : > { %5222 = vst [vmem:[#allocation24_spill] sm:$0xff] %v4462_v28  ;;  %v2465_v22 = vadd.f32 %v2424_v41, %v2345_v16  ;;  %v2544_v47 = vsel %vm961_vm1, %v2541_v24, %v2543_v5  ;;  %v5118_v51 = vunpack.c.l.bf16 %v4462_v28  ;;  %v4472_v55 = vunpack.c.l.bf16 %v271_v45  ;;  %v5228_v45 = vld [vmem:[#allocation12_spill] sm:$0xff] }
 0x102   : > { %v2584_v20 = vadd.f32 %v2542_v54, %v2464_v58  ;;  %v315_v1 = vmul.f32 %v3372_v17, %v5179_v9  ;;  %v334_v56 = vmul.f32 %v3375_v18, %v5224_v42  ;;  %v335_v62 = vmul.f32 %v3375_v18, %v4106_v6 }
 0x103   : > { %v2585_v0 = vadd.f32 %v2544_v47, %v2465_v22  ;;  %v4481_v24 = vmax.bf16 %v5147_v53, %v410_v14  ;;  %v370_v10 = vmul.f32 %v3378_v19, %v5118_v51  ;;  %v371_v23 = vmul.f32 %v3378_v19, %v4472_v55  ;;  %v5227_v22 = vld [vmem:[#allocation11_spill] sm:$0xff] }
 0x104   : > { %v4489_v3 = vmax.bf16 %v5147_v53, %v411_v36  ;;  %v483_v11 = vmul.f32 %v3389_v26, %v5227_v22  ;;  %v350_v15 = vadd.f32 %v334_v56, %v314_v30  ;;  %v351_v5 = vadd.f32 %v335_v62, %v315_v1  ;;  %v5229_v22 = vld [vmem:[#allocation5_spill] sm:$0xff]  ;;  %v5230_v56 = vld [vmem:[#allocation6_spill] sm:$0xff] }
 0x105   : > { %5225 = vst [vmem:[#allocation25_spill] sm:$0xff] %v4481_v24  ;;  %v2596_v16 = vpack.c.bf16 %v2585_v0, %v2584_v20  ;;  %v5120_v41 = vunpack.c.l.bf16 %v4481_v24  ;;  %v484_v58 = vmul.f32 %v3389_v26, %v5179_v9  ;;  %v485_v54 = vmul.f32 %v3389_v26, %v5228_v45 }
 0x106   : > { %5226 = vst [vmem:[#allocation2_spill] sm:$0xff] %v4489_v3  ;;  %v5123_v14 = vunpack.c.l.bf16 %v4489_v3  ;;  %v542_v47 = vrot.slane %v483_v11, 2  ;;  %v386_v44 = vadd.f32 %v370_v10, %v350_v15  ;;  %v387_v36 = vadd.f32 %v371_v23, %v351_v5  ;;  %v856_v15 = vld [vmem:[%s3353_s26 + $0x74] sm:$0x3] }
 0x107   : > { %3265 = vmatprep.mubr.bf16.mxu1 %v2596_v16  ;;  %v608_v30 = vmul.f32 %v3463_v25, %v5229_v22  ;;  %v609_v20 = vmul.f32 %v3463_v25, %v4106_v6  ;;  %v543_v1 = vrot.slane %v484_v58, 2  ;;  %v545_v0 = vrot.slane %v485_v54, 2  ;;  %v855_v16 = vld [vmem:[%s3353_s26 + $0x6c] sm:$0xc] }
 0x108   : > { %v610_v62 = vmul.f32 %v3463_v25, %v5230_v56  ;;  %v732_v45 = vmul.f32 %v3466_v27, %v5120_v41  ;;  %v733_v10 = vmul.f32 %v3466_v27, %v4472_v55  ;;  %v734_v23 = vmul.f32 %v3466_v27, %v5123_v14 }
 0x109   : > { %v666_v51 = vrot.slane %v608_v30, 2  ;;  %v667_v11 = vrot.slane %v609_v20, 2  ;;  %v544_v5 = vsel %vm516_vm0, %v542_v47, %v543_v1  ;;  %v546_v58 = vsel %vm516_vm0, %v543_v1, %v545_v0 }
 0x10a   : > { %v669_v54 = vrot.slane %v610_v62, 2  ;;  %v790_v56 = vrot.slane %v732_v45, 2  ;;  %v583_v24 = vadd.f32 %v544_v5, %v386_v44  ;;  %v584_v22 = vadd.f32 %v546_v58, %v387_v36 }
 0x10b   : > { %v668_v30 = vsel %vm516_vm0, %v666_v51, %v667_v11  ;;  %v791_v20 = vrot.slane %v733_v10, 2  ;;  %v793_v28 = vrot.slane %v734_v23, 2  ;;  %v4520_v3 = vmax.bf16 %v5147_v53, %v855_v16  ;;  %v5233_v10 = vld [vmem:[#allocation16_spill] sm:$0xff]  ;;  %v5235_v23 = vld [vmem:[#allocation9_spill] sm:$0xff] }
 0x10c   : > { %v670_v41 = vsel %vm516_vm0, %v667_v11, %v669_v54  ;;  %v4523_v14 = vmax.bf16 %v5147_v53, %v856_v15  ;;  %v707_v42 = vadd.f32 %v668_v30, %v583_v24  ;;  %v928_v44 = vmul.f32 %v3514_v29, %v5194_v8  ;;  %v2977_v54 = vld [vmem:[%s3353_s26 + $0xcc] sm:$0xf] }
 0x10d   : > { %5231 = vst [vmem:[#allocation3_spill] sm:$0xff] %v4520_v3  ;;  %v708_v47 = vadd.f32 %v670_v41, %v584_v22  ;;  %v792_v1 = vsel %vm516_vm0, %v790_v56, %v791_v20  ;;  %v794_v36 = vsel %vm516_vm0, %v791_v20, %v793_v28  ;;  %v5124_v51 = vunpack.c.l.bf16 %v4520_v3  ;;  %v5234_v56 = vld [vmem:[#allocation8_spill] sm:$0xff] }
 0x10e   : > { %5232 = vst [vmem:[#allocation26_spill] sm:$0xff] %v4523_v14  ;;  %v5127_v0 = vunpack.c.l.bf16 %v4523_v14  ;;  %v929_v62 = vmul.f32 %v3514_v29, %v5179_v9  ;;  %v831_v45 = vadd.f32 %v792_v1, %v707_v42  ;;  %v930_v24 = vmul.f32 %v3514_v29, %v5233_v10  ;;  %v4544_v9 = vld [vmem:[%s5028_s1 + $0x8] ss:$0 sm:$0xff] }
 0x10f   : > { %v832_v11 = vadd.f32 %v794_v36, %v708_v47  ;;  %v987_v41 = vrot.slane %v928_v44, 4  ;;  %v1053_v8 = vmul.f32 %v3521_v32, %v5234_v56  ;;  %v1054_v28 = vmul.f32 %v3521_v32, %v4106_v6  ;;  %v2978_v44 = vld [vmem:[%s3353_s26 + $0xd0] sm:$0xf]  ;;  %v3002_v56 = vld [vmem:[%s3353_s26 + $0xd4] sm:$0x1] }
 0x110   : > { %v988_v22 = vrot.slane %v929_v62, 4  ;;  %v1055_v16 = vmul.f32 %v3521_v32, %v5235_v23  ;;  %v990_v15 = vrot.slane %v930_v24, 4  ;;  %v1177_v42 = vmul.f32 %v4544_v9, %v5124_v51 }
 0x111   : > { %v1178_v5 = vmul.f32 %v4544_v9, %v4472_v55  ;;  %v1179_v58 = vmul.f32 %v4544_v9, %v5127_v0  ;;  %v1111_v20 = vrot.slane %v1053_v8, 4  ;;  %v1112_v47 = vrot.slane %v1054_v28, 4 }
 0x112   : > { %v989_v30 = vsel %vm961_vm1, %v987_v41, %v988_v22  ;;  %v1114_v1 = vrot.slane %v1055_v16, 4  ;;  %v991_v36 = vsel %vm961_vm1, %v988_v22, %v990_v15  ;;  %v1235_v10 = vrot.slane %v1177_v42, 4  ;;  %v3001_v16 = vld [vmem:[%s3353_s26 + $0xcc] sm:$0xe] }
 0x113   : > { %v1028_v62 = vadd.f32 %v989_v30, %v831_v45  ;;  %v1236_v24 = vrot.slane %v1178_v5, 4  ;;  %v1029_v51 = vadd.f32 %v991_v36, %v832_v11  ;;  %v1113_v3 = vsel %vm961_vm1, %v1111_v20, %v1112_v47  ;;  %v5237_v11 = vld [vmem:[#allocation18_spill] sm:$0xff] }
 0x114   : > { %v1115_v14 = vsel %vm961_vm1, %v1112_v47, %v1114_v1  ;;  %v1238_v0 = vrot.slane %v1179_v58, 4  ;;  %v4562_v8 = vmax.bf16 %v5147_v53, %v2977_v54  ;;  %v1619_v28 = vmax.bf16 %v5147_v53, %v2978_v44  ;;  %v5238_v54 = vld [vmem:[#allocation10_spill] sm:$0xff]  ;;  %v5241_v44 = vld [vmem:[#allocation21_spill] sm:$0xff] }
 0x115   : > { %v1152_v23 = vadd.f32 %v1113_v3, %v1028_v62  ;;  %v1237_v41 = vsel %vm961_vm1, %v1235_v10, %v1236_v24  ;;  %v1153_v22 = vadd.f32 %v1115_v14, %v1029_v51  ;;  %v1658_v15 = vmul.f32 %v5237_v11, %v3372_v17 }
 0x116   : > { %5236 = vst [vmem:[#allocation27_spill] sm:$0xff] %v4562_v8  ;;  %v1239_v45 = vsel %vm961_vm1, %v1236_v24, %v1238_v0  ;;  %v1659_v42 = vmul.f32 %v3817_v63, %v3372_v17  ;;  %v5128_v3 = vunpack.c.l.bf16 %v4562_v8  ;;  %v4573_v58 = vunpack.c.l.bf16 %v1619_v28 }
 0x117   : > { %v1276_v5 = vadd.f32 %v1237_v41, %v1152_v23  ;;  %v1674_v30 = vmul.f32 %v5238_v54, %v3375_v18  ;;  %v1277_v20 = vadd.f32 %v1239_v45, %v1153_v22  ;;  %v1675_v14 = vmul.f32 %v4197_v48, %v3375_v18 }
 0x118   : > { %v4580_v51 = vmax.bf16 %v5147_v53, %v3001_v16  ;;  %v4583_v0 = vmax.bf16 %v5147_v53, %v3002_v56  ;;  %v1706_v23 = vmul.f32 %v5128_v3, %v3378_v19  ;;  %v1707_v1 = vmul.f32 %v4573_v58, %v3378_v19  ;;  %v5242_v16 = vld [vmem:[#allocation22_spill] sm:$0xff]  ;;  %v3026_v3 = vld [vmem:[%s3353_s26 + $0xd4] sm:$0x3] }
 0x119   : > { %v1690_v47 = vadd.f32 %v1674_v30, %v1658_v15  ;;  %v1815_v36 = vmul.f32 %v5241_v44, %v3389_v26  ;;  %v1287_v62 = vpack.c.bf16 %v1277_v20, %v1276_v5  ;;  %v1691_v10 = vadd.f32 %v1675_v14, %v1659_v42  ;;  %v5243_v15 = vld [vmem:[#allocation13_spill] sm:$0xff]  ;;  %v5244_v30 = vld [vmem:[#allocation14_spill] sm:$0xff] }
 0x11a   : > { %5239 = vst [vmem:[#allocation7_spill] sm:$0xff] %v4580_v51  ;;  %5240 = vst [vmem:[#allocation11_spill] sm:$0xff] %v4583_v0  ;;  %v5130_v24 = vunpack.c.l.bf16 %v4580_v51  ;;  %v5132_v41 = vunpack.c.l.bf16 %v4583_v0  ;;  %v1816_v28 = vmul.f32 %v3817_v63, %v3389_v26  ;;  %v1817_v22 = vmul.f32 %v5242_v16, %v3389_v26 }
 0x11b   : > { %v1722_v56 = vadd.f32 %v1706_v23, %v1690_v47  ;;  %v1873_v45 = vrot.slane %v1815_v36, 2  ;;  %3234 = vmatmul.mubr.bf16.gmra.mrb[8].mxu0 %v1287_v62  ;;  %v1723_v11 = vadd.f32 %v1707_v1, %v1691_v10  ;;  %v1935_v5 = vmul.f32 %v5243_v15, %v3463_v25  ;;  %v3025_v36 = vld [vmem:[%s3353_s26 + $0xcc] sm:$0xc] }
 0x11c   : > { %v1936_v42 = vmul.f32 %v4197_v48, %v3463_v25  ;;  %v1937_v20 = vmul.f32 %v5244_v30, %v3463_v25  ;;  %v1874_v14 = vrot.slane %v1816_v28, 2  ;;  %v1876_v47 = vrot.slane %v1817_v22, 2 }
 0x11d   : > { %v2055_v23 = vmul.f32 %v5130_v24, %v3466_v27  ;;  %v2056_v44 = vmul.f32 %v4573_v58, %v3466_v27  ;;  %v1993_v1 = vrot.slane %v1935_v5, 2  ;;  %v2057_v16 = vmul.f32 %v5132_v41, %v3466_v27 }
 0x11e   : > { %v1994_v62 = vrot.slane %v1936_v42, 2  ;;  %v1996_v10 = vrot.slane %v1937_v20, 2  ;;  %v1875_v30 = vsel %vm516_vm0, %v1873_v45, %v1874_v14  ;;  %v1877_v28 = vsel %vm516_vm0, %v1874_v14, %v1876_v47 }
 0x11f   : > { %v2113_v22 = vrot.slane %v2055_v23, 2  ;;  %v2114_v15 = vrot.slane %v2056_v44, 2  ;;  %v1914_v51 = vadd.f32 %v1875_v30, %v1722_v56  ;;  %v1915_v24 = vadd.f32 %v1877_v28, %v1723_v11 }
 0x120   : > { %v1995_v8 = vsel %vm516_vm0, %v1993_v1, %v1994_v62  ;;  %v1997_v54 = vsel %vm516_vm0, %v1994_v62, %v1996_v10  ;;  %v2116_v42 = vrot.slane %v2057_v16, 2  ;;  %v4620_v20 = vmax.bf16 %v5147_v53, %v3025_v36  ;;  %v248_v1 = vld [vmem:[%s3353_s26 + $0x78] sm:$0xf]  ;;  %v249_v62 = vld [vmem:[%s3353_s26 + $0x7c] sm:$0xf] }
 0x121   : > { %v2115_v5 = vsel %vm516_vm0, %v2113_v22, %v2114_v15  ;;  %v4623_v41 = vmax.bf16 %v5147_v53, %v3026_v3  ;;  %v2034_v45 = vadd.f32 %v1995_v8, %v1914_v51  ;;  %v2035_v0 = vadd.f32 %v1997_v54, %v1915_v24 }
 0x122   : > { %v2247_v14 = vmul.f32 %v3892_v52, %v3514_v29  ;;  %v2248_v56 = vmul.f32 %v3817_v63, %v3514_v29  ;;  %v2117_v11 = vsel %vm516_vm0, %v2114_v15, %v2116_v42  ;;  %v5135_v30 = vunpack.c.l.bf16 %v4620_v20 }
 0x123   : > { %v5134_v47 = vunpack.c.l.bf16 %v4623_v41  ;;  %v2249_v3 = vmul.f32 %v3894_v2, %v3514_v29  ;;  %v2154_v23 = vadd.f32 %v2115_v5, %v2034_v45  ;;  %v2155_v8 = vadd.f32 %v2117_v11, %v2035_v0 }
 0x124   : > { %v2305_v54 = vrot.slane %v2247_v14, 4  ;;  %v2306_v51 = vrot.slane %v2248_v56, 4  ;;  %v2367_v52 = vmul.f32 %v4248_v13, %v3521_v32  ;;  %v2368_v63 = vmul.f32 %v4197_v48, %v3521_v32 }
 0x125   : > { %v2308_v24 = vrot.slane %v2249_v3, 4  ;;  %v2369_v15 = vmul.f32 %v4250_v49, %v3521_v32  ;;  %v2487_v2 = vmul.f32 %v4544_v9, %v5135_v30  ;;  %v2488_v0 = vmul.f32 %v4544_v9, %v4573_v58 }
 0x126   : > { %v2307_v44 = vsel %vm961_vm1, %v2305_v54, %v2306_v51  ;;  %v2489_v36 = vmul.f32 %v4544_v9, %v5134_v47  ;;  %v2425_v28 = vrot.slane %v2367_v52, 4  ;;  %v2426_v22 = vrot.slane %v2368_v63, 4 }
 0x127   : > { %v2309_v10 = vsel %vm961_vm1, %v2306_v51, %v2308_v24  ;;  %v2346_v16 = vadd.f32 %v2307_v44, %v2154_v23  ;;  %v2428_v42 = vrot.slane %v2369_v15, 4  ;;  %v2545_v45 = vrot.slane %v2487_v2, 4  ;;  %v413_v44 = vld [vmem:[%s3353_s26 + $0x80] sm:$0x1] }
 0x128   : > { %v2347_v5 = vadd.f32 %v2309_v10, %v2155_v8  ;;  %v2546_v14 = vrot.slane %v2488_v0, 4  ;;  %v2427_v56 = vsel %vm961_vm1, %v2425_v28, %v2426_v22  ;;  %v2548_v11 = vrot.slane %v2489_v36, 4  ;;  %v412_v8 = vld [vmem:[%s3353_s26 + $0x78] sm:$0xe] }
 0x129   : > { %v272_v3 = vmax.bf16 %v5147_v53, %v248_v1  ;;  %v273_v54 = vmax.bf16 %v5147_v53, %v249_v62  ;;  %v2429_v47 = vsel %vm961_vm1, %v2426_v22, %v2428_v42  ;;  %v2466_v30 = vadd.f32 %v2427_v56, %v2346_v16 }
 0x12a   : > { %v2547_v51 = vsel %vm961_vm1, %v2545_v45, %v2546_v14  ;;  %v316_v23 = vmul.f32 %v3372_v17, %v3923_v21  ;;  %v2467_v24 = vadd.f32 %v2429_v47, %v2347_v5  ;;  %v2549_v52 = vsel %vm961_vm1, %v2546_v14, %v2548_v11 }
 0x12b   : > { %v296_v63 = vunpack.c.l.bf16 %v272_v3  ;;  %v4661_v15 = vunpack.c.l.bf16 %v273_v54  ;;  %v2586_v2 = vadd.f32 %v2547_v51, %v2466_v30  ;;  %v317_v0 = vmul.f32 %v3372_v17, %v3935_v35 }
 0x12c   : > { %v5245_v36 = vunpack.c.l.bf16 %v4273_v37  ;;  %v337_v62 = vmul.f32 %v3375_v18, %v4283_v31  ;;  %v2587_v21 = vadd.f32 %v2549_v52, %v2467_v24  ;;  %v436_v16 = vmax.bf16 %v5147_v53, %v412_v8  ;;  %v5247_v52 = vld [vmem:[#allocation15_spill] sm:$0xff] }
 0x12d   : > { %v372_v47 = vmul.f32 %v3378_v19, %v296_v63  ;;  %v373_v10 = vmul.f32 %v3378_v19, %v4661_v15  ;;  %v437_v22 = vmax.bf16 %v5147_v53, %v413_v44  ;;  %v486_v37 = vmul.f32 %v3389_v26, %v5211_v60 }
 0x12e   : > { %v336_v1 = vmul.f32 %v3375_v18, %v5245_v36  ;;  %v353_v30 = vadd.f32 %v337_v62, %v317_v0  ;;  %v2597_v5 = vpack.c.bf16 %v2587_v21, %v2586_v2  ;;  %v460_v42 = vunpack.c.l.bf16 %v436_v16  ;;  %v857_v36 = vld [vmem:[%s3353_s26 + $0x78] sm:$0xc] }
 0x12f   : > { %v487_v45 = vmul.f32 %v3389_v26, %v3935_v35  ;;  %v488_v14 = vmul.f32 %v3389_v26, %v3951_v4  ;;  %v461_v3 = vunpack.c.l.bf16 %v437_v22  ;;  %v547_v54 = vrot.slane %v486_v37, 2 }
 0x130   : > { %v352_v28 = vadd.f32 %v336_v1, %v316_v23  ;;  %v389_v11 = vadd.f32 %v373_v10, %v353_v30  ;;  %3266 = vmatmul.mubr.bf16.gmra.mrb[8].mxu1 %v2597_v5  ;;  %v5246_v8 = vunpack.c.l.bf16 %v4298_v39  ;;  %v612_v24 = vmul.f32 %v3463_v25, %v4283_v31 }
 0x131   : > { %v548_v51 = vrot.slane %v487_v45, 2  ;;  %v550_v23 = vrot.slane %v488_v14, 2  ;;  %v5248_v63 = vunpack.c.l.bf16 %v5247_v52  ;;  %v735_v4 = vmul.f32 %v3466_v27, %v460_v42 }
 0x132   : > { %v388_v56 = vadd.f32 %v372_v47, %v352_v28  ;;  %v611_v60 = vmul.f32 %v3463_v25, %v5246_v8  ;;  %v736_v2 = vmul.f32 %v3466_v27, %v4661_v15  ;;  %v737_v0 = vmul.f32 %v3466_v27, %v461_v3  ;;  %v858_v47 = vld [vmem:[%s3353_s26 + $0x80] sm:$0x3] }
 0x133   : > { %v613_v44 = vmul.f32 %v3463_v25, %v5248_v63  ;;  %v549_v1 = vsel %vm516_vm0, %v547_v54, %v548_v51  ;;  %v551_v39 = vsel %vm516_vm0, %v548_v51, %v550_v23  ;;  %v672_v21 = vrot.slane %v612_v24, 2 }
 0x134   : > { %v671_v62 = vrot.slane %v611_v60, 2  ;;  %v585_v10 = vadd.f32 %v549_v1, %v388_v56  ;;  %v586_v16 = vadd.f32 %v551_v39, %v389_v11  ;;  %v795_v30 = vrot.slane %v735_v4, 2 }
 0x135   : > { %v674_v28 = vrot.slane %v613_v44, 2  ;;  %v796_v37 = vrot.slane %v736_v2, 2  ;;  %v798_v5 = vrot.slane %v737_v0, 2  ;;  %v881_v42 = vmax.bf16 %v5147_v53, %v857_v36 }
 0x136   : > { %v673_v22 = vsel %vm516_vm0, %v671_v62, %v672_v21  ;;  %v882_v3 = vmax.bf16 %v5147_v53, %v858_v47  ;;  %v931_v54 = vmul.f32 %v3514_v29, %v3979_v43  ;;  %v932_v24 = vmul.f32 %v3514_v29, %v3935_v35  ;;  %v2979_v47 = vld [vmem:[%s3353_s26 + $0xd8] sm:$0xf] }
 0x137   : > { %v675_v45 = vsel %vm516_vm0, %v672_v21, %v674_v28  ;;  %v709_v14 = vadd.f32 %v673_v22, %v585_v10  ;;  %v797_v56 = vsel %vm516_vm0, %v795_v30, %v796_v37  ;;  %v799_v11 = vsel %vm516_vm0, %v796_v37, %v798_v5  ;;  %v2980_v10 = vld [vmem:[%s3353_s26 + $0xdc] sm:$0xf] }
 0x138   : > { %v710_v51 = vadd.f32 %v675_v45, %v586_v16  ;;  %v905_v23 = vunpack.c.l.bf16 %v881_v42  ;;  %v906_v60 = vunpack.c.l.bf16 %v882_v3  ;;  %v933_v52 = vmul.f32 %v3514_v29, %v3981_v59 }
 0x139   : > { %v833_v8 = vadd.f32 %v797_v56, %v709_v14  ;;  %v992_v44 = vrot.slane %v931_v54, 4  ;;  %v5249_v43 = vunpack.c.l.bf16 %v4331_v12  ;;  %v1057_v2 = vmul.f32 %v3521_v32, %v4283_v31 }
 0x13a   : > { %v834_v63 = vadd.f32 %v799_v11, %v710_v51  ;;  %v993_v0 = vrot.slane %v932_v24, 4  ;;  %v995_v36 = vrot.slane %v933_v52, 4  ;;  %v5250_v1 = vunpack.c.l.bf16 %v4335_v38  ;;  %v3003_v11 = vld [vmem:[%s3353_s26 + $0xd8] sm:$0xe] }
 0x13b   : > { %v1056_v4 = vmul.f32 %v3521_v32, %v5249_v43  ;;  %v1180_v35 = vmul.f32 %v4544_v9, %v905_v23  ;;  %v1117_v21 = vrot.slane %v1057_v2, 4  ;;  %v1181_v59 = vmul.f32 %v4544_v9, %v4661_v15  ;;  %v3004_v23 = vld [vmem:[%s3353_s26 + $0xe0] sm:$0x1] }
 0x13c   : > { %v1058_v39 = vmul.f32 %v3521_v32, %v5250_v1  ;;  %v1182_v12 = vmul.f32 %v4544_v9, %v906_v60  ;;  %v994_v16 = vsel %vm961_vm1, %v992_v44, %v993_v0  ;;  %v996_v31 = vsel %vm961_vm1, %v993_v0, %v995_v36 }
 0x13d   : > { %v1116_v62 = vrot.slane %v1056_v4, 4  ;;  %v1240_v28 = vrot.slane %v1180_v35, 4  ;;  %v1030_v30 = vadd.f32 %v994_v16, %v833_v8  ;;  %v1031_v22 = vadd.f32 %v996_v31, %v834_v63 }
 0x13e   : > { %v1119_v38 = vrot.slane %v1058_v39, 4  ;;  %v1241_v5 = vrot.slane %v1181_v59, 4  ;;  %v1243_v15 = vrot.slane %v1182_v12, 4  ;;  %v1620_v45 = vmax.bf16 %v5147_v53, %v2979_v47 }
 0x13f   : > { %v1118_v37 = vsel %vm961_vm1, %v1116_v62, %v1117_v21  ;;  %v1621_v14 = vmax.bf16 %v5147_v53, %v2980_v10  ;;  %v1660_v56 = vmul.f32 %v4017_v50, %v3372_v17  ;;  %v1661_v52 = vmul.f32 %v4019_v46, %v3372_v17 }
 0x140   : > { %v1120_v42 = vsel %vm961_vm1, %v1117_v21, %v1119_v38  ;;  %v1154_v3 = vadd.f32 %v1118_v37, %v1030_v30  ;;  %v1242_v51 = vsel %vm961_vm1, %v1240_v28, %v1241_v5  ;;  %v1244_v8 = vsel %vm961_vm1, %v1241_v5, %v1243_v15  ;;  %v5252_v38 = vld [vmem:[#allocation17_spill] sm:$0xff]  ;;  %v5254_v5 = vld [vmem:[#allocation19_spill] sm:$0xff] }
 0x141   : > { %v1155_v54 = vadd.f32 %v1120_v42, %v1031_v22  ;;  %v1644_v60 = vunpack.c.l.bf16 %v1620_v45  ;;  %v4736_v24 = vunpack.c.l.bf16 %v1621_v14  ;;  %v5251_v43 = vunpack.c.l.bf16 %v4368_v33 }
 0x142   : > { %v1278_v63 = vadd.f32 %v1242_v51, %v1154_v3  ;;  %v1677_v2 = vmul.f32 %v4378_v7, %v3375_v18  ;;  %v1772_v36 = vmax.bf16 %v5147_v53, %v3003_v11  ;;  %v1773_v1 = vmax.bf16 %v5147_v53, %v3004_v23  ;;  %v4769_v51 = vpop.f32.mrb[0].mxu0 }
 0x143   : > { %v1279_v44 = vadd.f32 %v1244_v8, %v1155_v54  ;;  %v1676_v4 = vmul.f32 %v5251_v43, %v3375_v18  ;;  %v1708_v50 = vmul.f32 %v1644_v60, %v3378_v19  ;;  %v1709_v0 = vmul.f32 %v4736_v24, %v3378_v19  ;;  %v3027_v54 = vld [vmem:[%s3353_s26 + $0xd8] sm:$0xc]  ;;  %v3028_v60 = vld [vmem:[%s3353_s26 + $0xe0] sm:$0x3] }
 0x144   : > { %v1693_v62 = vadd.f32 %v1677_v2, %v1661_v52  ;;  %v1818_v21 = vmul.f32 %v5214_v61, %v3389_v26  ;;  %v1796_v33 = vunpack.c.l.bf16 %v1772_v36  ;;  %v1797_v59 = vunpack.c.l.bf16 %v1773_v1  ;;  %v4774_v52 = vpop.f32.mrb[1].mxu0 }
 0x145   : > { %v1288_v39 = vpack.c.bf16 %v1279_v44, %v1278_v63  ;;  %v1692_v35 = vadd.f32 %v1676_v4, %v1660_v56  ;;  %v1819_v12 = vmul.f32 %v4019_v46, %v3389_v26  ;;  %v1820_v47 = vmul.f32 %v5215_v40, %v3389_v26  ;;  %v4776_v2 = vpop.f32.mrb[2].mxu0 }
 0x146   : > { %v1725_v16 = vadd.f32 %v1709_v0, %v1693_v62  ;;  %v1878_v31 = vrot.slane %v1818_v21, 2  ;;  %v5253_v28 = vunpack.c.l.bf16 %v5252_v38  ;;  %v1939_v37 = vmul.f32 %v4378_v7, %v3463_v25 }
 0x147   : > { %3237 = vmatprep.mubr.bf16.mxu0 %v1288_v39  ;;  %v1724_v10 = vadd.f32 %v1708_v50, %v1692_v35  ;;  %v1879_v22 = vrot.slane %v1819_v12, 2  ;;  %v1881_v61 = vrot.slane %v1820_v47, 2  ;;  %v5255_v42 = vunpack.c.l.bf16 %v5254_v5  ;;  %v4781_v39 = vpop.f32.mrb[3].mxu0 }
 0x148   : > { %v1938_v30 = vmul.f32 %v5253_v28, %v3463_v25  ;;  %v2058_v40 = vmul.f32 %v1796_v33, %v3466_v27  ;;  %v2059_v14 = vmul.f32 %v4736_v24, %v3466_v27  ;;  %v2060_v3 = vmul.f32 %v1797_v59, %v3466_v27 }
 0x149   : > { %v1940_v15 = vmul.f32 %v5255_v42, %v3463_v25  ;;  %v1880_v56 = vsel %vm516_vm0, %v1878_v31, %v1879_v22  ;;  %v1882_v11 = vsel %vm516_vm0, %v1879_v22, %v1881_v61  ;;  %v1999_v23 = vrot.slane %v1939_v37, 2  ;;  %v5256_v61 = vld [vmem:[#allocation20_spill] sm:$0xff] }
 0x14a   : > { %v1998_v45 = vrot.slane %v1938_v30, 2  ;;  %v1916_v63 = vadd.f32 %v1880_v56, %v1724_v10  ;;  %v1917_v44 = vadd.f32 %v1882_v11, %v1725_v16  ;;  %v2118_v43 = vrot.slane %v2058_v40, 2  ;;  %v250_v11 = vld [vmem:[%s3353_s26 + $0x84] sm:$0xf] }
 0x14b   : > { %v2001_v8 = vrot.slane %v1940_v15, 2  ;;  %v2119_v4 = vrot.slane %v2059_v14, 2  ;;  %v2121_v36 = vrot.slane %v2060_v3, 2  ;;  %v2204_v1 = vmax.bf16 %v5147_v53, %v3027_v54 }
 0x14c   : > { %v2000_v50 = vsel %vm516_vm0, %v1998_v45, %v1999_v23  ;;  %v2205_v33 = vmax.bf16 %v5147_v53, %v3028_v60  ;;  %v2250_v47 = vmul.f32 %v5220_v57, %v3514_v29  ;;  %v2251_v10 = vmul.f32 %v4019_v46, %v3514_v29  ;;  %v5258_v46 = vld [vmem:[#allocation23_spill] sm:$0xff] }
 0x14d   : > { %v2002_v0 = vsel %vm516_vm0, %v1999_v23, %v2001_v8  ;;  %v2036_v35 = vadd.f32 %v2000_v50, %v1916_v63  ;;  %v2120_v21 = vsel %vm516_vm0, %v2118_v43, %v2119_v4  ;;  %v2122_v59 = vsel %vm516_vm0, %v2119_v4, %v2121_v36  ;;  %v251_v23 = vld [vmem:[%s3353_s26 + $0x88] sm:$0xf] }
 0x14e   : > { %v2037_v62 = vadd.f32 %v2002_v0, %v1917_v44  ;;  %v2228_v12 = vunpack.c.l.bf16 %v2204_v1  ;;  %v2229_v38 = vunpack.c.l.bf16 %v2205_v33  ;;  %v2252_v28 = vmul.f32 %v5221_v34, %v3514_v29 }
 0x14f   : > { %v2156_v16 = vadd.f32 %v2120_v21, %v2036_v35  ;;  %v2310_v30 = vrot.slane %v2250_v47, 4  ;;  %v2311_v22 = vrot.slane %v2251_v10, 4  ;;  %v5257_v37 = vunpack.c.l.bf16 %v5256_v61  ;;  %v414_v35 = vld [vmem:[%s3353_s26 + $0x84] sm:$0xe]  ;;  %v415_v47 = vld [vmem:[%s3353_s26 + $0x8c] sm:$0x1] }
 0x150   : > { %v2157_v31 = vadd.f32 %v2122_v59, %v2037_v62  ;;  %v2371_v57 = vmul.f32 %v4378_v7, %v3521_v32  ;;  %v2313_v42 = vrot.slane %v2252_v28, 4  ;;  %v5259_v15 = vunpack.c.l.bf16 %v5258_v46  ;;  %v5260_v59 = vld [vmem:[#allocation4_spill] sm:$0xff] }
 0x151   : > { %v2370_v5 = vmul.f32 %v5257_v37, %v3521_v32  ;;  %v2490_v40 = vmul.f32 %v4544_v9, %v2228_v12  ;;  %v2491_v14 = vmul.f32 %v4544_v9, %v4736_v24  ;;  %v2312_v34 = vsel %vm961_vm1, %v2310_v30, %v2311_v22  ;;  %v5261_v30 = vld [vmem:[#allocation24_spill] sm:$0xff] }
 0x152   : > { %v2372_v45 = vmul.f32 %v5259_v15, %v3521_v32  ;;  %v2431_v54 = vrot.slane %v2371_v57, 4  ;;  %v2492_v56 = vmul.f32 %v4544_v9, %v2229_v38  ;;  %v2314_v7 = vsel %vm961_vm1, %v2311_v22, %v2313_v42  ;;  %v5263_v15 = vld [vmem:[#allocation5_spill] sm:$0xff] }
 0x153   : > { %v2430_v3 = vrot.slane %v2370_v5, 4  ;;  %v2348_v8 = vadd.f32 %v2312_v34, %v2156_v16  ;;  %v2550_v63 = vrot.slane %v2490_v40, 4  ;;  %v2349_v44 = vadd.f32 %v2314_v7, %v2157_v31 }
 0x154   : > { %v2433_v60 = vrot.slane %v2372_v45, 4  ;;  %v2551_v4 = vrot.slane %v2491_v14, 4  ;;  %v2553_v24 = vrot.slane %v2492_v56, 4  ;;  %v274_v36 = vmax.bf16 %v5147_v53, %v250_v11  ;;  %v5264_v11 = vld [vmem:[#allocation6_spill] sm:$0xff] }
 0x155   : > { %v2432_v43 = vsel %vm961_vm1, %v2430_v3, %v2431_v54  ;;  %v275_v1 = vmax.bf16 %v5147_v53, %v251_v23  ;;  %v318_v12 = vmul.f32 %v3372_v17, %v5260_v59  ;;  %v319_v38 = vmul.f32 %v3372_v17, %v4106_v6 }
 0x156   : > { %v2434_v50 = vsel %vm961_vm1, %v2431_v54, %v2433_v60  ;;  %v2468_v0 = vadd.f32 %v2432_v43, %v2348_v8  ;;  %v2552_v21 = vsel %vm961_vm1, %v2550_v63, %v2551_v4  ;;  %v2554_v33 = vsel %vm961_vm1, %v2551_v4, %v2553_v24  ;;  %v5265_v63 = vld [vmem:[#allocation25_spill] sm:$0xff] }
 0x157   : > { %v2469_v62 = vadd.f32 %v2434_v50, %v2349_v44  ;;  %v298_v16 = vunpack.c.l.bf16 %v274_v36  ;;  %v4818_v31 = vunpack.c.l.bf16 %v275_v1  ;;  %v5262_v22 = vunpack.c.l.bf16 %v5261_v30 }
 0x158   : > { %v2588_v10 = vadd.f32 %v2552_v21, %v2468_v0  ;;  %v339_v37 = vmul.f32 %v3375_v18, %v4472_v55  ;;  %v438_v5 = vmax.bf16 %v5147_v53, %v414_v35  ;;  %v439_v46 = vmax.bf16 %v5147_v53, %v415_v47  ;;  %v5267_v0 = vld [vmem:[#allocation2_spill] sm:$0xff]  ;;  %v860_v47 = vld [vmem:[%s3353_s26 + $0x8c] sm:$0x3] }
 0x159   : > { %v2589_v28 = vadd.f32 %v2554_v33, %v2469_v62  ;;  %v338_v61 = vmul.f32 %v3375_v18, %v5262_v22  ;;  %v374_v57 = vmul.f32 %v3378_v19, %v298_v16  ;;  %v375_v42 = vmul.f32 %v3378_v19, %v4818_v31 }
 0x15a   : > { %v489_v45 = vmul.f32 %v3389_v26, %v5263_v15  ;;  %v355_v34 = vadd.f32 %v339_v37, %v319_v38  ;;  %v462_v3 = vunpack.c.l.bf16 %v438_v5  ;;  %v463_v54 = vunpack.c.l.bf16 %v439_v46 }
 0x15b   : > { %v2598_v40 = vpack.c.bf16 %v2589_v28, %v2588_v10  ;;  %v354_v14 = vadd.f32 %v338_v61, %v318_v12  ;;  %v490_v56 = vmul.f32 %v3389_v26, %v4106_v6  ;;  %v491_v23 = vmul.f32 %v3389_v26, %v5264_v11  ;;  %v859_v12 = vld [vmem:[%s3353_s26 + $0x84] sm:$0xc] }
 0x15c   : > { %v552_v7 = vrot.slane %v489_v45, 2  ;;  %v391_v60 = vadd.f32 %v375_v42, %v355_v34  ;;  %v5266_v44 = vunpack.c.l.bf16 %v5265_v63  ;;  %v615_v4 = vmul.f32 %v3463_v25, %v4472_v55 }
 0x15d   : > { %3269 = vmatprep.mubr.bf16.mxu1 %v2598_v40  ;;  %v390_v8 = vadd.f32 %v374_v57, %v354_v14  ;;  %v553_v24 = vrot.slane %v490_v56, 2  ;;  %v555_v50 = vrot.slane %v491_v23, 2  ;;  %v5268_v36 = vunpack.c.l.bf16 %v5267_v0  ;;  %v5269_v14 = vld [vmem:[#allocation8_spill] sm:$0xff] }
 0x15e   : > { %v614_v43 = vmul.f32 %v3463_v25, %v5266_v44  ;;  %v738_v35 = vmul.f32 %v3466_v27, %v462_v3  ;;  %v677_v21 = vrot.slane %v615_v4, 2  ;;  %v739_v33 = vmul.f32 %v3466_v27, %v4818_v31  ;;  %v4866_v44 = vpop.f32.mrb[0].mxu1  ;;  %v5271_v4 = vld [vmem:[#allocation3_spill] sm:$0xff] }
 0x15f   : > { %v616_v1 = vmul.f32 %v3463_v25, %v5268_v36  ;;  %v740_v59 = vmul.f32 %v3466_v27, %v463_v54  ;;  %v554_v10 = vsel %vm516_vm0, %v552_v7, %v553_v24  ;;  %v556_v16 = vsel %vm516_vm0, %v553_v24, %v555_v50  ;;  %v5273_v36 = vld [vmem:[#allocation26_spill] sm:$0xff] }
 0x160   : > { %v676_v62 = vrot.slane %v614_v43, 2  ;;  %v800_v28 = vrot.slane %v738_v35, 2  ;;  %v587_v30 = vadd.f32 %v554_v10, %v390_v8  ;;  %v588_v22 = vadd.f32 %v556_v16, %v391_v60  ;;  %v5270_v8 = vld [vmem:[#allocation9_spill] sm:$0xff]  ;;  %v4876_v35 = vpop.f32.mrb[1].mxu1 }
 0x161   : > { %v679_v38 = vrot.slane %v616_v1, 2  ;;  %v801_v37 = vrot.slane %v739_v33, 2  ;;  %v803_v57 = vrot.slane %v740_v59, 2  ;;  %v883_v42 = vmax.bf16 %v5147_v53, %v859_v12  ;;  %v2981_v12 = vld [vmem:[%s3353_s26 + $0xe4] sm:$0xf] }
 0x162   : > { %v678_v61 = vsel %vm516_vm0, %v676_v62, %v677_v21  ;;  %v884_v46 = vmax.bf16 %v5147_v53, %v860_v47  ;;  %v934_v34 = vmul.f32 %v3514_v29, %v5269_v14  ;;  %v935_v11 = vmul.f32 %v3514_v29, %v4106_v6  ;;  %v4883_v47 = vpop.f32.mrb[2].mxu1 }
 0x163   : > { %v680_v5 = vsel %vm516_vm0, %v677_v21, %v679_v38  ;;  %v711_v15 = vadd.f32 %v678_v61, %v587_v30  ;;  %v802_v40 = vsel %vm516_vm0, %v800_v28, %v801_v37  ;;  %v804_v3 = vsel %vm516_vm0, %v801_v37, %v803_v57  ;;  %v2982_v28 = vld [vmem:[%s3353_s26 + $0xe8] sm:$0xf]  ;;  %v4887_v30 = vpop.f32.mrb[3].mxu1 }
 0x164   : > { %v712_v45 = vadd.f32 %v680_v5, %v588_v22  ;;  %v907_v54 = vunpack.c.l.bf16 %v883_v42  ;;  %v908_v56 = vunpack.c.l.bf16 %v884_v46  ;;  %v936_v60 = vmul.f32 %v3514_v29, %v5270_v8 }
 0x165   : > { %v835_v23 = vadd.f32 %v802_v40, %v711_v15  ;;  %v997_v63 = vrot.slane %v934_v34, 4  ;;  %v998_v43 = vrot.slane %v935_v11, 4  ;;  %v5272_v24 = vunpack.c.l.bf16 %v5271_v4  ;;  %v3005_v34 = vld [vmem:[%s3353_s26 + $0xe4] sm:$0xe] }
 0x166   : > { %v836_v7 = vadd.f32 %v804_v3, %v712_v45  ;;  %v1060_v0 = vmul.f32 %v3521_v32, %v4472_v55  ;;  %v5274_v1 = vunpack.c.l.bf16 %v5273_v36  ;;  %v1000_v62 = vrot.slane %v936_v60, 4  ;;  %v3006_v3 = vld [vmem:[%s3353_s26 + $0xec] sm:$0x1]  ;;  %v5275_v11 = vld [vmem:[#allocation10_spill] sm:$0xff] }
 0x167   : > { %v1059_v50 = vmul.f32 %v3521_v32, %v5272_v24  ;;  %v1183_v21 = vmul.f32 %v4544_v9, %v907_v54  ;;  %v1184_v33 = vmul.f32 %v4544_v9, %v4818_v31  ;;  %v1185_v59 = vmul.f32 %v4544_v9, %v908_v56 }
 0x168   : > { %v1061_v6 = vmul.f32 %v3521_v32, %v5274_v1  ;;  %v999_v10 = vsel %vm961_vm1, %v997_v63, %v998_v43  ;;  %v1122_v16 = vrot.slane %v1060_v0, 4  ;;  %v1001_v22 = vsel %vm961_vm1, %v998_v43, %v1000_v62  ;;  %v5276_v43 = vld [vmem:[#allocation27_spill] sm:$0xff] }
 0x169   : > { %v1121_v55 = vrot.slane %v1059_v50, 4  ;;  %v1032_v61 = vadd.f32 %v999_v10, %v835_v23  ;;  %v1245_v37 = vrot.slane %v1183_v21, 4  ;;  %v1246_v31 = vrot.slane %v1184_v33, 4  ;;  %v5278_v21 = vld [vmem:[#allocation13_spill] sm:$0xff] }
 0x16a   : > { %v1124_v38 = vrot.slane %v1061_v6, 4  ;;  %v1033_v5 = vadd.f32 %v1001_v22, %v836_v7  ;;  %v1248_v46 = vrot.slane %v1185_v59, 4  ;;  %v1622_v40 = vmax.bf16 %v5147_v53, %v2981_v12 }
 0x16b   : > { %v1123_v57 = vsel %vm961_vm1, %v1121_v55, %v1122_v16  ;;  %v1247_v45 = vsel %vm961_vm1, %v1245_v37, %v1246_v31  ;;  %v1623_v14 = vmax.bf16 %v5147_v53, %v2982_v28  ;;  %v1662_v23 = vmul.f32 %v5275_v11, %v3372_v17  ;;  %v3030_v11 = vld [vmem:[%s3353_s26 + $0xec] sm:$0x3] }
 0x16c   : > { %v1125_v42 = vsel %vm961_vm1, %v1122_v16, %v1124_v38  ;;  %v1156_v15 = vadd.f32 %v1123_v57, %v1032_v61  ;;  %v1249_v56 = vsel %vm961_vm1, %v1246_v31, %v1248_v46  ;;  %v1663_v7 = vmul.f32 %v4197_v48, %v3372_v17  ;;  %v5279_v38 = vld [vmem:[#allocation14_spill] sm:$0xff]  ;;  %v5282_v57 = vld [vmem:[#allocation11_spill] sm:$0xff] }
 0x16d   : > { %v1157_v54 = vadd.f32 %v1125_v42, %v1033_v5  ;;  %v1646_v60 = vunpack.c.l.bf16 %v1622_v40  ;;  %v4902_v63 = vunpack.c.l.bf16 %v1623_v14  ;;  %v5277_v4 = vunpack.c.l.bf16 %v5276_v43  ;;  %v3029_v14 = vld [vmem:[%s3353_s26 + $0xe4] sm:$0xc] }
 0x16e   : > { %v1280_v8 = vadd.f32 %v1247_v45, %v1156_v15  ;;  %v1679_v0 = vmul.f32 %v4573_v58, %v3375_v18  ;;  %v1774_v36 = vmax.bf16 %v5147_v53, %v3005_v34  ;;  %v1775_v1 = vmax.bf16 %v5147_v53, %v3006_v3 }
 0x16f   : > { %v1678_v24 = vmul.f32 %v5277_v4, %v3375_v18  ;;  %v1281_v50 = vadd.f32 %v1249_v56, %v1157_v54  ;;  %v1710_v62 = vmul.f32 %v1646_v60, %v3378_v19  ;;  %v1711_v17 = vmul.f32 %v4902_v63, %v3378_v19  ;;  %v5280_v19 = vld [vmem:[#allocation7_spill] sm:$0xff] }
 0x170   : > { %v1821_v33 = vmul.f32 %v5278_v21, %v3389_v26  ;;  %v1695_v12 = vadd.f32 %v1679_v0, %v1663_v7  ;;  %v1798_v10 = vunpack.c.l.bf16 %v1774_v36  ;;  %v1799_v55 = vunpack.c.l.bf16 %v1775_v1 }
 0x171   : > { %v1694_v6 = vadd.f32 %v1678_v24, %v1662_v23  ;;  %v1289_v59 = vpack.c.bf16 %v1281_v50, %v1280_v8  ;;  %v1822_v18 = vmul.f32 %v4197_v48, %v3389_v26  ;;  %v1823_v28 = vmul.f32 %v5279_v38, %v3389_v26 }
 0x172   : > { %v1883_v22 = vrot.slane %v1821_v33, 2  ;;  %v1727_v61 = vadd.f32 %v1711_v17, %v1695_v12  ;;  %v5281_v37 = vunpack.c.l.bf16 %v5280_v19  ;;  %v1942_v5 = vmul.f32 %v4573_v58, %v3463_v25 }
 0x173   : > { %v1726_v16 = vadd.f32 %v1710_v62, %v1694_v6  ;;  %3238 = vmatmul.mubr.bf16.gmra.mrb[12].mxu0 %v1289_v59  ;;  %v5283_v42 = vunpack.c.l.bf16 %v5282_v57  ;;  %v1884_v15 = vrot.slane %v1822_v18, 2  ;;  %v1886_v45 = vrot.slane %v1823_v28, 2 }
 0x174   : > { %v1941_v31 = vmul.f32 %v5281_v37, %v3463_v25  ;;  %v2061_v40 = vmul.f32 %v1798_v10, %v3466_v27  ;;  %v2062_v26 = vmul.f32 %v4902_v63, %v3466_v27  ;;  %v2004_v3 = vrot.slane %v1942_v5, 2 }
 0x175   : > { %v1943_v46 = vmul.f32 %v5283_v42, %v3463_v25  ;;  %v2063_v56 = vmul.f32 %v1799_v55, %v3466_v27  ;;  %v1885_v23 = vsel %vm516_vm0, %v1883_v22, %v1884_v15  ;;  %v1887_v7 = vsel %vm516_vm0, %v1884_v15, %v1886_v45 }
 0x176   : > { %v2003_v34 = vrot.slane %v1941_v31, 2  ;;  %v2123_v8 = vrot.slane %v2061_v40, 2  ;;  %v2124_v25 = vrot.slane %v2062_v26, 2  ;;  %v1918_v60 = vadd.f32 %v1885_v23, %v1726_v16 }
 0x177   : > { %v2006_v54 = vrot.slane %v1943_v46, 2  ;;  %v1919_v43 = vadd.f32 %v1887_v7, %v1727_v61  ;;  %v2126_v0 = vrot.slane %v2063_v56, 2  ;;  %v2206_v36 = vmax.bf16 %v5147_v53, %v3029_v14 }
 0x178   : > { %v2005_v4 = vsel %vm516_vm0, %v2003_v34, %v2004_v3  ;;  %v2125_v50 = vsel %vm516_vm0, %v2123_v8, %v2124_v25  ;;  %v2207_v27 = vmax.bf16 %v5147_v53, %v3030_v11  ;;  %v2253_v62 = vmul.f32 %v4248_v13, %v3514_v29 }
 0x179   : > { %v2007_v24 = vsel %vm516_vm0, %v2004_v3, %v2006_v54  ;;  %v2038_v1 = vadd.f32 %v2005_v4, %v1918_v60  ;;  %v2254_v17 = vmul.f32 %v4197_v48, %v3514_v29  ;;  %v2127_v21 = vsel %vm516_vm0, %v2124_v25, %v2126_v0 }
 0x17a   : > { %v2039_v6 = vadd.f32 %v2007_v24, %v1919_v43  ;;  %v2230_v33 = vunpack.c.l.bf16 %v2206_v36  ;;  %v2231_v59 = vunpack.c.l.bf16 %v2207_v27  ;;  %v2255_v12 = vmul.f32 %v4250_v49, %v3514_v29 }
 0x17b   : > { %v2158_v10 = vadd.f32 %v2125_v50, %v2038_v1  ;;  %v2315_v16 = vrot.slane %v2253_v62, 4  ;;  %v2316_v53 = vrot.slane %v2254_v17, 4  ;;  %v5284_v38 = vunpack.c.l.bf16 %v4620_v20 }
 0x17c   : > { %v2159_v55 = vadd.f32 %v2127_v21, %v2039_v6  ;;  %v2318_v18 = vrot.slane %v2255_v12, 4  ;;  %v2374_v48 = vmul.f32 %v4573_v58, %v3521_v32  ;;  %v5285_v28 = vunpack.c.l.bf16 %v4623_v41 }
 0x17d   : > { %v2373_v13 = vmul.f32 %v5284_v38, %v3521_v32  ;;  %v2317_v61 = vsel %vm961_vm1, %v2315_v16, %v2316_v53  ;;  %v2493_v29 = vmul.f32 %v4544_v9, %v2230_v33  ;;  %v2494_v49 = vmul.f32 %v4544_v9, %v4902_v63 }
 0x17e   : > { %v2375_v22 = vmul.f32 %v5285_v28, %v3521_v32  ;;  %v2495_v19 = vmul.f32 %v4544_v9, %v2231_v59  ;;  %v2319_v37 = vsel %vm961_vm1, %v2316_v53, %v2318_v18  ;;  %v2350_v20 = vadd.f32 %v2317_v61, %v2158_v10 }
 0x17f   : > { %v2435_v31 = vrot.slane %v2373_v13, 4  ;;  %v2436_v5 = vrot.slane %v2374_v48, 4  ;;  %v2351_v58 = vadd.f32 %v2319_v37, %v2159_v55  ;;  %v2555_v42 = vrot.slane %v2493_v29, 4 }
 0x180   : > { %v2438_v57 = vrot.slane %v2375_v22, 4  ;;  %v2556_v41 = vrot.slane %v2494_v49, 4  ;;  %v2558_v46 = vrot.slane %v2495_v19, 4  ;;  %v3090_v26 = vpack.c.bf16 %v4776_v2, %v4769_v51 }
 0x181   : > { %v2437_v32 = vsel %vm961_vm1, %v2435_v31, %v2436_v5  ;;  %v1537_v34 = vmul.f32 %v4774_v52, %v4774_v52  ;;  %v3130_v3 = vpack.c.bf16 %v4883_v47, %v4866_v44  ;;  %v3085_v56 = vpack.c.bf16 %v4781_v39, %v4774_v52 }
 0x182   : > { %v2439_v15 = vsel %vm961_vm1, %v2436_v5, %v2438_v57  ;;  %v2470_v45 = vadd.f32 %v2437_v32, %v2350_v20  ;;  %v2557_v63 = vsel %vm961_vm1, %v2555_v42, %v2556_v41  ;;  %v2559_v40 = vsel %vm961_vm1, %v2556_v41, %v2558_v46  ;;  %3162 = vst [vmem:[%s4969_s24 + $0x8] sm:$0xff] %v3090_v26  }
 0x183   : > { %v2471_v9 = vadd.f32 %v2439_v15, %v2351_v58  ;;  %v1515_v11 = vadd.f32 %v4781_v39, %v4774_v52  ;;  %v1538_v23 = vmul.f32 %v4781_v39, %v4781_v39  ;;  %v2799_v7 = vmul.f32 %v4876_v35, %v4876_v35  ;;  %3170 = vst [vmem:[%s4969_s24 + $0x48] sm:$0xff] %v3130_v3  }
 0x184   : > { %v2590_v14 = vadd.f32 %v2557_v63, %v2470_v45  ;;  %v3125_v8 = vpack.c.bf16 %v4887_v30, %v4876_v35  ;;  %v2777_v25 = vadd.f32 %v4887_v30, %v4876_v35  ;;  %v2800_v60 = vmul.f32 %v4887_v30, %v4887_v30  ;;  %3086 = vst [vmem:[%s4969_s24] sm:$0xff] %v3085_v56  }
 0x185   : > { %v2591_v54 = vadd.f32 %v2559_v40, %v2471_v9  ;;  %v1539_v52 = vmul.f32 %v4769_v51, %v4769_v51  ;;  %v1516_v39 = vadd.f32 %v4769_v51, %v1515_v11  ;;  %v1553_v4 = vadd.f32 %v1538_v23, %v1537_v34 }
 0x186   : > { %v2801_v24 = vmul.f32 %v4866_v44, %v4866_v44  ;;  %3169 = vst [vmem:[%s4969_s24 + $0x40] sm:$0xff] %v3125_v8   ;;  %v2778_v50 = vadd.f32 %v4866_v44, %v2777_v25  ;;  %v2815_v0 = vadd.f32 %v2800_v60, %v2799_v7  ;;  %v1540_v35 = vmul.f32 %v4776_v2, %v4776_v2 }
 0x187   : > { %v2599_v43 = vpack.c.bf16 %v2591_v54, %v2590_v14  ;;  %v1554_v30 = vadd.f32 %v1553_v4, %v1539_v52  ;;  %v1517_v36 = vadd.f32 %v4776_v2, %v1516_v39  ;;  %v2802_v27 = vmul.f32 %v4883_v47, %v4883_v47 }
 0x188   : > { %v2816_v51 = vadd.f32 %v2815_v0, %v2801_v24  ;;  %v2779_v1 = vadd.f32 %v4883_v47, %v2778_v50 }
 0x189   : > { %3270 = vmatmul.mubr.bf16.gmra.mrb[12].mxu1 %v2599_v43  ;;  %v1555_v6 = vadd.f32 %v1554_v30, %v1540_v35 }
 0x18a   : > { %v2817_v62 = vadd.f32 %v2816_v51, %v2802_v27 }
 0x19b   : > { %v3231_v17 = vpop.f32.mrb[4].mxu0 }
 0x19c   : > { %v1388_v44 = vpop.f32.mrb[5].mxu0  ;;  %v1543_v18 = vmul.f32 %v3231_v17, %v3231_v17 }
 0x19d   : > { %v1518_v21 = vadd.f32 %v1517_v36, %v1388_v44  ;;  %v1541_v33 = vmul.f32 %v1388_v44, %v1388_v44  ;;  %v3232_v59 = vpop.f32.mrb[6].mxu0 }
 0x19e   : > { %v3100_v12 = vpack.c.bf16 %v3232_v59, %v3231_v17  ;;  %v1391_v10 = vpop.f32.mrb[7].mxu0  ;;  %v1544_v47 = vmul.f32 %v3232_v59, %v3232_v59 }
 0x19f   : > { %v1556_v55 = vadd.f32 %v1555_v6, %v1541_v33  ;;  %v3095_v16 = vpack.c.bf16 %v1391_v10, %v1388_v44  ;;  %v1519_v2 = vadd.f32 %v1518_v21, %v1391_v10  ;;  %v1542_v53 = vmul.f32 %v1391_v10, %v1391_v10 }
 0x1a0   : > { %3164 = vst [vmem:[%s4969_s24 + $0x18] sm:$0xff] %v3100_v12  }
 0x1a1   : > { %3163 = vst [vmem:[%s4969_s24 + $0x10] sm:$0xff] %v3095_v16   ;;  %v1520_v38 = vadd.f32 %v3231_v17, %v1519_v2  ;;  %v1557_v13 = vadd.f32 %v1556_v55, %v1542_v53 }
 0x1a3   : > { %v1558_v48 = vadd.f32 %v1557_v13, %v1543_v18  ;;  %v1521_v28 = vadd.f32 %v3232_v59, %v1520_v38 }
 0x1a5   : > { %v1559_v22 = vadd.f32 %v1558_v48, %v1544_v47 }
 0x1b1   : > { %v3263_v61 = vpop.f32.mrb[4].mxu1 }
 0x1b2   : > { %v2650_v29 = vpop.f32.mrb[5].mxu1  ;;  %v2805_v41 = vmul.f32 %v3263_v61, %v3263_v61 }
 0x1b3   : > { %v2780_v49 = vadd.f32 %v2779_v1, %v2650_v29  ;;  %v2803_v19 = vmul.f32 %v2650_v29, %v2650_v29  ;;  %v3264_v37 = vpop.f32.mrb[6].mxu1 }
 0x1b4   : > { %v3140_v20 = vpack.c.bf16 %v3264_v37, %v3263_v61  ;;  %v2653_v31 = vpop.f32.mrb[7].mxu1  ;;  %v2806_v15 = vmul.f32 %v3264_v37, %v3264_v37 }
 0x1b5   : > { %v2818_v5 = vadd.f32 %v2817_v62, %v2803_v19  ;;  %v3135_v58 = vpack.c.bf16 %v2653_v31, %v2650_v29  ;;  %v2781_v57 = vadd.f32 %v2780_v49, %v2653_v31  ;;  %v2804_v42 = vmul.f32 %v2653_v31, %v2653_v31 }
 0x1b6   : > { %3172 = vst [vmem:[%s4969_s24 + $0x58] sm:$0xff] %v3140_v20  }
 0x1b7   : > { %3171 = vst [vmem:[%s4969_s24 + $0x50] sm:$0xff] %v3135_v58   ;;  %v2782_v32 = vadd.f32 %v3263_v61, %v2781_v57  ;;  %v2819_v46 = vadd.f32 %v2818_v5, %v2804_v42 }
 0x1b9   : > { %v2820_v45 = vadd.f32 %v2819_v46, %v2805_v41  ;;  %v2783_v63 = vadd.f32 %v3264_v37, %v2782_v32 }
 0x1bb   : > { %v2821_v9 = vadd.f32 %v2820_v45, %v2806_v15 }
 0x1ee   : > { %v3235_v40 = vpop.f32.mrb[8].mxu0 }
 0x1ef   : > { %v1404_v26 = vpop.f32.mrb[9].mxu0  ;;  %v1547_v25 = vmul.f32 %v3235_v40, %v3235_v40 }
 0x1f0   : > { %v1522_v14 = vadd.f32 %v1521_v28, %v1404_v26  ;;  %v1545_v34 = vmul.f32 %v1404_v26, %v1404_v26  ;;  %v3236_v3 = vpop.f32.mrb[10].mxu0 }
 0x1f1   : > { %v3110_v54 = vpack.c.bf16 %v3236_v3, %v3235_v40  ;;  %v1407_v56 = vpop.f32.mrb[11].mxu0  ;;  %v1548_v52 = vmul.f32 %v3236_v3, %v3236_v3 }
 0x1f2   : > { %v1560_v11 = vadd.f32 %v1559_v22, %v1545_v34  ;;  %v3105_v23 = vpack.c.bf16 %v1407_v56, %v1404_v26  ;;  %v1523_v7 = vadd.f32 %v1522_v14, %v1407_v56  ;;  %v1546_v8 = vmul.f32 %v1407_v56, %v1407_v56 }
 0x1f3   : > { %3166 = vst [vmem:[%s4969_s24 + $0x28] sm:$0xff] %v3110_v54  }
 0x1f4   : > { %3165 = vst [vmem:[%s4969_s24 + $0x20] sm:$0xff] %v3105_v23   ;;  %v1524_v60 = vadd.f32 %v3235_v40, %v1523_v7  ;;  %v1561_v43 = vadd.f32 %v1560_v11, %v1546_v8 }
 0x1f6   : > { %v1562_v39 = vadd.f32 %v1561_v43, %v1547_v25  ;;  %v1525_v4 = vadd.f32 %v3236_v3, %v1524_v60 }
 0x1f8   : > { %v1563_v24 = vadd.f32 %v1562_v39, %v1548_v52 }
 0x203   : > { %v3267_v50 = vpop.f32.mrb[8].mxu1 }
 0x204   : > { %v2666_v0 = vpop.f32.mrb[9].mxu1  ;;  %v2809_v44 = vmul.f32 %v3267_v50, %v3267_v50 }
 0x205   : > { %v2784_v35 = vadd.f32 %v2783_v63, %v2666_v0  ;;  %v2807_v30 = vmul.f32 %v2666_v0, %v2666_v0  ;;  %v3268_v36 = vpop.f32.mrb[10].mxu1 }
 0x206   : > { %v3150_v27 = vpack.c.bf16 %v3268_v36, %v3267_v50  ;;  %v2669_v51 = vpop.f32.mrb[11].mxu1  ;;  %v2810_v59 = vmul.f32 %v3268_v36, %v3268_v36 }
 0x207   : > { %v2822_v1 = vadd.f32 %v2821_v9, %v2807_v30  ;;  %v3145_v6 = vpack.c.bf16 %v2669_v51, %v2666_v0  ;;  %v2785_v62 = vadd.f32 %v2784_v35, %v2669_v51  ;;  %v2808_v17 = vmul.f32 %v2669_v51, %v2669_v51 }
 0x208   : > { %3174 = vst [vmem:[%s4969_s24 + $0x68] sm:$0xff] %v3150_v27  }
 0x209   : > { %3173 = vst [vmem:[%s4969_s24 + $0x60] sm:$0xff] %v3145_v6   ;;  %v2786_v21 = vadd.f32 %v3267_v50, %v2785_v62  ;;  %v2823_v33 = vadd.f32 %v2822_v1, %v2808_v17 }
 0x20b   : > { %v2824_v12 = vadd.f32 %v2823_v33, %v2809_v44  ;;  %v2787_v10 = vadd.f32 %v3268_v36, %v2786_v21 }
 0x20d   : > { %v2825_v55 = vadd.f32 %v2824_v12, %v2810_v59 }
 0x246   : > { %v3239_v16 = vpop.f32.mrb[12].mxu0 }
 0x247   : > { %v1420_v2 = vpop.f32.mrb[13].mxu0  ;;  %v1551_v29 = vmul.f32 %v3239_v16, %v3239_v16 }
 0x248   : > { %v1526_v53 = vadd.f32 %v1525_v4, %v1420_v2  ;;  %v1549_v18 = vmul.f32 %v1420_v2, %v1420_v2  ;;  %v3240_v38 = vpop.f32.mrb[14].mxu0 }
 0x249   : > { %v3120_v13 = vpack.c.bf16 %v3240_v38, %v3239_v16  ;;  %v1423_v47 = vpop.f32.mrb[15].mxu0  ;;  %v1552_v37 = vmul.f32 %v3240_v38, %v3240_v38 }
 0x24a   : > { %v1564_v48 = vadd.f32 %v1563_v24, %v1549_v18  ;;  %v3115_v28 = vpack.c.bf16 %v1423_v47, %v1420_v2  ;;  %v1527_v22 = vadd.f32 %v1526_v53, %v1423_v47  ;;  %v1550_v61 = vmul.f32 %v1423_v47, %v1423_v47 }
 0x24b   : > { %3168 = vst [vmem:[%s4969_s24 + $0x38] sm:$0xff] %v3120_v13  }
 0x24c   : > { %3167 = vst [vmem:[%s4969_s24 + $0x30] sm:$0xff] %v3115_v28   ;;  %v1528_v49 = vadd.f32 %v3239_v16, %v1527_v22  ;;  %v1565_v19 = vadd.f32 %v1564_v48, %v1550_v61 }
 0x24e   : > { %v1529_v20 = vadd.f32 %v3240_v38, %v1528_v49  ;;  %v1566_v31 = vadd.f32 %v1565_v19, %v1551_v29 }
 0x250   : > { %v1567_v5 = vadd.f32 %v1566_v31, %v1552_v37  ;;  %v1530_v58 = vrot.slane %v1529_v20, 4 }
 0x252   : > { %v1568_v57 = vrot.slane %v1567_v5, 4  ;;  %v1531_v45 = vadd.f32 %v1530_v58, %v1529_v20 }
 0x254   : > { %v1569_v9 = vadd.f32 %v1568_v57, %v1567_v5  ;;  %v1532_v56 = vrot.slane %v1531_v45, 2 }
 0x256   : > { %v1570_v8 = vrot.slane %v1569_v9, 2  ;;  %v1533_v43 = vadd.f32 %v1532_v56, %v1531_v45 }
 0x258   : > { %v1571_v4 = vadd.f32 %v1570_v8, %v1569_v9  ;;  %v1534_v0 = vrot.slane %v1533_v43, 1 }
 0x25a   : > { %v1572_v36 = vrot.slane %v1571_v4, 1  ;;  %v1535_v1 = vadd.f32 %v1534_v0, %v1533_v43 }
 0x25c   : > { %v3271_v42 = vpop.f32.mrb[12].mxu1  ;;  %v1573_v17 = vadd.f32 %v1572_v36, %v1571_v4 }
 0x25d   : > { %v2682_v41 = vpop.f32.mrb[13].mxu1  ;;  %v2813_v54 = vmul.f32 %v3271_v42, %v3271_v42 }
 0x25e   : > { %v2788_v32 = vadd.f32 %v2787_v10, %v2682_v41  ;;  %v2811_v46 = vmul.f32 %v2682_v41, %v2682_v41  ;;  %v3272_v15 = vpop.f32.mrb[14].mxu1 }
 0x25f   : > { %v3160_v63 = vpack.c.bf16 %v3272_v15, %v3271_v42  ;;  %v2685_v40 = vpop.f32.mrb[15].mxu1  ;;  %v2814_v7 = vmul.f32 %v3272_v15, %v3272_v15 }
 0x260   : > { %v2826_v26 = vadd.f32 %v2825_v55, %v2811_v46  ;;  %v3155_v14 = vpack.c.bf16 %v2685_v40, %v2682_v41  ;;  %v2789_v34 = vadd.f32 %v2788_v32, %v2685_v40  ;;  %v2812_v3 = vmul.f32 %v2685_v40, %v2685_v40 }
 0x261   : > { %3176 = vst [vmem:[%s4969_s24 + $0x78] sm:$0xff] %v3160_v63  }
 0x262   : > { %3175 = vst [vmem:[%s4969_s24 + $0x70] sm:$0xff] %v3155_v14   ;;  %v2790_v11 = vadd.f32 %v3271_v42, %v2789_v34  ;;  %v2827_v23 = vadd.f32 %v2826_v26, %v2812_v3 }
 0x264   : > { %v2791_v25 = vadd.f32 %v3272_v15, %v2790_v11  ;;  %v2828_v60 = vadd.f32 %v2827_v23, %v2813_v54 }
 0x266   : > { %v2792_v52 = vrot.slane %v2791_v25, 4  ;;  %v2829_v39 = vadd.f32 %v2828_v60, %v2814_v7 }
 0x268   : > { %v2793_v24 = vadd.f32 %v2792_v52, %v2791_v25  ;;  %v2830_v50 = vrot.slane %v2829_v39, 4 }
 0x26a   : > { %v2794_v35 = vrot.slane %v2793_v24, 2  ;;  %v2831_v30 = vadd.f32 %v2830_v50, %v2829_v39 }
 0x26c   : > { %v2795_v27 = vadd.f32 %v2794_v35, %v2793_v24  ;;  %v2832_v51 = vrot.slane %v2831_v30, 2 }
 0x26e   : > { %v2796_v6 = vrot.slane %v2795_v27, 1  ;;  %v2833_v62 = vadd.f32 %v2832_v51, %v2831_v30 }
 0x270   : > { %v2797_v44 = vadd.f32 %v2796_v6, %v2795_v27  ;;  %v2834_v21 = vrot.slane %v2833_v62, 1 }
 0x272   : > { %v2798_v33 = vadd.f32 %v2797_v44, %v1535_v1  ;;  %v2835_v59 = vadd.f32 %v2834_v21, %v2833_v62 }
 0x274   : > { %v2836_v12 = vadd.f32 %v2835_v59, %v1573_v17  ;;  %2837 = vst [vmem:[%s208_s28] sm:$0x1] %v2798_v33 }
 0x276   : > { %2838 = vst [vmem:[%s208_s28 + $0x1] sm:$0x1] %v2836_v12 }
 0x277 PF: > { %s15_s15 = sadd.s32 1, %s3299_s15  }
 0x278   : > { %p12_p4 = scmp.ge.s32.totalorder %s15_s15, 4  }
 0x27a   :  { %14 = sbr.rel (!%p12_p4) target bundleno = 1 (0x1), region = 75 }

</bundles_post_ra>
